<compile_context>
chip_gen: v7x
topology: tpu7x:2x2x1
jax: 0.10.0
libtpu: 0.0.40
codegen_flags: <defaults>
</compile_context>

<pallas_src>
import functools

import numpy as np
import jax
import jax.numpy as jnp
from jax.experimental import pallas as pl
from jax.experimental.pallas import tpu as pltpu


CONV_CHANNELS = 32            # out_channels of every encoder conv (=> encoder hidden_size)
KSIZE = 3                     # conv kernel size (stride 2, padding 1)
NUM_CONV_LAYERS = 4
CONV_W_DTYPE = jnp.bfloat16   # bf16 weights on the MXU; f32 accumulate + f32 epilogue


# ---------------------------------------------------------------------------
# The single fused Pallas kernel
# ---------------------------------------------------------------------------
def _actor_kernel(layer_dims,
                  x_ref,
                  w1_ref, b1_ref, w2_ref, b2_ref, w3_ref, b3_ref, w4_ref, b4_ref,
                  wa_ref, ba_ref, wl_ref, bl_ref,
                  prob_ref, feat_ref,
                  p2_ref, p3_ref, p4_ref):
    n_batch = x_ref.shape[0]
    w_refs = (w1_ref, w2_ref, w3_ref, w4_ref)
    b_refs = (b1_ref, b2_ref, b3_ref, b4_ref)
    src_refs = (x_ref, p2_ref, p3_ref, p4_ref)
    dst_refs = (p2_ref, p3_ref, p4_ref, None)

    # Zero the padded intermediate activation buffers (~100 KiB total, border rows matter).
    for p_ref in (p2_ref, p3_ref, p4_ref):
        p_ref[...] = jnp.zeros(p_ref.shape, p_ref.dtype)

    last_out = [None] * n_batch
    for layer, (h, w, _cin, cout) in enumerate(layer_dims):
        oh, ow = h // 2, w // 2
        hp = h + 2
        src, dst = src_refs[layer], dst_refs[layer]
        w_ref, b_ref = w_refs[layer], b_refs[layer]
        bias = b_ref[...]                                   # (1, ow*cout) f32

        # One-hot row-selection sel_kh[o, r] = (r == 2*o + kh): picks the stride-2 H taps
        # with a tiny MXU matmul instead of strided memory access.
        row_i = jax.lax.broadcasted_iota(jnp.int32, (oh, hp), 0)
        col_i = jax.lax.broadcasted_iota(jnp.int32, (oh, hp), 1)

        for n in range(n_batch):
            act = src[n]                                    # (hp, w*cin) f32, H-padded
            acc = None
            for kh in range(KSIZE):
                sel = (col_i == 2 * row_i + kh).astype(jnp.float32)
                rows = jnp.dot(sel, act,
                               preferred_element_type=jnp.float32)      # (oh, w*cin)
                term = jnp.dot(rows.astype(w_ref.dtype), w_ref[kh],
                               preferred_element_type=jnp.float32)      # (oh, ow*cout)
                acc = term if acc is None else acc + term
            out_n = jnp.maximum(acc + bias, 0.0)            # bias + ReLU epilogue (f32)
            if dst is not None:
                dst[n, 1:oh + 1, :] = out_n                 # interior rows of next padded act
            else:
                last_out[n] = out_n                         # (2, 2*cout) final feature map

    # AvgPool2d(2) + flatten folded into the conv4 epilogue: the final map is 2x2 spatial,
    # so pooled/flattened features are the mean of 4 static slices.
    cout = layer_dims[-1][3]
    for n in range(n_batch):
        o = last_out[n]                                     # (2, 2*cout)
        feat_ref[n:n + 1, :] = 0.25 * (o[0:1, 0:cout] + o[0:1, cout:2 * cout]
                                       + o[1:2, 0:cout] + o[1:2, cout:2 * cout])

    # Actor head: probability = Linear(features * softmax(Linear(features), dim=-1))
    feats = feat_ref[...]                                   # (N, hidden) f32
    logits = jnp.dot(feats, wa_ref[...], preferred_element_type=jnp.float32) + ba_ref[...]
    logits = logits - jnp.max(logits, axis=-1, keepdims=True)
    expl = jnp.exp(logits)
    attn = expl / jnp.sum(expl, axis=-1, keepdims=True)
    attended = feats * attn
    prob_ref[...] = (jnp.dot(attended, wl_ref[...], preferred_element_type=jnp.float32)
                     + bl_ref[...]).astype(prob_ref.dtype)


# ---------------------------------------------------------------------------
# Wrapper: one pallas_call per forward, everything else hoisted to init.
# ---------------------------------------------------------------------------
@jax.jit
def actor_forward(states_nchw, params):
    """Fused Actor forward.  states: (N, C, H, W) f32.  Returns (probability, features)."""
    n, c, h, w = states_nchw.shape
    layer_dims = []
    ch, hh, ww = c, h, w
    for _ in range(NUM_CONV_LAYERS):
        layer_dims.append((hh, ww, ch, CONV_CHANNELS))
        hh, ww, ch = hh // 2, ww // 2, CONV_CHANNELS
    hidden = CONV_CHANNELS

    (w1, b1), (w2, b2), (w3, b3), (w4, b4) = params["convs"]
    wa_t, ba = params["attn"]
    wl_t, bl = params["linear"]
    action_space = wl_t.shape[1]

    # One-time input relayout (the only XLA glue in the forward):
    # NCHW -> NHWC -> pad H by 1 -> fuse (W, C) into the lane dimension.
    xk = jnp.transpose(states_nchw, (0, 2, 3, 1))
    xk = jnp.pad(xk, ((0, 0), (1, 1), (0, 0), (0, 0)))
    xk = xk.reshape(n, h + 2, w * c)

    # VMEM scratch for the (H-padded, lane-fused) intermediate activations of layers 2..4.
    scratch = [
        pltpu.VMEM((n, ld[0] // 2 + 2, (ld[1] // 2) * CONV_CHANNELS), jnp.float32)
        for ld in layer_dims[:-1]
    ]

    probability, features = pl.pallas_call(
        functools.partial(_actor_kernel, tuple(layer_dims)),
        out_shape=(
            jax.ShapeDtypeStruct((n, action_space), jnp.float32),
            jax.ShapeDtypeStruct((n, hidden), jnp.float32),
        ),
        scratch_shapes=scratch,
    )(xk, w1, b1, w2, b2, w3, b3, w4, b4, wa_t, ba, wl_t, bl)
    return probability, features


# ---------------------------------------------------------------------------
# Parameter init (PyTorch layout) + one-time packing into kernel layout
# ---------------------------------------------------------------------------
def init_actor_params(key, num_stacked_frames=4, action_space=6):
    """PyTorch-layout parameters (Conv2d / Linear default U(-1/sqrt(fan_in), +))."""
    convs = []
    cin = num_stacked_frames
    for _ in range(NUM_CONV_LAYERS):
        key, kw_key, kb_key = jax.random.split(key, 3)
        fan_in = cin * KSIZE * KSIZE
        bound = 1.0 / np.sqrt(fan_in)
        wc = jax.random.uniform(kw_key, (CONV_CHANNELS, cin, KSIZE, KSIZE),
                                jnp.float32, -bound, bound)
        bc = jax.random.uniform(kb_key, (CONV_CHANNELS,), jnp.float32, -bound, bound)
        convs.append((wc, bc))
        cin = CONV_CHANNELS
    hidden = CONV_CHANNELS
    key, k1, k2, k3, k4 = jax.random.split(key, 5)
    bound = 1.0 / np.sqrt(hidden)
    wa = jax.random.uniform(k1, (hidden, hidden), jnp.float32, -bound, bound)
    ba = jax.random.uniform(k2, (hidden,), jnp.float32, -bound, bound)
    wl = jax.random.uniform(k3, (action_space, hidden), jnp.float32, -bound, bound)
    bl = jax.random.uniform(k4, (action_space,), jnp.float32, -bound, bound)
    return {"convs": convs, "attn": (wa, ba), "linear": (wl, bl)}


def _pack_conv_weight(wc, width, dtype):
    """Fold the stride-2 / pad-1 column taps of a 3x3 conv into a block-sparse matrix.

    big[kh, w*Ci + ci, ow*Co + co] = wc[co, ci, kh, kw]   where w == 2*ow + kw - 1
    (zero elsewhere), so `row(2*oh+kh) @ big[kh]` yields the kh-contribution of the conv
    for every output column at once -- im2col without ever materializing patches.
    """
    co, ci = wc.shape[0], wc.shape[1]
    ow_dim = width // 2
    wc_np = np.asarray(wc, dtype=np.float32)
    big = np.zeros((KSIZE, width * ci, ow_dim * co), np.float32)
    for kh in range(KSIZE):
        for ow in range(ow_dim):
            for kw in range(KSIZE):
                w_col = 2 * ow + kw - 1
                if 0 <= w_col < width:
                    big[kh,
                        w_col * ci:(w_col + 1) * ci,
                        ow * co:(ow + 1) * co] = wc_np[:, :, kh, kw].T
    return jnp.asarray(big, dtype=dtype)


def prepare_kernel_params(params, input_hw):
    """Hoist all weight relayout out of the forward pass (done once at init)."""
    w = input_hw[1]
    packed_convs = []
    for (wc, bc) in params["convs"]:
        ow = w // 2
        bigw = _pack_conv_weight(wc, w, CONV_W_DTYPE)
        bias = jnp.asarray(
            np.tile(np.asarray(bc, np.float32), ow).reshape(1, ow * CONV_CHANNELS))
        packed_convs.append((bigw, bias))
        w //= 2
    wa, ba = params["attn"]
    wl, bl = params["linear"]
    return {
        "convs": packed_convs,
        "attn": (wa.T, ba.reshape(1, -1)),
        "linear": (wl.T, bl.reshape(1, -1)),
    }


# ---------------------------------------------------------------------------
# Pure-JAX reference (exact PyTorch semantics) for validation
# ---------------------------------------------------------------------------
def actor_reference(states_nchw, params):
    h = states_nchw
    for (wc, bc) in params["convs"]:
        h = jax.lax.conv_general_dilated(
            h, wc, window_strides=(2, 2), padding=((1, 1), (1, 1)),
            dimension_numbers=("NCHW", "OIHW", "NCHW"))
        h = jax.nn.relu(h + bc.reshape(1, -1, 1, 1))
    n, c, hh, ww = h.shape
    pooled = h.reshape(n, c, hh // 2, 2, ww // 2, 2).mean(axis=(3, 5))
    feats = pooled.reshape(n, -1)                      # x.view(N, -1)
    wa, ba = params["attn"]
    wl, bl = params["linear"]
    attn = jax.nn.softmax(feats @ wa.T + ba, axis=-1)
    prob = (feats * attn) @ wl.T + bl
    return prob, feats


if __name__ == "__main__":
    key = jax.random.PRNGKey(0)
    kx, kp = jax.random.split(key)
    # NCHW states; 32x32 spatial so 4 stride-2 convs leave 2x2 and AvgPool2d(2) is valid.
    batch, frames, size, actions = 2, 4, 32, 6
    states = jax.random.normal(kx, (batch, frames, size, size), jnp.float32)

    torch_params = init_actor_params(kp, num_stacked_frames=frames, action_space=actions)
    kernel_params = prepare_kernel_params(torch_params, (size, size))

    probability, features = actor_forward(states, kernel_params)
    probability, features = jax.block_until_ready((probability, features))

    assert probability.shape == (batch, actions), probability.shape
    assert features.shape == (batch, CONV_CHANNELS), features.shape
    assert bool(jnp.all(jnp.isfinite(probability)))
    assert bool(jnp.all(jnp.isfinite(features)))

    # Validate against the pure-JAX reference (bf16 conv weights => relaxed tolerance).
    ref_prob, ref_feat = actor_reference(states, torch_params)
    assert np.allclose(np.asarray(features), np.asarray(ref_feat), rtol=0.1, atol=5e-3), (
        float(np.max(np.abs(np.asarray(features) - np.asarray(ref_feat)))))
    assert np.allclose(np.asarray(probability), np.asarray(ref_prob), rtol=0.1, atol=5e-3), (
        float(np.max(np.abs(np.asarray(probability) - np.asarray(ref_prob)))))

    print("KERNEL_OK")
</pallas_src>

<mosaic_0001>
module attributes {stable_mosaic.version = 11 : i64} {
  func.func @_actor_kernel(%arg0: memref<2x34x128xf32, #tpu.memory_space<vmem>>, %arg1: memref<3x128x512xbf16, #tpu.memory_space<vmem>>, %arg2: memref<1x512xf32, #tpu.memory_space<vmem>>, %arg3: memref<3x512x256xbf16, #tpu.memory_space<vmem>>, %arg4: memref<1x256xf32, #tpu.memory_space<vmem>>, %arg5: memref<3x256x128xbf16, #tpu.memory_space<vmem>>, %arg6: memref<1x128xf32, #tpu.memory_space<vmem>>, %arg7: memref<3x128x64xbf16, #tpu.memory_space<vmem>>, %arg8: memref<1x64xf32, #tpu.memory_space<vmem>>, %arg9: memref<32x32xf32, #tpu.memory_space<vmem>>, %arg10: memref<1x32xf32, #tpu.memory_space<vmem>>, %arg11: memref<32x6xf32, #tpu.memory_space<vmem>>, %arg12: memref<1x6xf32, #tpu.memory_space<vmem>>, %arg13: memref<2x6xf32, #tpu.memory_space<vmem>>, %arg14: memref<2x32xf32, #tpu.memory_space<vmem>>, %arg15: memref<2x18x512xf32, #tpu.memory_space<vmem>>, %arg16: memref<2x10x256xf32, #tpu.memory_space<vmem>>, %arg17: memref<2x6x128xf32, #tpu.memory_space<vmem>>) attributes {dimension_semantics = [], scalar_prefetch = 0 : i64, scratch_operands = 3 : i64, tpu.core_type = #tpu.core_type<tc>} {
    %cst = arith.constant 0.000000e+00 : f32
    %0 = vector.broadcast %cst : f32 to vector<2x18x512xf32>
    %c0 = arith.constant 0 : index
    %c0_0 = arith.constant 0 : index
    %c0_1 = arith.constant 0 : index
    %1 = vector.load %arg15[%c0, %c0_0, %c0_1] : memref<2x18x512xf32, #tpu.memory_space<vmem>>, vector<2x18x512xf32>
    tpu.vector_store %arg15[%c0, %c0_0, %c0_1], %0 {strides = array<i32>} : memref<2x18x512xf32, #tpu.memory_space<vmem>>, vector<2x18x512xf32>,
    %cst_2 = arith.constant 0.000000e+00 : f32
    %2 = vector.broadcast %cst_2 : f32 to vector<2x10x256xf32>
    %c0_3 = arith.constant 0 : index
    %c0_4 = arith.constant 0 : index
    %c0_5 = arith.constant 0 : index
    %3 = vector.load %arg16[%c0_3, %c0_4, %c0_5] : memref<2x10x256xf32, #tpu.memory_space<vmem>>, vector<2x10x256xf32>
    tpu.vector_store %arg16[%c0_3, %c0_4, %c0_5], %2 {strides = array<i32>} : memref<2x10x256xf32, #tpu.memory_space<vmem>>, vector<2x10x256xf32>,
    %cst_6 = arith.constant 0.000000e+00 : f32
    %4 = vector.broadcast %cst_6 : f32 to vector<2x6x128xf32>
    %c0_7 = arith.constant 0 : index
    %c0_8 = arith.constant 0 : index
    %c0_9 = arith.constant 0 : index
    %5 = vector.load %arg17[%c0_7, %c0_8, %c0_9] : memref<2x6x128xf32, #tpu.memory_space<vmem>>, vector<2x6x128xf32>
    tpu.vector_store %arg17[%c0_7, %c0_8, %c0_9], %4 {strides = array<i32>} : memref<2x6x128xf32, #tpu.memory_space<vmem>>, vector<2x6x128xf32>,
    %c0_10 = arith.constant 0 : index
    %c0_11 = arith.constant 0 : index
    %6 = vector.load %arg2[%c0_10, %c0_11] : memref<1x512xf32, #tpu.memory_space<vmem>>, vector<1x512xf32>
    %7 = tpu.iota {dimensions = array<i32: 0>} : vector<16x34xi32>
    %8 = tpu.iota {dimensions = array<i32: 1>} : vector<16x34xi32>
    %c0_12 = arith.constant 0 : index
    %c0_13 = arith.constant 0 : index
    %c0_14 = arith.constant 0 : index
    %9 = vector.load %arg0[%c0_12, %c0_13, %c0_14] : memref<2x34x128xf32, #tpu.memory_space<vmem>>, vector<1x34x128xf32>
    %10 = vector.shape_cast %9 : vector<1x34x128xf32> to vector<34x128xf32>
    %c2_i32 = arith.constant 2 : i32
    %11 = vector.broadcast %c2_i32 : i32 to vector<16x34xi32>
    %12 = arith.muli %11, %7 : vector<16x34xi32>
    %c0_i32 = arith.constant 0 : i32
    %13 = vector.broadcast %c0_i32 : i32 to vector<16x34xi32>
    %14 = arith.addi %12, %13 : vector<16x34xi32>
    %15 = arith.cmpi eq, %8, %14 : vector<16x34xi32>
    %16 = arith.extui %15 : vector<16x34xi1> to vector<16x34xi32>
    %17 = arith.sitofp %16 : vector<16x34xi32> to vector<16x34xf32>
    %cst_15 = arith.constant dense<0.000000e+00> : vector<16x128xf32>
    %18 = tpu.matmul %17, %10, %cst_15 {dimension_numbers = #tpu.dot_dimension_numbers<[1], [0], [0], [1], [0, 0, 1, 1], [], []>} : vector<16x34xf32>, vector<34x128xf32>, vector<16x128xf32> -> vector<16x128xf32>
    %19 = arith.truncf %18 : vector<16x128xf32> to vector<16x128xbf16>
    %c0_16 = arith.constant 0 : index
    %c0_17 = arith.constant 0 : index
    %c0_18 = arith.constant 0 : index
    %20 = vector.load %arg1[%c0_16, %c0_17, %c0_18] : memref<3x128x512xbf16, #tpu.memory_space<vmem>>, vector<1x128x512xbf16>
    %21 = vector.shape_cast %20 : vector<1x128x512xbf16> to vector<128x512xbf16>
    %cst_19 = arith.constant dense<0.000000e+00> : vector<16x512xf32>
    %22 = tpu.matmul %19, %21, %cst_19 {dimension_numbers = #tpu.dot_dimension_numbers<[1], [0], [0], [1], [0, 0, 1, 1], [], []>} : vector<16x128xbf16>, vector<128x512xbf16>, vector<16x512xf32> -> vector<16x512xf32>
    %c2_i32_20 = arith.constant 2 : i32
    %23 = vector.broadcast %c2_i32_20 : i32 to vector<16x34xi32>
    %24 = arith.muli %23, %7 : vector<16x34xi32>
    %c1_i32 = arith.constant 1 : i32
    %25 = vector.broadcast %c1_i32 : i32 to vector<16x34xi32>
    %26 = arith.addi %24, %25 : vector<16x34xi32>
    %27 = arith.cmpi eq, %8, %26 : vector<16x34xi32>
    %28 = arith.extui %27 : vector<16x34xi1> to vector<16x34xi32>
    %29 = arith.sitofp %28 : vector<16x34xi32> to vector<16x34xf32>
    %cst_21 = arith.constant dense<0.000000e+00> : vector<16x128xf32>
    %30 = tpu.matmul %29, %10, %cst_21 {dimension_numbers = #tpu.dot_dimension_numbers<[1], [0], [0], [1], [0, 0, 1, 1], [], []>} : vector<16x34xf32>, vector<34x128xf32>, vector<16x128xf32> -> vector<16x128xf32>
    %31 = arith.truncf %30 : vector<16x128xf32> to vector<16x128xbf16>
    %c1 = arith.constant 1 : index
    %c0_22 = arith.constant 0 : index
    %c0_23 = arith.constant 0 : index
    %32 = vector.load %arg1[%c1, %c0_22, %c0_23] : memref<3x128x512xbf16, #tpu.memory_space<vmem>>, vector<1x128x512xbf16>
    %33 = vector.shape_cast %32 : vector<1x128x512xbf16> to vector<128x512xbf16>
    %cst_24 = arith.constant dense<0.000000e+00> : vector<16x512xf32>
    %34 = tpu.matmul %31, %33, %cst_24 {dimension_numbers = #tpu.dot_dimension_numbers<[1], [0], [0], [1], [0, 0, 1, 1], [], []>} : vector<16x128xbf16>, vector<128x512xbf16>, vector<16x512xf32> -> vector<16x512xf32>
    %35 = arith.addf %22, %34 : vector<16x512xf32>
    %c2_i32_25 = arith.constant 2 : i32
    %36 = vector.broadcast %c2_i32_25 : i32 to vector<16x34xi32>
    %37 = arith.muli %36, %7 : vector<16x34xi32>
    %c2_i32_26 = arith.constant 2 : i32
    %38 = vector.broadcast %c2_i32_26 : i32 to vector<16x34xi32>
    %39 = arith.addi %37, %38 : vector<16x34xi32>
    %40 = arith.cmpi eq, %8, %39 : vector<16x34xi32>
    %41 = arith.extui %40 : vector<16x34xi1> to vector<16x34xi32>
    %42 = arith.sitofp %41 : vector<16x34xi32> to vector<16x34xf32>
    %cst_27 = arith.constant dense<0.000000e+00> : vector<16x128xf32>
    %43 = tpu.matmul %42, %10, %cst_27 {dimension_numbers = #tpu.dot_dimension_numbers<[1], [0], [0], [1], [0, 0, 1, 1], [], []>} : vector<16x34xf32>, vector<34x128xf32>, vector<16x128xf32> -> vector<16x128xf32>
    %44 = arith.truncf %43 : vector<16x128xf32> to vector<16x128xbf16>
    %c2 = arith.constant 2 : index
    %c0_28 = arith.constant 0 : index
    %c0_29 = arith.constant 0 : index
    %45 = vector.load %arg1[%c2, %c0_28, %c0_29] : memref<3x128x512xbf16, #tpu.memory_space<vmem>>, vector<1x128x512xbf16>
    %46 = vector.shape_cast %45 : vector<1x128x512xbf16> to vector<128x512xbf16>
    %cst_30 = arith.constant dense<0.000000e+00> : vector<16x512xf32>
    %47 = tpu.matmul %44, %46, %cst_30 {dimension_numbers = #tpu.dot_dimension_numbers<[1], [0], [0], [1], [0, 0, 1, 1], [], []>} : vector<16x128xbf16>, vector<128x512xbf16>, vector<16x512xf32> -> vector<16x512xf32>
    %48 = arith.addf %35, %47 : vector<16x512xf32>
    %49 = vector.broadcast %6 : vector<1x512xf32> to vector<16x512xf32>
    %50 = arith.addf %48, %49 : vector<16x512xf32>
    %cst_31 = arith.constant 0.000000e+00 : f32
    %51 = vector.broadcast %cst_31 : f32 to vector<16x512xf32>
    %52 = arith.maximumf %50, %51 : vector<16x512xf32>
    %c0_32 = arith.constant 0 : index
    %c1_33 = arith.constant 1 : index
    %c0_34 = arith.constant 0 : index
    %53 = vector.load %arg15[%c0_32, %c1_33, %c0_34] : memref<2x18x512xf32, #tpu.memory_space<vmem>>, vector<1x16x512xf32>
    %54 = vector.shape_cast %53 : vector<1x16x512xf32> to vector<16x512xf32>
    %55 = vector.shape_cast %52 : vector<16x512xf32> to vector<1x16x512xf32>
    tpu.vector_store %arg15[%c0_32, %c1_33, %c0_34], %55 {strides = array<i32>} : memref<2x18x512xf32, #tpu.memory_space<vmem>>, vector<1x16x512xf32>,
    %c1_35 = arith.constant 1 : index
    %c0_36 = arith.constant 0 : index
    %c0_37 = arith.constant 0 : index
    %56 = vector.load %arg0[%c1_35, %c0_36, %c0_37] : memref<2x34x128xf32, #tpu.memory_space<vmem>>, vector<1x34x128xf32>
    %57 = vector.shape_cast %56 : vector<1x34x128xf32> to vector<34x128xf32>
    %c2_i32_38 = arith.constant 2 : i32
    %58 = vector.broadcast %c2_i32_38 : i32 to vector<16x34xi32>
    %59 = arith.muli %58, %7 : vector<16x34xi32>
    %c0_i32_39 = arith.constant 0 : i32
    %60 = vector.broadcast %c0_i32_39 : i32 to vector<16x34xi32>
    %61 = arith.addi %59, %60 : vector<16x34xi32>
    %62 = arith.cmpi eq, %8, %61 : vector<16x34xi32>
    %63 = arith.extui %62 : vector<16x34xi1> to vector<16x34xi32>
    %64 = arith.sitofp %63 : vector<16x34xi32> to vector<16x34xf32>
    %cst_40 = arith.constant dense<0.000000e+00> : vector<16x128xf32>
    %65 = tpu.matmul %64, %57, %cst_40 {dimension_numbers = #tpu.dot_dimension_numbers<[1], [0], [0], [1], [0, 0, 1, 1], [], []>} : vector<16x34xf32>, vector<34x128xf32>, vector<16x128xf32> -> vector<16x128xf32>
    %66 = arith.truncf %65 : vector<16x128xf32> to vector<16x128xbf16>
    %c0_41 = arith.constant 0 : index
    %c0_42 = arith.constant 0 : index
    %c0_43 = arith.constant 0 : index
    %67 = vector.load %arg1[%c0_41, %c0_42, %c0_43] : memref<3x128x512xbf16, #tpu.memory_space<vmem>>, vector<1x128x512xbf16>
    %68 = vector.shape_cast %67 : vector<1x128x512xbf16> to vector<128x512xbf16>
    %cst_44 = arith.constant dense<0.000000e+00> : vector<16x512xf32>
    %69 = tpu.matmul %66, %68, %cst_44 {dimension_numbers = #tpu.dot_dimension_numbers<[1], [0], [0], [1], [0, 0, 1, 1], [], []>} : vector<16x128xbf16>, vector<128x512xbf16>, vector<16x512xf32> -> vector<16x512xf32>
    %c2_i32_45 = arith.constant 2 : i32
    %70 = vector.broadcast %c2_i32_45 : i32 to vector<16x34xi32>
    %71 = arith.muli %70, %7 : vector<16x34xi32>
    %c1_i32_46 = arith.constant 1 : i32
    %72 = vector.broadcast %c1_i32_46 : i32 to vector<16x34xi32>
    %73 = arith.addi %71, %72 : vector<16x34xi32>
    %74 = arith.cmpi eq, %8, %73 : vector<16x34xi32>
    %75 = arith.extui %74 : vector<16x34xi1> to vector<16x34xi32>
    %76 = arith.sitofp %75 : vector<16x34xi32> to vector<16x34xf32>
    %cst_47 = arith.constant dense<0.000000e+00> : vector<16x128xf32>
    %77 = tpu.matmul %76, %57, %cst_47 {dimension_numbers = #tpu.dot_dimension_numbers<[1], [0], [0], [1], [0, 0, 1, 1], [], []>} : vector<16x34xf32>, vector<34x128xf32>, vector<16x128xf32> -> vector<16x128xf32>
    %78 = arith.truncf %77 : vector<16x128xf32> to vector<16x128xbf16>
    %c1_48 = arith.constant 1 : index
    %c0_49 = arith.constant 0 : index
    %c0_50 = arith.constant 0 : index
    %79 = vector.load %arg1[%c1_48, %c0_49, %c0_50] : memref<3x128x512xbf16, #tpu.memory_space<vmem>>, vector<1x128x512xbf16>
    %80 = vector.shape_cast %79 : vector<1x128x512xbf16> to vector<128x512xbf16>
    %cst_51 = arith.constant dense<0.000000e+00> : vector<16x512xf32>
    %81 = tpu.matmul %78, %80, %cst_51 {dimension_numbers = #tpu.dot_dimension_numbers<[1], [0], [0], [1], [0, 0, 1, 1], [], []>} : vector<16x128xbf16>, vector<128x512xbf16>, vector<16x512xf32> -> vector<16x512xf32>
    %82 = arith.addf %69, %81 : vector<16x512xf32>
    %c2_i32_52 = arith.constant 2 : i32
    %83 = vector.broadcast %c2_i32_52 : i32 to vector<16x34xi32>
    %84 = arith.muli %83, %7 : vector<16x34xi32>
    %c2_i32_53 = arith.constant 2 : i32
    %85 = vector.broadcast %c2_i32_53 : i32 to vector<16x34xi32>
    %86 = arith.addi %84, %85 : vector<16x34xi32>
    %87 = arith.cmpi eq, %8, %86 : vector<16x34xi32>
    %88 = arith.extui %87 : vector<16x34xi1> to vector<16x34xi32>
    %89 = arith.sitofp %88 : vector<16x34xi32> to vector<16x34xf32>
    %cst_54 = arith.constant dense<0.000000e+00> : vector<16x128xf32>
    %90 = tpu.matmul %89, %57, %cst_54 {dimension_numbers = #tpu.dot_dimension_numbers<[1], [0], [0], [1], [0, 0, 1, 1], [], []>} : vector<16x34xf32>, vector<34x128xf32>, vector<16x128xf32> -> vector<16x128xf32>
    %91 = arith.truncf %90 : vector<16x128xf32> to vector<16x128xbf16>
    %c2_55 = arith.constant 2 : index
    %c0_56 = arith.constant 0 : index
    %c0_57 = arith.constant 0 : index
    %92 = vector.load %arg1[%c2_55, %c0_56, %c0_57] : memref<3x128x512xbf16, #tpu.memory_space<vmem>>, vector<1x128x512xbf16>
    %93 = vector.shape_cast %92 : vector<1x128x512xbf16> to vector<128x512xbf16>
    %cst_58 = arith.constant dense<0.000000e+00> : vector<16x512xf32>
    %94 = tpu.matmul %91, %93, %cst_58 {dimension_numbers = #tpu.dot_dimension_numbers<[1], [0], [0], [1], [0, 0, 1, 1], [], []>} : vector<16x128xbf16>, vector<128x512xbf16>, vector<16x512xf32> -> vector<16x512xf32>
    %95 = arith.addf %82, %94 : vector<16x512xf32>
    %96 = vector.broadcast %6 : vector<1x512xf32> to vector<16x512xf32>
    %97 = arith.addf %95, %96 : vector<16x512xf32>
    %cst_59 = arith.constant 0.000000e+00 : f32
    %98 = vector.broadcast %cst_59 : f32 to vector<16x512xf32>
    %99 = arith.maximumf %97, %98 : vector<16x512xf32>
    %c1_60 = arith.constant 1 : index
    %c1_61 = arith.constant 1 : index
    %c0_62 = arith.constant 0 : index
    %100 = vector.load %arg15[%c1_60, %c1_61, %c0_62] : memref<2x18x512xf32, #tpu.memory_space<vmem>>, vector<1x16x512xf32>
    %101 = vector.shape_cast %100 : vector<1x16x512xf32> to vector<16x512xf32>
    %102 = vector.shape_cast %99 : vector<16x512xf32> to vector<1x16x512xf32>
    tpu.vector_store %arg15[%c1_60, %c1_61, %c0_62], %102 {strides = array<i32>} : memref<2x18x512xf32, #tpu.memory_space<vmem>>, vector<1x16x512xf32>,
    %c0_63 = arith.constant 0 : index
    %c0_64 = arith.constant 0 : index
    %103 = vector.load %arg4[%c0_63, %c0_64] : memref<1x256xf32, #tpu.memory_space<vmem>>, vector<1x256xf32>
    %104 = tpu.iota {dimensions = array<i32: 0>} : vector<8x18xi32>
    %105 = tpu.iota {dimensions = array<i32: 1>} : vector<8x18xi32>
    %c0_65 = arith.constant 0 : index
    %c0_66 = arith.constant 0 : index
    %c0_67 = arith.constant 0 : index
    %106 = vector.load %arg15[%c0_65, %c0_66, %c0_67] : memref<2x18x512xf32, #tpu.memory_space<vmem>>, vector<1x18x512xf32>
    %107 = vector.shape_cast %106 : vector<1x18x512xf32> to vector<18x512xf32>
    %c2_i32_68 = arith.constant 2 : i32
    %108 = vector.broadcast %c2_i32_68 : i32 to vector<8x18xi32>
    %109 = arith.muli %108, %104 : vector<8x18xi32>
    %c0_i32_69 = arith.constant 0 : i32
    %110 = vector.broadcast %c0_i32_69 : i32 to vector<8x18xi32>
    %111 = arith.addi %109, %110 : vector<8x18xi32>
    %112 = arith.cmpi eq, %105, %111 : vector<8x18xi32>
    %113 = arith.extui %112 : vector<8x18xi1> to vector<8x18xi32>
    %114 = arith.sitofp %113 : vector<8x18xi32> to vector<8x18xf32>
    %cst_70 = arith.constant dense<0.000000e+00> : vector<8x512xf32>
    %115 = tpu.matmul %114, %107, %cst_70 {dimension_numbers = #tpu.dot_dimension_numbers<[1], [0], [0], [1], [0, 0, 1, 1], [], []>} : vector<8x18xf32>, vector<18x512xf32>, vector<8x512xf32> -> vector<8x512xf32>
    %116 = arith.truncf %115 : vector<8x512xf32> to vector<8x512xbf16>
    %c0_71 = arith.constant 0 : index
    %c0_72 = arith.constant 0 : index
    %c0_73 = arith.constant 0 : index
    %117 = vector.load %arg3[%c0_71, %c0_72, %c0_73] : memref<3x512x256xbf16, #tpu.memory_space<vmem>>, vector<1x512x256xbf16>
    %118 = vector.shape_cast %117 : vector<1x512x256xbf16> to vector<512x256xbf16>
    %cst_74 = arith.constant dense<0.000000e+00> : vector<8x256xf32>
    %119 = tpu.matmul %116, %118, %cst_74 {dimension_numbers = #tpu.dot_dimension_numbers<[1], [0], [0], [1], [0, 0, 1, 1], [], []>} : vector<8x512xbf16>, vector<512x256xbf16>, vector<8x256xf32> -> vector<8x256xf32>
    %c2_i32_75 = arith.constant 2 : i32
    %120 = vector.broadcast %c2_i32_75 : i32 to vector<8x18xi32>
    %121 = arith.muli %120, %104 : vector<8x18xi32>
    %c1_i32_76 = arith.constant 1 : i32
    %122 = vector.broadcast %c1_i32_76 : i32 to vector<8x18xi32>
    %123 = arith.addi %121, %122 : vector<8x18xi32>
    %124 = arith.cmpi eq, %105, %123 : vector<8x18xi32>
    %125 = arith.extui %124 : vector<8x18xi1> to vector<8x18xi32>
    %126 = arith.sitofp %125 : vector<8x18xi32> to vector<8x18xf32>
    %cst_77 = arith.constant dense<0.000000e+00> : vector<8x512xf32>
    %127 = tpu.matmul %126, %107, %cst_77 {dimension_numbers = #tpu.dot_dimension_numbers<[1], [0], [0], [1], [0, 0, 1, 1], [], []>} : vector<8x18xf32>, vector<18x512xf32>, vector<8x512xf32> -> vector<8x512xf32>
    %128 = arith.truncf %127 : vector<8x512xf32> to vector<8x512xbf16>
    %c1_78 = arith.constant 1 : index
    %c0_79 = arith.constant 0 : index
    %c0_80 = arith.constant 0 : index
    %129 = vector.load %arg3[%c1_78, %c0_79, %c0_80] : memref<3x512x256xbf16, #tpu.memory_space<vmem>>, vector<1x512x256xbf16>
    %130 = vector.shape_cast %129 : vector<1x512x256xbf16> to vector<512x256xbf16>
    %cst_81 = arith.constant dense<0.000000e+00> : vector<8x256xf32>
    %131 = tpu.matmul %128, %130, %cst_81 {dimension_numbers = #tpu.dot_dimension_numbers<[1], [0], [0], [1], [0, 0, 1, 1], [], []>} : vector<8x512xbf16>, vector<512x256xbf16>, vector<8x256xf32> -> vector<8x256xf32>
    %132 = arith.addf %119, %131 : vector<8x256xf32>
    %c2_i32_82 = arith.constant 2 : i32
    %133 = vector.broadcast %c2_i32_82 : i32 to vector<8x18xi32>
    %134 = arith.muli %133, %104 : vector<8x18xi32>
    %c2_i32_83 = arith.constant 2 : i32
    %135 = vector.broadcast %c2_i32_83 : i32 to vector<8x18xi32>
    %136 = arith.addi %134, %135 : vector<8x18xi32>
    %137 = arith.cmpi eq, %105, %136 : vector<8x18xi32>
    %138 = arith.extui %137 : vector<8x18xi1> to vector<8x18xi32>
    %139 = arith.sitofp %138 : vector<8x18xi32> to vector<8x18xf32>
    %cst_84 = arith.constant dense<0.000000e+00> : vector<8x512xf32>
    %140 = tpu.matmul %139, %107, %cst_84 {dimension_numbers = #tpu.dot_dimension_numbers<[1], [0], [0], [1], [0, 0, 1, 1], [], []>} : vector<8x18xf32>, vector<18x512xf32>, vector<8x512xf32> -> vector<8x512xf32>
    %141 = arith.truncf %140 : vector<8x512xf32> to vector<8x512xbf16>
    %c2_85 = arith.constant 2 : index
    %c0_86 = arith.constant 0 : index
    %c0_87 = arith.constant 0 : index
    %142 = vector.load %arg3[%c2_85, %c0_86, %c0_87] : memref<3x512x256xbf16, #tpu.memory_space<vmem>>, vector<1x512x256xbf16>
    %143 = vector.shape_cast %142 : vector<1x512x256xbf16> to vector<512x256xbf16>
    %cst_88 = arith.constant dense<0.000000e+00> : vector<8x256xf32>
    %144 = tpu.matmul %141, %143, %cst_88 {dimension_numbers = #tpu.dot_dimension_numbers<[1], [0], [0], [1], [0, 0, 1, 1], [], []>} : vector<8x512xbf16>, vector<512x256xbf16>, vector<8x256xf32> -> vector<8x256xf32>
    %145 = arith.addf %132, %144 : vector<8x256xf32>
    %146 = vector.broadcast %103 : vector<1x256xf32> to vector<8x256xf32>
    %147 = arith.addf %145, %146 : vector<8x256xf32>
    %cst_89 = arith.constant 0.000000e+00 : f32
    %148 = vector.broadcast %cst_89 : f32 to vector<8x256xf32>
    %149 = arith.maximumf %147, %148 : vector<8x256xf32>
    %c0_90 = arith.constant 0 : index
    %c1_91 = arith.constant 1 : index
    %c0_92 = arith.constant 0 : index
    %150 = vector.load %arg16[%c0_90, %c1_91, %c0_92] : memref<2x10x256xf32, #tpu.memory_space<vmem>>, vector<1x8x256xf32>
    %151 = vector.shape_cast %150 : vector<1x8x256xf32> to vector<8x256xf32>
    %152 = vector.shape_cast %149 : vector<8x256xf32> to vector<1x8x256xf32>
    tpu.vector_store %arg16[%c0_90, %c1_91, %c0_92], %152 {strides = array<i32>} : memref<2x10x256xf32, #tpu.memory_space<vmem>>, vector<1x8x256xf32>,
    %c1_93 = arith.constant 1 : index
    %c0_94 = arith.constant 0 : index
    %c0_95 = arith.constant 0 : index
    %153 = vector.load %arg15[%c1_93, %c0_94, %c0_95] : memref<2x18x512xf32, #tpu.memory_space<vmem>>, vector<1x18x512xf32>
    %154 = vector.shape_cast %153 : vector<1x18x512xf32> to vector<18x512xf32>
    %c2_i32_96 = arith.constant 2 : i32
    %155 = vector.broadcast %c2_i32_96 : i32 to vector<8x18xi32>
    %156 = arith.muli %155, %104 : vector<8x18xi32>
    %c0_i32_97 = arith.constant 0 : i32
    %157 = vector.broadcast %c0_i32_97 : i32 to vector<8x18xi32>
    %158 = arith.addi %156, %157 : vector<8x18xi32>
    %159 = arith.cmpi eq, %105, %158 : vector<8x18xi32>
    %160 = arith.extui %159 : vector<8x18xi1> to vector<8x18xi32>
    %161 = arith.sitofp %160 : vector<8x18xi32> to vector<8x18xf32>
    %cst_98 = arith.constant dense<0.000000e+00> : vector<8x512xf32>
    %162 = tpu.matmul %161, %154, %cst_98 {dimension_numbers = #tpu.dot_dimension_numbers<[1], [0], [0], [1], [0, 0, 1, 1], [], []>} : vector<8x18xf32>, vector<18x512xf32>, vector<8x512xf32> -> vector<8x512xf32>
    %163 = arith.truncf %162 : vector<8x512xf32> to vector<8x512xbf16>
    %c0_99 = arith.constant 0 : index
    %c0_100 = arith.constant 0 : index
    %c0_101 = arith.constant 0 : index
    %164 = vector.load %arg3[%c0_99, %c0_100, %c0_101] : memref<3x512x256xbf16, #tpu.memory_space<vmem>>, vector<1x512x256xbf16>
    %165 = vector.shape_cast %164 : vector<1x512x256xbf16> to vector<512x256xbf16>
    %cst_102 = arith.constant dense<0.000000e+00> : vector<8x256xf32>
    %166 = tpu.matmul %163, %165, %cst_102 {dimension_numbers = #tpu.dot_dimension_numbers<[1], [0], [0], [1], [0, 0, 1, 1], [], []>} : vector<8x512xbf16>, vector<512x256xbf16>, vector<8x256xf32> -> vector<8x256xf32>
    %c2_i32_103 = arith.constant 2 : i32
    %167 = vector.broadcast %c2_i32_103 : i32 to vector<8x18xi32>
    %168 = arith.muli %167, %104 : vector<8x18xi32>
    %c1_i32_104 = arith.constant 1 : i32
    %169 = vector.broadcast %c1_i32_104 : i32 to vector<8x18xi32>
    %170 = arith.addi %168, %169 : vector<8x18xi32>
    %171 = arith.cmpi eq, %105, %170 : vector<8x18xi32>
    %172 = arith.extui %171 : vector<8x18xi1> to vector<8x18xi32>
    %173 = arith.sitofp %172 : vector<8x18xi32> to vector<8x18xf32>
    %cst_105 = arith.constant dense<0.000000e+00> : vector<8x512xf32>
    %174 = tpu.matmul %173, %154, %cst_105 {dimension_numbers = #tpu.dot_dimension_numbers<[1], [0], [0], [1], [0, 0, 1, 1], [], []>} : vector<8x18xf32>, vector<18x512xf32>, vector<8x512xf32> -> vector<8x512xf32>
    %175 = arith.truncf %174 : vector<8x512xf32> to vector<8x512xbf16>
    %c1_106 = arith.constant 1 : index
    %c0_107 = arith.constant 0 : index
    %c0_108 = arith.constant 0 : index
    %176 = vector.load %arg3[%c1_106, %c0_107, %c0_108] : memref<3x512x256xbf16, #tpu.memory_space<vmem>>, vector<1x512x256xbf16>
    %177 = vector.shape_cast %176 : vector<1x512x256xbf16> to vector<512x256xbf16>
    %cst_109 = arith.constant dense<0.000000e+00> : vector<8x256xf32>
    %178 = tpu.matmul %175, %177, %cst_109 {dimension_numbers = #tpu.dot_dimension_numbers<[1], [0], [0], [1], [0, 0, 1, 1], [], []>} : vector<8x512xbf16>, vector<512x256xbf16>, vector<8x256xf32> -> vector<8x256xf32>
    %179 = arith.addf %166, %178 : vector<8x256xf32>
    %c2_i32_110 = arith.constant 2 : i32
    %180 = vector.broadcast %c2_i32_110 : i32 to vector<8x18xi32>
    %181 = arith.muli %180, %104 : vector<8x18xi32>
    %c2_i32_111 = arith.constant 2 : i32
    %182 = vector.broadcast %c2_i32_111 : i32 to vector<8x18xi32>
    %183 = arith.addi %181, %182 : vector<8x18xi32>
    %184 = arith.cmpi eq, %105, %183 : vector<8x18xi32>
    %185 = arith.extui %184 : vector<8x18xi1> to vector<8x18xi32>
    %186 = arith.sitofp %185 : vector<8x18xi32> to vector<8x18xf32>
    %cst_112 = arith.constant dense<0.000000e+00> : vector<8x512xf32>
    %187 = tpu.matmul %186, %154, %cst_112 {dimension_numbers = #tpu.dot_dimension_numbers<[1], [0], [0], [1], [0, 0, 1, 1], [], []>} : vector<8x18xf32>, vector<18x512xf32>, vector<8x512xf32> -> vector<8x512xf32>
    %188 = arith.truncf %187 : vector<8x512xf32> to vector<8x512xbf16>
    %c2_113 = arith.constant 2 : index
    %c0_114 = arith.constant 0 : index
    %c0_115 = arith.constant 0 : index
    %189 = vector.load %arg3[%c2_113, %c0_114, %c0_115] : memref<3x512x256xbf16, #tpu.memory_space<vmem>>, vector<1x512x256xbf16>
    %190 = vector.shape_cast %189 : vector<1x512x256xbf16> to vector<512x256xbf16>
    %cst_116 = arith.constant dense<0.000000e+00> : vector<8x256xf32>
    %191 = tpu.matmul %188, %190, %cst_116 {dimension_numbers = #tpu.dot_dimension_numbers<[1], [0], [0], [1], [0, 0, 1, 1], [], []>} : vector<8x512xbf16>, vector<512x256xbf16>, vector<8x256xf32> -> vector<8x256xf32>
    %192 = arith.addf %179, %191 : vector<8x256xf32>
    %193 = vector.broadcast %103 : vector<1x256xf32> to vector<8x256xf32>
    %194 = arith.addf %192, %193 : vector<8x256xf32>
    %cst_117 = arith.constant 0.000000e+00 : f32
    %195 = vector.broadcast %cst_117 : f32 to vector<8x256xf32>
    %196 = arith.maximumf %194, %195 : vector<8x256xf32>
    %c1_118 = arith.constant 1 : index
    %c1_119 = arith.constant 1 : index
    %c0_120 = arith.constant 0 : index
    %197 = vector.load %arg16[%c1_118, %c1_119, %c0_120] : memref<2x10x256xf32, #tpu.memory_space<vmem>>, vector<1x8x256xf32>
    %198 = vector.shape_cast %197 : vector<1x8x256xf32> to vector<8x256xf32>
    %199 = vector.shape_cast %196 : vector<8x256xf32> to vector<1x8x256xf32>
    tpu.vector_store %arg16[%c1_118, %c1_119, %c0_120], %199 {strides = array<i32>} : memref<2x10x256xf32, #tpu.memory_space<vmem>>, vector<1x8x256xf32>,
    %c0_121 = arith.constant 0 : index
    %c0_122 = arith.constant 0 : index
    %200 = vector.load %arg6[%c0_121, %c0_122] : memref<1x128xf32, #tpu.memory_space<vmem>>, vector<1x128xf32>
    %201 = tpu.iota {dimensions = array<i32: 0>} : vector<4x10xi32>
    %202 = tpu.iota {dimensions = array<i32: 1>} : vector<4x10xi32>
    %c0_123 = arith.constant 0 : index
    %c0_124 = arith.constant 0 : index
    %c0_125 = arith.constant 0 : index
    %203 = vector.load %arg16[%c0_123, %c0_124, %c0_125] : memref<2x10x256xf32, #tpu.memory_space<vmem>>, vector<1x10x256xf32>
    %204 = vector.shape_cast %203 : vector<1x10x256xf32> to vector<10x256xf32>
    %c2_i32_126 = arith.constant 2 : i32
    %205 = vector.broadcast %c2_i32_126 : i32 to vector<4x10xi32>
    %206 = arith.muli %205, %201 : vector<4x10xi32>
    %c0_i32_127 = arith.constant 0 : i32
    %207 = vector.broadcast %c0_i32_127 : i32 to vector<4x10xi32>
    %208 = arith.addi %206, %207 : vector<4x10xi32>
    %209 = arith.cmpi eq, %202, %208 : vector<4x10xi32>
    %210 = arith.extui %209 : vector<4x10xi1> to vector<4x10xi32>
    %211 = arith.sitofp %210 : vector<4x10xi32> to vector<4x10xf32>
    %cst_128 = arith.constant dense<0.000000e+00> : vector<4x256xf32>
    %212 = tpu.matmul %211, %204, %cst_128 {dimension_numbers = #tpu.dot_dimension_numbers<[1], [0], [0], [1], [0, 0, 1, 1], [], []>} : vector<4x10xf32>, vector<10x256xf32>, vector<4x256xf32> -> vector<4x256xf32>
    %213 = arith.truncf %212 : vector<4x256xf32> to vector<4x256xbf16>
    %c0_129 = arith.constant 0 : index
    %c0_130 = arith.constant 0 : index
    %c0_131 = arith.constant 0 : index
    %214 = vector.load %arg5[%c0_129, %c0_130, %c0_131] : memref<3x256x128xbf16, #tpu.memory_space<vmem>>, vector<1x256x128xbf16>
    %215 = vector.shape_cast %214 : vector<1x256x128xbf16> to vector<256x128xbf16>
    %cst_132 = arith.constant dense<0.000000e+00> : vector<4x128xf32>
    %216 = tpu.matmul %213, %215, %cst_132 {dimension_numbers = #tpu.dot_dimension_numbers<[1], [0], [0], [1], [0, 0, 1, 1], [], []>} : vector<4x256xbf16>, vector<256x128xbf16>, vector<4x128xf32> -> vector<4x128xf32>
    %c2_i32_133 = arith.constant 2 : i32
    %217 = vector.broadcast %c2_i32_133 : i32 to vector<4x10xi32>
    %218 = arith.muli %217, %201 : vector<4x10xi32>
    %c1_i32_134 = arith.constant 1 : i32
    %219 = vector.broadcast %c1_i32_134 : i32 to vector<4x10xi32>
    %220 = arith.addi %218, %219 : vector<4x10xi32>
    %221 = arith.cmpi eq, %202, %220 : vector<4x10xi32>
    %222 = arith.extui %221 : vector<4x10xi1> to vector<4x10xi32>
    %223 = arith.sitofp %222 : vector<4x10xi32> to vector<4x10xf32>
    %cst_135 = arith.constant dense<0.000000e+00> : vector<4x256xf32>
    %224 = tpu.matmul %223, %204, %cst_135 {dimension_numbers = #tpu.dot_dimension_numbers<[1], [0], [0], [1], [0, 0, 1, 1], [], []>} : vector<4x10xf32>, vector<10x256xf32>, vector<4x256xf32> -> vector<4x256xf32>
    %225 = arith.truncf %224 : vector<4x256xf32> to vector<4x256xbf16>
    %c1_136 = arith.constant 1 : index
    %c0_137 = arith.constant 0 : index
    %c0_138 = arith.constant 0 : index
    %226 = vector.load %arg5[%c1_136, %c0_137, %c0_138] : memref<3x256x128xbf16, #tpu.memory_space<vmem>>, vector<1x256x128xbf16>
    %227 = vector.shape_cast %226 : vector<1x256x128xbf16> to vector<256x128xbf16>
    %cst_139 = arith.constant dense<0.000000e+00> : vector<4x128xf32>
    %228 = tpu.matmul %225, %227, %cst_139 {dimension_numbers = #tpu.dot_dimension_numbers<[1], [0], [0], [1], [0, 0, 1, 1], [], []>} : vector<4x256xbf16>, vector<256x128xbf16>, vector<4x128xf32> -> vector<4x128xf32>
    %229 = arith.addf %216, %228 : vector<4x128xf32>
    %c2_i32_140 = arith.constant 2 : i32
    %230 = vector.broadcast %c2_i32_140 : i32 to vector<4x10xi32>
    %231 = arith.muli %230, %201 : vector<4x10xi32>
    %c2_i32_141 = arith.constant 2 : i32
    %232 = vector.broadcast %c2_i32_141 : i32 to vector<4x10xi32>
    %233 = arith.addi %231, %232 : vector<4x10xi32>
    %234 = arith.cmpi eq, %202, %233 : vector<4x10xi32>
    %235 = arith.extui %234 : vector<4x10xi1> to vector<4x10xi32>
    %236 = arith.sitofp %235 : vector<4x10xi32> to vector<4x10xf32>
    %cst_142 = arith.constant dense<0.000000e+00> : vector<4x256xf32>
    %237 = tpu.matmul %236, %204, %cst_142 {dimension_numbers = #tpu.dot_dimension_numbers<[1], [0], [0], [1], [0, 0, 1, 1], [], []>} : vector<4x10xf32>, vector<10x256xf32>, vector<4x256xf32> -> vector<4x256xf32>
    %238 = arith.truncf %237 : vector<4x256xf32> to vector<4x256xbf16>
    %c2_143 = arith.constant 2 : index
    %c0_144 = arith.constant 0 : index
    %c0_145 = arith.constant 0 : index
    %239 = vector.load %arg5[%c2_143, %c0_144, %c0_145] : memref<3x256x128xbf16, #tpu.memory_space<vmem>>, vector<1x256x128xbf16>
    %240 = vector.shape_cast %239 : vector<1x256x128xbf16> to vector<256x128xbf16>
    %cst_146 = arith.constant dense<0.000000e+00> : vector<4x128xf32>
    %241 = tpu.matmul %238, %240, %cst_146 {dimension_numbers = #tpu.dot_dimension_numbers<[1], [0], [0], [1], [0, 0, 1, 1], [], []>} : vector<4x256xbf16>, vector<256x128xbf16>, vector<4x128xf32> -> vector<4x128xf32>
    %242 = arith.addf %229, %241 : vector<4x128xf32>
    %243 = vector.broadcast %200 : vector<1x128xf32> to vector<4x128xf32>
    %244 = arith.addf %242, %243 : vector<4x128xf32>
    %cst_147 = arith.constant 0.000000e+00 : f32
    %245 = vector.broadcast %cst_147 : f32 to vector<4x128xf32>
    %246 = arith.maximumf %244, %245 : vector<4x128xf32>
    %c0_148 = arith.constant 0 : index
    %c1_149 = arith.constant 1 : index
    %c0_150 = arith.constant 0 : index
    %247 = vector.load %arg17[%c0_148, %c1_149, %c0_150] : memref<2x6x128xf32, #tpu.memory_space<vmem>>, vector<1x4x128xf32>
    %248 = vector.shape_cast %247 : vector<1x4x128xf32> to vector<4x128xf32>
    %249 = vector.shape_cast %246 : vector<4x128xf32> to vector<1x4x128xf32>
    tpu.vector_store %arg17[%c0_148, %c1_149, %c0_150], %249 {strides = array<i32>} : memref<2x6x128xf32, #tpu.memory_space<vmem>>, vector<1x4x128xf32>,
    %c1_151 = arith.constant 1 : index
    %c0_152 = arith.constant 0 : index
    %c0_153 = arith.constant 0 : index
    %250 = vector.load %arg16[%c1_151, %c0_152, %c0_153] : memref<2x10x256xf32, #tpu.memory_space<vmem>>, vector<1x10x256xf32>
    %251 = vector.shape_cast %250 : vector<1x10x256xf32> to vector<10x256xf32>
    %c2_i32_154 = arith.constant 2 : i32
    %252 = vector.broadcast %c2_i32_154 : i32 to vector<4x10xi32>
    %253 = arith.muli %252, %201 : vector<4x10xi32>
    %c0_i32_155 = arith.constant 0 : i32
    %254 = vector.broadcast %c0_i32_155 : i32 to vector<4x10xi32>
    %255 = arith.addi %253, %254 : vector<4x10xi32>
    %256 = arith.cmpi eq, %202, %255 : vector<4x10xi32>
    %257 = arith.extui %256 : vector<4x10xi1> to vector<4x10xi32>
    %258 = arith.sitofp %257 : vector<4x10xi32> to vector<4x10xf32>
    %cst_156 = arith.constant dense<0.000000e+00> : vector<4x256xf32>
    %259 = tpu.matmul %258, %251, %cst_156 {dimension_numbers = #tpu.dot_dimension_numbers<[1], [0], [0], [1], [0, 0, 1, 1], [], []>} : vector<4x10xf32>, vector<10x256xf32>, vector<4x256xf32> -> vector<4x256xf32>
    %260 = arith.truncf %259 : vector<4x256xf32> to vector<4x256xbf16>
    %c0_157 = arith.constant 0 : index
    %c0_158 = arith.constant 0 : index
    %c0_159 = arith.constant 0 : index
    %261 = vector.load %arg5[%c0_157, %c0_158, %c0_159] : memref<3x256x128xbf16, #tpu.memory_space<vmem>>, vector<1x256x128xbf16>
    %262 = vector.shape_cast %261 : vector<1x256x128xbf16> to vector<256x128xbf16>
    %cst_160 = arith.constant dense<0.000000e+00> : vector<4x128xf32>
    %263 = tpu.matmul %260, %262, %cst_160 {dimension_numbers = #tpu.dot_dimension_numbers<[1], [0], [0], [1], [0, 0, 1, 1], [], []>} : vector<4x256xbf16>, vector<256x128xbf16>, vector<4x128xf32> -> vector<4x128xf32>
    %c2_i32_161 = arith.constant 2 : i32
    %264 = vector.broadcast %c2_i32_161 : i32 to vector<4x10xi32>
    %265 = arith.muli %264, %201 : vector<4x10xi32>
    %c1_i32_162 = arith.constant 1 : i32
    %266 = vector.broadcast %c1_i32_162 : i32 to vector<4x10xi32>
    %267 = arith.addi %265, %266 : vector<4x10xi32>
    %268 = arith.cmpi eq, %202, %267 : vector<4x10xi32>
    %269 = arith.extui %268 : vector<4x10xi1> to vector<4x10xi32>
    %270 = arith.sitofp %269 : vector<4x10xi32> to vector<4x10xf32>
    %cst_163 = arith.constant dense<0.000000e+00> : vector<4x256xf32>
    %271 = tpu.matmul %270, %251, %cst_163 {dimension_numbers = #tpu.dot_dimension_numbers<[1], [0], [0], [1], [0, 0, 1, 1], [], []>} : vector<4x10xf32>, vector<10x256xf32>, vector<4x256xf32> -> vector<4x256xf32>
    %272 = arith.truncf %271 : vector<4x256xf32> to vector<4x256xbf16>
    %c1_164 = arith.constant 1 : index
    %c0_165 = arith.constant 0 : index
    %c0_166 = arith.constant 0 : index
    %273 = vector.load %arg5[%c1_164, %c0_165, %c0_166] : memref<3x256x128xbf16, #tpu.memory_space<vmem>>, vector<1x256x128xbf16>
    %274 = vector.shape_cast %273 : vector<1x256x128xbf16> to vector<256x128xbf16>
    %cst_167 = arith.constant dense<0.000000e+00> : vector<4x128xf32>
    %275 = tpu.matmul %272, %274, %cst_167 {dimension_numbers = #tpu.dot_dimension_numbers<[1], [0], [0], [1], [0, 0, 1, 1], [], []>} : vector<4x256xbf16>, vector<256x128xbf16>, vector<4x128xf32> -> vector<4x128xf32>
    %276 = arith.addf %263, %275 : vector<4x128xf32>
    %c2_i32_168 = arith.constant 2 : i32
    %277 = vector.broadcast %c2_i32_168 : i32 to vector<4x10xi32>
    %278 = arith.muli %277, %201 : vector<4x10xi32>
    %c2_i32_169 = arith.constant 2 : i32
    %279 = vector.broadcast %c2_i32_169 : i32 to vector<4x10xi32>
    %280 = arith.addi %278, %279 : vector<4x10xi32>
    %281 = arith.cmpi eq, %202, %280 : vector<4x10xi32>
    %282 = arith.extui %281 : vector<4x10xi1> to vector<4x10xi32>
    %283 = arith.sitofp %282 : vector<4x10xi32> to vector<4x10xf32>
    %cst_170 = arith.constant dense<0.000000e+00> : vector<4x256xf32>
    %284 = tpu.matmul %283, %251, %cst_170 {dimension_numbers = #tpu.dot_dimension_numbers<[1], [0], [0], [1], [0, 0, 1, 1], [], []>} : vector<4x10xf32>, vector<10x256xf32>, vector<4x256xf32> -> vector<4x256xf32>
    %285 = arith.truncf %284 : vector<4x256xf32> to vector<4x256xbf16>
    %c2_171 = arith.constant 2 : index
    %c0_172 = arith.constant 0 : index
    %c0_173 = arith.constant 0 : index
    %286 = vector.load %arg5[%c2_171, %c0_172, %c0_173] : memref<3x256x128xbf16, #tpu.memory_space<vmem>>, vector<1x256x128xbf16>
    %287 = vector.shape_cast %286 : vector<1x256x128xbf16> to vector<256x128xbf16>
    %cst_174 = arith.constant dense<0.000000e+00> : vector<4x128xf32>
    %288 = tpu.matmul %285, %287, %cst_174 {dimension_numbers = #tpu.dot_dimension_numbers<[1], [0], [0], [1], [0, 0, 1, 1], [], []>} : vector<4x256xbf16>, vector<256x128xbf16>, vector<4x128xf32> -> vector<4x128xf32>
    %289 = arith.addf %276, %288 : vector<4x128xf32>
    %290 = vector.broadcast %200 : vector<1x128xf32> to vector<4x128xf32>
    %291 = arith.addf %289, %290 : vector<4x128xf32>
    %cst_175 = arith.constant 0.000000e+00 : f32
    %292 = vector.broadcast %cst_175 : f32 to vector<4x128xf32>
    %293 = arith.maximumf %291, %292 : vector<4x128xf32>
    %c1_176 = arith.constant 1 : index
    %c1_177 = arith.constant 1 : index
    %c0_178 = arith.constant 0 : index
    %294 = vector.load %arg17[%c1_176, %c1_177, %c0_178] : memref<2x6x128xf32, #tpu.memory_space<vmem>>, vector<1x4x128xf32>
    %295 = vector.shape_cast %294 : vector<1x4x128xf32> to vector<4x128xf32>
    %296 = vector.shape_cast %293 : vector<4x128xf32> to vector<1x4x128xf32>
    tpu.vector_store %arg17[%c1_176, %c1_177, %c0_178], %296 {strides = array<i32>} : memref<2x6x128xf32, #tpu.memory_space<vmem>>, vector<1x4x128xf32>,
    %c0_179 = arith.constant 0 : index
    %c0_180 = arith.constant 0 : index
    %297 = vector.load %arg8[%c0_179, %c0_180] : memref<1x64xf32, #tpu.memory_space<vmem>>, vector<1x64xf32>
    %298 = tpu.iota {dimensions = array<i32: 0>} : vector<2x6xi32>
    %299 = tpu.iota {dimensions = array<i32: 1>} : vector<2x6xi32>
    %c0_181 = arith.constant 0 : index
    %c0_182 = arith.constant 0 : index
    %c0_183 = arith.constant 0 : index
    %300 = vector.load %arg17[%c0_181, %c0_182, %c0_183] : memref<2x6x128xf32, #tpu.memory_space<vmem>>, vector<1x6x128xf32>
    %301 = vector.shape_cast %300 : vector<1x6x128xf32> to vector<6x128xf32>
    %c2_i32_184 = arith.constant 2 : i32
    %302 = vector.broadcast %c2_i32_184 : i32 to vector<2x6xi32>
    %303 = arith.muli %302, %298 : vector<2x6xi32>
    %c0_i32_185 = arith.constant 0 : i32
    %304 = vector.broadcast %c0_i32_185 : i32 to vector<2x6xi32>
    %305 = arith.addi %303, %304 : vector<2x6xi32>
    %306 = arith.cmpi eq, %299, %305 : vector<2x6xi32>
    %307 = arith.extui %306 : vector<2x6xi1> to vector<2x6xi32>
    %308 = arith.sitofp %307 : vector<2x6xi32> to vector<2x6xf32>
    %cst_186 = arith.constant dense<0.000000e+00> : vector<2x128xf32>
    %309 = tpu.matmul %308, %301, %cst_186 {dimension_numbers = #tpu.dot_dimension_numbers<[1], [0], [0], [1], [0, 0, 1, 1], [], []>} : vector<2x6xf32>, vector<6x128xf32>, vector<2x128xf32> -> vector<2x128xf32>
    %310 = arith.truncf %309 : vector<2x128xf32> to vector<2x128xbf16>
    %c0_187 = arith.constant 0 : index
    %c0_188 = arith.constant 0 : index
    %c0_189 = arith.constant 0 : index
    %311 = vector.load %arg7[%c0_187, %c0_188, %c0_189] : memref<3x128x64xbf16, #tpu.memory_space<vmem>>, vector<1x128x64xbf16>
    %312 = vector.shape_cast %311 : vector<1x128x64xbf16> to vector<128x64xbf16>
    %cst_190 = arith.constant dense<0.000000e+00> : vector<2x64xf32>
    %313 = tpu.matmul %310, %312, %cst_190 {dimension_numbers = #tpu.dot_dimension_numbers<[1], [0], [0], [1], [0, 0, 1, 1], [], []>} : vector<2x128xbf16>, vector<128x64xbf16>, vector<2x64xf32> -> vector<2x64xf32>
    %c2_i32_191 = arith.constant 2 : i32
    %314 = vector.broadcast %c2_i32_191 : i32 to vector<2x6xi32>
    %315 = arith.muli %314, %298 : vector<2x6xi32>
    %c1_i32_192 = arith.constant 1 : i32
    %316 = vector.broadcast %c1_i32_192 : i32 to vector<2x6xi32>
    %317 = arith.addi %315, %316 : vector<2x6xi32>
    %318 = arith.cmpi eq, %299, %317 : vector<2x6xi32>
    %319 = arith.extui %318 : vector<2x6xi1> to vector<2x6xi32>
    %320 = arith.sitofp %319 : vector<2x6xi32> to vector<2x6xf32>
    %cst_193 = arith.constant dense<0.000000e+00> : vector<2x128xf32>
    %321 = tpu.matmul %320, %301, %cst_193 {dimension_numbers = #tpu.dot_dimension_numbers<[1], [0], [0], [1], [0, 0, 1, 1], [], []>} : vector<2x6xf32>, vector<6x128xf32>, vector<2x128xf32> -> vector<2x128xf32>
    %322 = arith.truncf %321 : vector<2x128xf32> to vector<2x128xbf16>
    %c1_194 = arith.constant 1 : index
    %c0_195 = arith.constant 0 : index
    %c0_196 = arith.constant 0 : index
    %323 = vector.load %arg7[%c1_194, %c0_195, %c0_196] : memref<3x128x64xbf16, #tpu.memory_space<vmem>>, vector<1x128x64xbf16>
    %324 = vector.shape_cast %323 : vector<1x128x64xbf16> to vector<128x64xbf16>
    %cst_197 = arith.constant dense<0.000000e+00> : vector<2x64xf32>
    %325 = tpu.matmul %322, %324, %cst_197 {dimension_numbers = #tpu.dot_dimension_numbers<[1], [0], [0], [1], [0, 0, 1, 1], [], []>} : vector<2x128xbf16>, vector<128x64xbf16>, vector<2x64xf32> -> vector<2x64xf32>
    %326 = arith.addf %313, %325 : vector<2x64xf32>
    %c2_i32_198 = arith.constant 2 : i32
    %327 = vector.broadcast %c2_i32_198 : i32 to vector<2x6xi32>
    %328 = arith.muli %327, %298 : vector<2x6xi32>
    %c2_i32_199 = arith.constant 2 : i32
    %329 = vector.broadcast %c2_i32_199 : i32 to vector<2x6xi32>
    %330 = arith.addi %328, %329 : vector<2x6xi32>
    %331 = arith.cmpi eq, %299, %330 : vector<2x6xi32>
    %332 = arith.extui %331 : vector<2x6xi1> to vector<2x6xi32>
    %333 = arith.sitofp %332 : vector<2x6xi32> to vector<2x6xf32>
    %cst_200 = arith.constant dense<0.000000e+00> : vector<2x128xf32>
    %334 = tpu.matmul %333, %301, %cst_200 {dimension_numbers = #tpu.dot_dimension_numbers<[1], [0], [0], [1], [0, 0, 1, 1], [], []>} : vector<2x6xf32>, vector<6x128xf32>, vector<2x128xf32> -> vector<2x128xf32>
    %335 = arith.truncf %334 : vector<2x128xf32> to vector<2x128xbf16>
    %c2_201 = arith.constant 2 : index
    %c0_202 = arith.constant 0 : index
    %c0_203 = arith.constant 0 : index
    %336 = vector.load %arg7[%c2_201, %c0_202, %c0_203] : memref<3x128x64xbf16, #tpu.memory_space<vmem>>, vector<1x128x64xbf16>
    %337 = vector.shape_cast %336 : vector<1x128x64xbf16> to vector<128x64xbf16>
    %cst_204 = arith.constant dense<0.000000e+00> : vector<2x64xf32>
    %338 = tpu.matmul %335, %337, %cst_204 {dimension_numbers = #tpu.dot_dimension_numbers<[1], [0], [0], [1], [0, 0, 1, 1], [], []>} : vector<2x128xbf16>, vector<128x64xbf16>, vector<2x64xf32> -> vector<2x64xf32>
    %339 = arith.addf %326, %338 : vector<2x64xf32>
    %340 = vector.broadcast %297 : vector<1x64xf32> to vector<2x64xf32>
    %341 = arith.addf %339, %340 : vector<2x64xf32>
    %cst_205 = arith.constant 0.000000e+00 : f32
    %342 = vector.broadcast %cst_205 : f32 to vector<2x64xf32>
    %343 = arith.maximumf %341, %342 : vector<2x64xf32>
    %c1_206 = arith.constant 1 : index
    %c0_207 = arith.constant 0 : index
    %c0_208 = arith.constant 0 : index
    %344 = vector.load %arg17[%c1_206, %c0_207, %c0_208] : memref<2x6x128xf32, #tpu.memory_space<vmem>>, vector<1x6x128xf32>
    %345 = vector.shape_cast %344 : vector<1x6x128xf32> to vector<6x128xf32>
    %c2_i32_209 = arith.constant 2 : i32
    %346 = vector.broadcast %c2_i32_209 : i32 to vector<2x6xi32>
    %347 = arith.muli %346, %298 : vector<2x6xi32>
    %c0_i32_210 = arith.constant 0 : i32
    %348 = vector.broadcast %c0_i32_210 : i32 to vector<2x6xi32>
    %349 = arith.addi %347, %348 : vector<2x6xi32>
    %350 = arith.cmpi eq, %299, %349 : vector<2x6xi32>
    %351 = arith.extui %350 : vector<2x6xi1> to vector<2x6xi32>
    %352 = arith.sitofp %351 : vector<2x6xi32> to vector<2x6xf32>
    %cst_211 = arith.constant dense<0.000000e+00> : vector<2x128xf32>
    %353 = tpu.matmul %352, %345, %cst_211 {dimension_numbers = #tpu.dot_dimension_numbers<[1], [0], [0], [1], [0, 0, 1, 1], [], []>} : vector<2x6xf32>, vector<6x128xf32>, vector<2x128xf32> -> vector<2x128xf32>
    %354 = arith.truncf %353 : vector<2x128xf32> to vector<2x128xbf16>
    %c0_212 = arith.constant 0 : index
    %c0_213 = arith.constant 0 : index
    %c0_214 = arith.constant 0 : index
    %355 = vector.load %arg7[%c0_212, %c0_213, %c0_214] : memref<3x128x64xbf16, #tpu.memory_space<vmem>>, vector<1x128x64xbf16>
    %356 = vector.shape_cast %355 : vector<1x128x64xbf16> to vector<128x64xbf16>
    %cst_215 = arith.constant dense<0.000000e+00> : vector<2x64xf32>
    %357 = tpu.matmul %354, %356, %cst_215 {dimension_numbers = #tpu.dot_dimension_numbers<[1], [0], [0], [1], [0, 0, 1, 1], [], []>} : vector<2x128xbf16>, vector<128x64xbf16>, vector<2x64xf32> -> vector<2x64xf32>
    %c2_i32_216 = arith.constant 2 : i32
    %358 = vector.broadcast %c2_i32_216 : i32 to vector<2x6xi32>
    %359 = arith.muli %358, %298 : vector<2x6xi32>
    %c1_i32_217 = arith.constant 1 : i32
    %360 = vector.broadcast %c1_i32_217 : i32 to vector<2x6xi32>
    %361 = arith.addi %359, %360 : vector<2x6xi32>
    %362 = arith.cmpi eq, %299, %361 : vector<2x6xi32>
    %363 = arith.extui %362 : vector<2x6xi1> to vector<2x6xi32>
    %364 = arith.sitofp %363 : vector<2x6xi32> to vector<2x6xf32>
    %cst_218 = arith.constant dense<0.000000e+00> : vector<2x128xf32>
    %365 = tpu.matmul %364, %345, %cst_218 {dimension_numbers = #tpu.dot_dimension_numbers<[1], [0], [0], [1], [0, 0, 1, 1], [], []>} : vector<2x6xf32>, vector<6x128xf32>, vector<2x128xf32> -> vector<2x128xf32>
    %366 = arith.truncf %365 : vector<2x128xf32> to vector<2x128xbf16>
    %c1_219 = arith.constant 1 : index
    %c0_220 = arith.constant 0 : index
    %c0_221 = arith.constant 0 : index
    %367 = vector.load %arg7[%c1_219, %c0_220, %c0_221] : memref<3x128x64xbf16, #tpu.memory_space<vmem>>, vector<1x128x64xbf16>
    %368 = vector.shape_cast %367 : vector<1x128x64xbf16> to vector<128x64xbf16>
    %cst_222 = arith.constant dense<0.000000e+00> : vector<2x64xf32>
    %369 = tpu.matmul %366, %368, %cst_222 {dimension_numbers = #tpu.dot_dimension_numbers<[1], [0], [0], [1], [0, 0, 1, 1], [], []>} : vector<2x128xbf16>, vector<128x64xbf16>, vector<2x64xf32> -> vector<2x64xf32>
    %370 = arith.addf %357, %369 : vector<2x64xf32>
    %c2_i32_223 = arith.constant 2 : i32
    %371 = vector.broadcast %c2_i32_223 : i32 to vector<2x6xi32>
    %372 = arith.muli %371, %298 : vector<2x6xi32>
    %c2_i32_224 = arith.constant 2 : i32
    %373 = vector.broadcast %c2_i32_224 : i32 to vector<2x6xi32>
    %374 = arith.addi %372, %373 : vector<2x6xi32>
    %375 = arith.cmpi eq, %299, %374 : vector<2x6xi32>
    %376 = arith.extui %375 : vector<2x6xi1> to vector<2x6xi32>
    %377 = arith.sitofp %376 : vector<2x6xi32> to vector<2x6xf32>
    %cst_225 = arith.constant dense<0.000000e+00> : vector<2x128xf32>
    %378 = tpu.matmul %377, %345, %cst_225 {dimension_numbers = #tpu.dot_dimension_numbers<[1], [0], [0], [1], [0, 0, 1, 1], [], []>} : vector<2x6xf32>, vector<6x128xf32>, vector<2x128xf32> -> vector<2x128xf32>
    %379 = arith.truncf %378 : vector<2x128xf32> to vector<2x128xbf16>
    %c2_226 = arith.constant 2 : index
    %c0_227 = arith.constant 0 : index
    %c0_228 = arith.constant 0 : index
    %380 = vector.load %arg7[%c2_226, %c0_227, %c0_228] : memref<3x128x64xbf16, #tpu.memory_space<vmem>>, vector<1x128x64xbf16>
    %381 = vector.shape_cast %380 : vector<1x128x64xbf16> to vector<128x64xbf16>
    %cst_229 = arith.constant dense<0.000000e+00> : vector<2x64xf32>
    %382 = tpu.matmul %379, %381, %cst_229 {dimension_numbers = #tpu.dot_dimension_numbers<[1], [0], [0], [1], [0, 0, 1, 1], [], []>} : vector<2x128xbf16>, vector<128x64xbf16>, vector<2x64xf32> -> vector<2x64xf32>
    %383 = arith.addf %370, %382 : vector<2x64xf32>
    %384 = vector.broadcast %297 : vector<1x64xf32> to vector<2x64xf32>
    %385 = arith.addf %383, %384 : vector<2x64xf32>
    %cst_230 = arith.constant 0.000000e+00 : f32
    %386 = vector.broadcast %cst_230 : f32 to vector<2x64xf32>
    %387 = arith.maximumf %385, %386 : vector<2x64xf32>
    %388 = vector.extract_strided_slice %343 {offsets = [0, 0], sizes = [1, 32], strides = [1, 1]} : vector<2x64xf32> to vector<1x32xf32>
    %389 = vector.extract_strided_slice %343 {offsets = [0, 32], sizes = [1, 32], strides = [1, 1]} : vector<2x64xf32> to vector<1x32xf32>
    %390 = arith.addf %388, %389 : vector<1x32xf32>
    %391 = vector.extract_strided_slice %343 {offsets = [1, 0], sizes = [1, 32], strides = [1, 1]} : vector<2x64xf32> to vector<1x32xf32>
    %392 = arith.addf %390, %391 : vector<1x32xf32>
    %393 = vector.extract_strided_slice %343 {offsets = [1, 32], sizes = [1, 32], strides = [1, 1]} : vector<2x64xf32> to vector<1x32xf32>
    %394 = arith.addf %392, %393 : vector<1x32xf32>
    %cst_231 = arith.constant 2.500000e-01 : f32
    %395 = vector.broadcast %cst_231 : f32 to vector<1x32xf32>
    %396 = arith.mulf %395, %394 : vector<1x32xf32>
    %c0_232 = arith.constant 0 : index
    %c0_233 = arith.constant 0 : index
    %397 = vector.load %arg14[%c0_232, %c0_233] : memref<2x32xf32, #tpu.memory_space<vmem>>, vector<1x32xf32>
    tpu.vector_store %arg14[%c0_232, %c0_233], %396 {strides = array<i32>} : memref<2x32xf32, #tpu.memory_space<vmem>>, vector<1x32xf32>,
    %398 = vector.extract_strided_slice %387 {offsets = [0, 0], sizes = [1, 32], strides = [1, 1]} : vector<2x64xf32> to vector<1x32xf32>
    %399 = vector.extract_strided_slice %387 {offsets = [0, 32], sizes = [1, 32], strides = [1, 1]} : vector<2x64xf32> to vector<1x32xf32>
    %400 = arith.addf %398, %399 : vector<1x32xf32>
    %401 = vector.extract_strided_slice %387 {offsets = [1, 0], sizes = [1, 32], strides = [1, 1]} : vector<2x64xf32> to vector<1x32xf32>
    %402 = arith.addf %400, %401 : vector<1x32xf32>
    %403 = vector.extract_strided_slice %387 {offsets = [1, 32], sizes = [1, 32], strides = [1, 1]} : vector<2x64xf32> to vector<1x32xf32>
    %404 = arith.addf %402, %403 : vector<1x32xf32>
    %cst_234 = arith.constant 2.500000e-01 : f32
    %405 = vector.broadcast %cst_234 : f32 to vector<1x32xf32>
    %406 = arith.mulf %405, %404 : vector<1x32xf32>
    %c1_235 = arith.constant 1 : index
    %c0_236 = arith.constant 0 : index
    %407 = vector.load %arg14[%c1_235, %c0_236] : memref<2x32xf32, #tpu.memory_space<vmem>>, vector<1x32xf32>
    tpu.vector_store %arg14[%c1_235, %c0_236], %406 {strides = array<i32>} : memref<2x32xf32, #tpu.memory_space<vmem>>, vector<1x32xf32>,
    %c0_237 = arith.constant 0 : index
    %c0_238 = arith.constant 0 : index
    %408 = vector.load %arg14[%c0_237, %c0_238] : memref<2x32xf32, #tpu.memory_space<vmem>>, vector<2x32xf32>
    %c0_239 = arith.constant 0 : index
    %c0_240 = arith.constant 0 : index
    %409 = vector.load %arg9[%c0_239, %c0_240] : memref<32x32xf32, #tpu.memory_space<vmem>>, vector<32x32xf32>
    %cst_241 = arith.constant dense<0.000000e+00> : vector<2x32xf32>
    %410 = tpu.matmul %408, %409, %cst_241 {dimension_numbers = #tpu.dot_dimension_numbers<[1], [0], [0], [1], [0, 0, 1, 1], [], []>} : vector<2x32xf32>, vector<32x32xf32>, vector<2x32xf32> -> vector<2x32xf32>
    %c0_242 = arith.constant 0 : index
    %c0_243 = arith.constant 0 : index
    %411 = vector.load %arg10[%c0_242, %c0_243] : memref<1x32xf32, #tpu.memory_space<vmem>>, vector<1x32xf32>
    %412 = vector.broadcast %411 : vector<1x32xf32> to vector<2x32xf32>
    %413 = arith.addf %410, %412 : vector<2x32xf32>
    %cst_244 = arith.constant dense<0xFF800000> : vector<2xf32>
    %414 = vector.multi_reduction <maximumf>, %413, %cst_244 [1] : vector<2x32xf32> to vector<2xf32>
    %415 = vector.shape_cast %414 : vector<2xf32> to vector<2x1xf32>
    %416 = vector.broadcast %415 : vector<2x1xf32> to vector<2x32xf32>
    %417 = arith.subf %413, %416 : vector<2x32xf32>
    %418 = math.exp %417 : vector<2x32xf32>
    %cst_245 = arith.constant dense<0.000000e+00> : vector<2xf32>
    %419 = vector.multi_reduction <add>, %418, %cst_245 [1] : vector<2x32xf32> to vector<2xf32>
    %420 = vector.shape_cast %419 : vector<2xf32> to vector<2x1xf32>
    %421 = vector.broadcast %420 : vector<2x1xf32> to vector<2x32xf32>
    %422 = arith.divf %418, %421 : vector<2x32xf32>
    %423 = arith.mulf %408, %422 : vector<2x32xf32>
    %c0_246 = arith.constant 0 : index
    %c0_247 = arith.constant 0 : index
    %424 = vector.load %arg11[%c0_246, %c0_247] : memref<32x6xf32, #tpu.memory_space<vmem>>, vector<32x6xf32>
    %cst_248 = arith.constant dense<0.000000e+00> : vector<2x6xf32>
    %425 = tpu.matmul %423, %424, %cst_248 {dimension_numbers = #tpu.dot_dimension_numbers<[1], [0], [0], [1], [0, 0, 1, 1], [], []>} : vector<2x32xf32>, vector<32x6xf32>, vector<2x6xf32> -> vector<2x6xf32>
    %c0_249 = arith.constant 0 : index
    %c0_250 = arith.constant 0 : index
    %426 = vector.load %arg12[%c0_249, %c0_250] : memref<1x6xf32, #tpu.memory_space<vmem>>, vector<1x6xf32>
    %427 = vector.broadcast %426 : vector<1x6xf32> to vector<2x6xf32>
    %428 = arith.addf %425, %427 : vector<2x6xf32>
    %c0_251 = arith.constant 0 : index
    %c0_252 = arith.constant 0 : index
    %429 = vector.load %arg13[%c0_251, %c0_252] : memref<2x6xf32, #tpu.memory_space<vmem>>, vector<2x6xf32>
    tpu.vector_store %arg13[%c0_251, %c0_252], %428 {strides = array<i32>} : memref<2x6xf32, #tpu.memory_space<vmem>>, vector<2x6xf32>,
    return
  }
}

</mosaic_0001>

<bundles_post_ra>
// kernel: actor_forward.1
= control target key start
LH: loop header
LB: loop body
LE: loop exit
PB: predicated region body
PF: predicated region fallthrough
CT: control target
= control target key end

     0   :  { %20 = vsyncpa [#allocation6], 0  ;;  %s13978_s0 = inlined_call_operand.vmem [shape: f32[2,34,128], index: 0, kind: input, shape index: {}]   ;;  %s13979_s1 = inlined_call_operand.hbm [shape: bf16[3,128,512], index: 1, kind: input, shape index: {}]   ;;  %s13980_s2 = inlined_call_operand.vmem [shape: f32[1,512], index: 2, kind: input, shape index: {}]   ;;  %s13981_s3 = inlined_call_operand.vmem [shape: bf16[3,512,256], index: 3, kind: input, shape index: {}]   ;;  %s13982_s4 = inlined_call_operand.vmem [shape: f32[1,256], index: 4, kind: input, shape index: {}]   ;;  %s13983_s5 = inlined_call_operand.hbm [shape: bf16[3,256,128], index: 5, kind: input, shape index: {}]   ;;  %s13984_s6 = inlined_call_operand.vmem [shape: f32[1,128], index: 6, kind: input, shape index: {}]   ;;  %s13985_s7 = inlined_call_operand.vmem [shape: bf16[3,128,64], index: 7, kind: input, shape index: {}]   ;;  %s13986_s8 = inlined_call_operand.vmem [shape: f32[1,64], index: 8, kind: input, shape index: {}]   ;;  %s13987_s9 = inlined_call_operand.vmem [shape: f32[32,32], index: 9, kind: input, shape index: {}]   ;;  %s13988_s10 = inlined_call_operand.vmem [shape: f32[1,32], index: 10, kind: input, shape index: {}]   ;;  %s13989_s11 = inlined_call_operand.vmem [shape: f32[32,6], index: 11, kind: input, shape index: {}]   ;;  %s13990_s12 = inlined_call_operand.vmem [shape: f32[1,6], index: 12, kind: input, shape index: {}]   ;;  %s13991_s13 = inlined_call_operand.hbm [shape: f32[2,6], index: 13, kind: output, shape index: {0}]   ;;  %s13992_s14 = inlined_call_operand.hbm [shape: f32[2,32], index: 14, kind: output, shape index: {1}]  }
   0x1   :  { %21 = vsyncpa [#allocation9], 0 }
   0x2   :  { %22 = vsyncpa [#allocation7], 0 }
   0x3   :  { %23 = vsyncpa [#allocation12], 0  ;;  %s11615_s29 = smov [#allocation5]   ;;  %s11519_s17 = scalar_lea.hbm %s13979_s1, 12288 }
   0x4   :  { %s31_s30 = sshll.u32 %s11615_s29, 4  ;;  %p11520_p0 = scmp.ne.s32.totalorder %s13979_s1, %s11519_s17  ;;  %s32_s30 = int_to_ptr.vmem [resolvable:$true] %s31_s30 }
   0x5   :  { %p11523_p1 = scmp.lt.u32.totalorder %s11519_s17, %s13979_s1 }
   0x7   :  { %p11525_p2 = pnand %p11523_p1, %p11520_p0 }
   0x9   :  { %11528 = shalt.err (!%p11525_p2)
}
   0xa   :  { %s11529_s22 = scalar_lea.vmem %s32_s30, 12288  ;;  %p11534_p4 = scmp.lt.s32.totalorder %s32_s30, %s32_s30 }
   0xb   :  { %p11530_p3 = scmp.ne.s32.totalorder %s32_s30, %s11529_s22  ;;  %p11535_p5 = scmp.lt.s32.totalorder %s11529_s22, %s11529_s22 }
   0xd   :  { %p11536_p6 = por %p11535_p5, %p11534_p4 }
   0xf   :  { %p11537_p7 = pnand %p11536_p6, %p11530_p3 }
  0x11   :  { %11540 = shalt.err (!%p11537_p7)
}
  0x12   :  { %s11616_s23 = smov 256   ;;  %s11617_s24 = smov 16  }
  0x13   :  { %37 = dma.hbm_to_vmem [thread:$0]  %s13979_s1, 12288, %s32_s30, [#allocation6], %s11616_s23, %s11616_s23, %s11617_s24  }
  0x14   :  { %s11618_s27 = smov [#allocation8]   ;;  %s11541_s16 = scalar_lea.hbm %s13983_s5, 6144 }
  0x15   :  { %s49_s28 = sshll.u32 %s11618_s27, 4  ;;  %p11542_p8 = scmp.ne.s32.totalorder %s13983_s5, %s11541_s16  ;;  %s50_s28 = int_to_ptr.vmem [resolvable:$true] %s49_s28 }
  0x16   :  { %p11545_p9 = scmp.lt.u32.totalorder %s11541_s16, %s13983_s5 }
  0x18   :  { %p11547_p10 = pnand %p11545_p9, %p11542_p8 }
  0x1a   :  { %11550 = shalt.err (!%p11547_p10)
}
  0x1b   :  { %s11551_s21 = scalar_lea.vmem %s50_s28, 6144  ;;  %p11556_p12 = scmp.lt.s32.totalorder %s50_s28, %s50_s28 }
  0x1c   :  { %p11552_p11 = scmp.ne.s32.totalorder %s50_s28, %s11551_s21  ;;  %p11557_p13 = scmp.lt.s32.totalorder %s11551_s21, %s11551_s21 }
  0x1e   :  { %p11558_p0 = por %p11557_p13, %p11556_p12 }
  0x20   :  { %p11559_p1 = pnand %p11558_p0, %p11552_p11 }
  0x22   :  { %11562 = shalt.err (!%p11559_p1)
}
  0x23   :  { %s11619_s1 = smov 64   ;;  %s11620_s30 = smov 4  }
  0x24   :  { %55 = dma.hbm_to_vmem [thread:$0]  %s13983_s5, 6144, %s50_s28, [#allocation9], %s11619_s1, %s11619_s1, %s11620_s30  }
  0x25   :  { %11607 = dma.done.wait [#allocation6], 12288  }
  0x26   :  { %11608 = vsyncadd [#allocation6], 4294955008 }
  0x27   :  { %11609 = dma.done.wait [#allocation9], 6144  }
  0x28   :  { %11610 = vsyncadd [#allocation9], 4294961152  ;;  %v112_v0 = vlaneseq  ;;  %v11621_v1 = vmov 0.0   ;;  %v117_v8 = vld [vmem:[%s13978_s0] sm:$0xff]  ;;  %v118_v9 = vld [vmem:[%s13978_s0 + $0x8] sm:$0xff]  ;;  %vm130_vm1 = vcmask 277504  }
  0x29   :  { %77 = vst [vmem:[#allocation2] sm:$0xff] %v11621_v1  ;;  %78 = vst [vmem:[#allocation2 + $0x8] sm:$0xff] %v11621_v1  ;;  %v119_v10 = vld [vmem:[%s13978_s0 + $0x10] sm:$0xff]  ;;  %v11779_v12 = vpack.c.bf16 %v118_v9, %v117_v8  ;;  %v120_v13 = vld [vmem:[%s13978_s0 + $0x18] sm:$0xff]  ;;  %vm137_vm3 = vcmask 1041408   ;;  %v13993_v54 = vmov 0  }
  0x2a   :  { %79 = vst [vmem:[#allocation2 + $0x10] sm:$0xff] %v11621_v1  ;;  %80 = vst [vmem:[#allocation2 + $0x18] sm:$0xff] %v11621_v1  ;;  %v11754_v2 = vshrl.u32 %v112_v0, 7  ;;  %v11756_v3 = vand.u32 127, %v112_v0  ;;  %v11787_v14 = vpack.c.bf16 %v120_v13, %v119_v10  ;;  %v121_v17 = vld [vmem:[%s13978_s0 + $0x20] sm:$0x3] }
  0x2b   :  { %85 = vst [vmem:[#allocation2 + $0x40] sm:$0x3] %v11621_v1  ;;  %86 = vst [vmem:[#allocation2 + $0x48] sm:$0x3] %v11621_v1  ;;  %10455 = vmatprep.subr.bf16.mxu1 %v11779_v12  ;;  %10447 = vmatprep.subr.bf16.mxu0 %v11779_v12  ;;  %v10636_v18 = vld [vmem:[#allocation5 + $0x100] ss:$16 sps:$4 sm:$0xff]  }
  0x2c   :  { %87 = vst [vmem:[#allocation2 + $0x50] sm:$0x3] %v11621_v1  ;;  %88 = vst [vmem:[#allocation2 + $0x58] sm:$0x3] %v11621_v1  ;;  %v11759_v4 = vmul.u32 2, %v11754_v2  ;;  %v114_v5 = vadd.s32 8, %v11754_v2  ;;  %10457 = vmatpush3.bf16.msra.mxu1 %v11779_v12  ;;  %10449 = vmatpush3.bf16.msra.mxu0 %v11779_v12 }
  0x2d   :  { %89 = vst [vmem:[#allocation2 + $0x60] sm:$0xff] %v11621_v1  ;;  %90 = vst [vmem:[#allocation2 + $0x68] sm:$0xff] %v11621_v1  ;;  %10459 = vmatprep.subr.bf16.mxu1 %v11787_v14  ;;  %10451 = vmatprep.subr.bf16.mxu0 %v11787_v14  ;;  %v10638_v20 = vld [vmem:[#allocation5 + $0x104] ss:$16 sps:$4 sm:$0xff]   ;;  %v10639_v21 = vld [vmem:[#allocation5 + $0x108] ss:$16 sps:$4 sm:$0xff]  }
  0x2e   :  { %91 = vst [vmem:[#allocation2 + $0x70] sm:$0xff] %v11621_v1  ;;  %92 = vst [vmem:[#allocation2 + $0x78] sm:$0xff] %v11621_v1  ;;  %v249_v6 = vadd.s32 1, %v11759_v4  ;;  %v11763_v7 = vmul.u32 2, %v114_v5  ;;  %vm124_vm0 = vcmp.eq.s32.totalorder %v11756_v3, %v11759_v4  ;;  %v10641_v23 = vld [vmem:[#allocation5 + $0x10c] ss:$16 sps:$4 sm:$0xff]  }
  0x2f   :  { %97 = vst [vmem:[#allocation2 + $0xa0] sm:$0x3] %v11621_v1  ;;  %98 = vst [vmem:[#allocation2 + $0xa8] sm:$0x3] %v11621_v1  ;;  %v11777_v11 = vsel %vm124_vm0, 1.0, %v11621_v1  ;;  %v864_v55 = vadd.s32 2, %v11759_v4 }
  0x30   :  { %99 = vst [vmem:[#allocation2 + $0xb0] sm:$0x3] %v11621_v1  ;;  %100 = vst [vmem:[#allocation2 + $0xb8] sm:$0x3] %v11621_v1  ;;  %vm251_vm2 = vcmp.eq.s32.totalorder %v11756_v3, %v249_v6  ;;  %10206 = vmatprep.mubr.msk.f32.mxu0 %vm130_vm1, %v11777_v11  ;;  %v250_v16 = vadd.s32 1, %v11763_v7  ;;  %10461 = vmatpush3.bf16.msra.mxu1 %v11787_v14  ;;  %vm125_vm5 = vcmp.eq.s32.totalorder %v11756_v3, %v11763_v7  ;;  %v11480_v62 = vld [vmem:[#allocation2] sm:$0xff] }
  0x31   :  { %101 = vst [vmem:[#allocation3] sm:$0xff] %v11621_v1  ;;  %102 = vst [vmem:[#allocation3 + $0x8] sm:$0xff] %v11621_v1  ;;  %v11790_v15 = vsel %vm251_vm2, 1.0, %v11621_v1  ;;  %10217 = vmatprep.subr.msk.mxu1 %vm137_vm3, %v121_v17  ;;  %10453 = vmatpush3.bf16.msra.mxu0 %v11787_v14  ;;  %v11815_v22 = vsel %vm125_vm5, 1.0, %v11621_v1  ;;  %v10644_v24 = vld [vmem:[#allocation5 + $0x124] ss:$16 sps:$4 sm:$0xff]   ;;  %vm866_vm6 = vcmp.eq.s32.totalorder %v11756_v3, %v864_v55 }
  0x32   :  { %103 = vst [vmem:[#allocation3 + $0x10] sm:$0x3] %v11621_v1  ;;  %104 = vst [vmem:[#allocation3 + $0x18] sm:$0x3] %v11621_v1  ;;  %10219 = vmatprep.mubr.msk.f32.mxu1 %vm130_vm1, %v11790_v15  ;;  %vm252_vm4 = vcmp.eq.s32.totalorder %v11756_v3, %v250_v16  ;;  %10204 = vmatprep.subr.msk.mxu0 %vm137_vm3, %v121_v17  ;;  %v10647_v25 = vld [vmem:[#allocation5 + $0x12c] ss:$16 sps:$4 sm:$0xff]  }
  0x33   :  { %105 = vst [vmem:[#allocation3 + $0x20] sm:$0xff] %v11621_v1  ;;  %106 = vst [vmem:[#allocation3 + $0x28] sm:$0xff] %v11621_v1  ;;  %v11811_v19 = vsel %vm252_vm4, 1.0, %v11621_v1  ;;  %v10642_v26 = vld [vmem:[#allocation5 + $0x120] ss:$16 sps:$4 sm:$0xff]   ;;  %v865_v56 = vadd.s32 2, %v11763_v7 }
  0x34   :  { %107 = vst [vmem:[#allocation3 + $0x30] sm:$0x3] %v11621_v1  ;;  %108 = vst [vmem:[#allocation3 + $0x38] sm:$0x3] %v11621_v1  ;;  %10218 = vmatpush3.msk.msra.mxu1 %vm137_vm3, %v121_v17  ;;  %v10645_v27 = vld [vmem:[#allocation5 + $0x128] ss:$16 sps:$4 sm:$0xff]  }
  0x35   :  { %109 = vst [vmem:[#allocation4] sm:$0x3f] %v11621_v1  ;;  %110 = vst [vmem:[#allocation4 + $0x8] sm:$0x3f] %v11621_v1  ;;  %10220 = vmatmul.mubr.msk.f32.vlgmr.msra.gmra.mrb[0].mxu1 %vm130_vm1, %v11811_v19  ;;  %10205 = vmatpush3.msk.msra.mxu0 %vm137_vm3, %v121_v17  ;;  %v10650_v28 = vld [vmem:[#allocation5 + $0x144] ss:$16 sps:$4 sm:$0xff]   ;;  %vm867_vm7 = vcmp.eq.s32.totalorder %v11756_v3, %v865_v56 }
  0x36   :  { %14034 = vst [vmem:[#allocation17_spill] sm:$0xff] %v11754_v2  ;;  %14035 = vst [vmem:[#allocation18_spill] sm:$0xff] %v11777_v11  ;;  %10207 = vmatmul.mubr.msk.f32.vlgmr.msra.gmra.mrb[0].mxu0 %vm130_vm1, %v11815_v22  ;;  %532 = vmatprep.subr.bf16.mxu0 %v10638_v20  ;;  %v10653_v29 = vld [vmem:[#allocation5 + $0x14c] ss:$16 sps:$4 sm:$0xff]   ;;  %v10648_v30 = vld [vmem:[#allocation5 + $0x140] ss:$16 sps:$4 sm:$0xff]  }
  0x37   :  { %14036 = vst [vmem:[#allocation19_spill] sm:$0xff] %v11790_v15  ;;  %575 = vmatprep.subr.bf16.mxu1 %v10641_v23  ;;  %533 = vmatpush1.bf16.msra.mxu0 %v10636_v18  ;;  %v10651_v31 = vld [vmem:[#allocation5 + $0x148] ss:$16 sps:$4 sm:$0xff]   ;;  %v10656_v32 = vld [vmem:[#allocation5 + $0x164] ss:$16 sps:$4 sm:$0xff]   ;;  %v11837_v63 = vsel %vm866_vm6, 1.0, %v11480_v62 }
  0x38   :  { %576 = vmatpush1.bf16.msra.mxu1 %v10639_v21  ;;  %534 = vmatprep.subr.bf16.mxu0 %v10644_v24  ;;  %v10654_v33 = vld [vmem:[#allocation5 + $0x160] ss:$16 sps:$4 sm:$0xff]   ;;  %v10659_v34 = vld [vmem:[#allocation5 + $0x16c] ss:$16 sps:$4 sm:$0xff]   ;;  %v10657_v35 = vld [vmem:[#allocation5 + $0x168] ss:$16 sps:$4 sm:$0xff]  }
  0x39   :  { %577 = vmatprep.subr.bf16.mxu1 %v10647_v25  ;;  %v10662_v36 = vld [vmem:[#allocation5 + $0x184] ss:$16 sps:$4 sm:$0xff]   ;;  %v10665_v37 = vld [vmem:[#allocation5 + $0x18c] ss:$16 sps:$4 sm:$0xff]   ;;  %v10660_v38 = vld [vmem:[#allocation5 + $0x180] ss:$16 sps:$4 sm:$0xff]   ;;  %564 = vmatprep.mubr.bf16.mxu0 %v13993_v54 }
  0x3a   :  { %v10663_v39 = vld [vmem:[#allocation5 + $0x188] ss:$16 sps:$4 sm:$0xff]   ;;  %v10668_v40 = vld [vmem:[#allocation5 + $0x1a4] ss:$16 sps:$4 sm:$0xff]   ;;  %v10671_v41 = vld [vmem:[#allocation5 + $0x1ac] ss:$16 sps:$4 sm:$0xff]   ;;  %607 = vmatprep.mubr.bf16.mxu1 %v13993_v54 }
  0x3b   :  { %535 = vmatpush1.bf16.msra.mxu0 %v10642_v26  ;;  %v10666_v42 = vld [vmem:[#allocation5 + $0x1a0] ss:$16 sps:$4 sm:$0xff]   ;;  %v10669_v43 = vld [vmem:[#allocation5 + $0x1a8] ss:$16 sps:$4 sm:$0xff]   ;;  %v10674_v44 = vld [vmem:[#allocation5 + $0x1c4] ss:$16 sps:$4 sm:$0xff]  }
  0x3c   :  { %578 = vmatpush1.bf16.msra.mxu1 %v10645_v27  ;;  %536 = vmatprep.subr.bf16.mxu0 %v10650_v28  ;;  %v10677_v45 = vld [vmem:[#allocation5 + $0x1cc] ss:$16 sps:$4 sm:$0xff]   ;;  %v10672_v46 = vld [vmem:[#allocation5 + $0x1c0] ss:$16 sps:$4 sm:$0xff]   ;;  %v10675_v47 = vld [vmem:[#allocation5 + $0x1c8] ss:$16 sps:$4 sm:$0xff]  }
  0x3d   :  { %579 = vmatprep.subr.bf16.mxu1 %v10653_v29  ;;  %v10680_v48 = vld [vmem:[#allocation5 + $0x1e4] ss:$16 sps:$4 sm:$0xff]   ;;  %v10683_v49 = vld [vmem:[#allocation5 + $0x1ec] ss:$16 sps:$4 sm:$0xff]   ;;  %v10678_v50 = vld [vmem:[#allocation5 + $0x1e0] ss:$16 sps:$4 sm:$0xff]  }
  0x3e   :  { %v10681_v51 = vld [vmem:[#allocation5 + $0x1e8] ss:$16 sps:$4 sm:$0xff]   ;;  %v10686_v52 = vld [vmem:[#allocation5 + $0x4] ss:$16 sps:$4 sm:$0xff]   ;;  %v10689_v53 = vld [vmem:[#allocation5 + $0xc] ss:$16 sps:$4 sm:$0xff]  }
  0x3f   :  { %537 = vmatpush1.bf16.msra.mxu0 %v10648_v30  ;;  %v11828_v57 = vld [vmem:[#allocation5] ss:$16 sps:$4 sm:$0xff]   ;;  %v11830_v58 = vld [vmem:[#allocation5 + $0x8] ss:$16 sps:$4 sm:$0xff]   ;;  %v11833_v60 = vld [vmem:[#allocation5 + $0x24] ss:$16 sps:$4 sm:$0xff]  }
  0x40   :  { %580 = vmatpush1.bf16.msra.mxu1 %v10651_v31  ;;  %538 = vmatprep.subr.bf16.mxu0 %v10656_v32  ;;  %v11835_v61 = vld [vmem:[#allocation5 + $0x2c] ss:$16 sps:$4 sm:$0xff]   ;;  %v11839_v6 = vsel %vm867_vm7, 1.0, %v11480_v62  ;;  %v11841_v7 = vld [vmem:[#allocation5 + $0x20] ss:$16 sps:$4 sm:$0xff]   ;;  %vm1286_vm8 = vcmask 1040384  }
  0x41   :  { %581 = vmatprep.subr.bf16.mxu1 %v10659_v34  ;;  %14037 = vst [vmem:[#allocation20_spill] sm:$0xff] %v11839_v6  ;;  %v11843_v8 = vld [vmem:[#allocation5 + $0x28] ss:$16 sps:$4 sm:$0xff]   ;;  %v11847_v3 = vld [vmem:[#allocation5 + $0x44] ss:$16 sps:$4 sm:$0xff]   ;;  %vm2476_vm9 = vcmask 146432  }
  0x42   :  { %v11849_v10 = vld [vmem:[#allocation5 + $0x4c] ss:$16 sps:$4 sm:$0xff]   ;;  %v11855_v13 = vld [vmem:[#allocation5 + $0x40] ss:$16 sps:$4 sm:$0xff]   ;;  %v11857_v16 = vld [vmem:[#allocation5 + $0x48] ss:$16 sps:$4 sm:$0xff]  }
  0x43   :  { %539 = vmatpush1.bf16.msra.mxu0 %v10654_v33  ;;  %v11861_v17 = vld [vmem:[#allocation5 + $0x64] ss:$16 sps:$4 sm:$0xff]   ;;  %v11863_v18 = vld [vmem:[#allocation5 + $0x6c] ss:$16 sps:$4 sm:$0xff]   ;;  %v11869_v20 = vld [vmem:[#allocation5 + $0x60] ss:$16 sps:$4 sm:$0xff]  }
  0x44   :  { %582 = vmatpush1.bf16.msra.mxu1 %v10657_v35  ;;  %540 = vmatprep.subr.bf16.mxu0 %v10662_v36  ;;  %v11871_v21 = vld [vmem:[#allocation5 + $0x68] ss:$16 sps:$4 sm:$0xff]   ;;  %v11873_v23 = vld [vmem:[#allocation5 + $0x84] ss:$16 sps:$4 sm:$0xff]   ;;  %v11875_v24 = vld [vmem:[#allocation5 + $0x8c] ss:$16 sps:$4 sm:$0xff]  }
  0x45   :  { %583 = vmatprep.subr.bf16.mxu1 %v10665_v37  ;;  %v11881_v25 = vld [vmem:[#allocation5 + $0x80] ss:$16 sps:$4 sm:$0xff]   ;;  %v11883_v26 = vld [vmem:[#allocation5 + $0x88] ss:$16 sps:$4 sm:$0xff]   ;;  %v11885_v27 = vld [vmem:[#allocation5 + $0xa4] ss:$16 sps:$4 sm:$0xff]  }
  0x46   :  { %v11887_v28 = vld [vmem:[#allocation5 + $0xac] ss:$16 sps:$4 sm:$0xff]   ;;  %v11893_v29 = vld [vmem:[#allocation5 + $0xa0] ss:$16 sps:$4 sm:$0xff]   ;;  %v11895_v30 = vld [vmem:[#allocation5 + $0xa8] ss:$16 sps:$4 sm:$0xff]  }
  0x47   :  { %541 = vmatpush1.bf16.msra.mxu0 %v10660_v38  ;;  %v11897_v31 = vld [vmem:[#allocation5 + $0xc4] ss:$16 sps:$4 sm:$0xff]   ;;  %v11899_v32 = vld [vmem:[#allocation5 + $0xcc] ss:$16 sps:$4 sm:$0xff]   ;;  %v11905_v33 = vld [vmem:[#allocation5 + $0xc0] ss:$16 sps:$4 sm:$0xff]  }
  0x48   :  { %584 = vmatpush1.bf16.msra.mxu1 %v10663_v39  ;;  %542 = vmatprep.subr.bf16.mxu0 %v10668_v40  ;;  %v11907_v34 = vld [vmem:[#allocation5 + $0xc8] ss:$16 sps:$4 sm:$0xff]   ;;  %v11909_v35 = vld [vmem:[#allocation5 + $0xe4] ss:$16 sps:$4 sm:$0xff]   ;;  %v11911_v36 = vld [vmem:[#allocation5 + $0xec] ss:$16 sps:$4 sm:$0xff]  }
  0x49   :  { %585 = vmatprep.subr.bf16.mxu1 %v10671_v41  ;;  %v11917_v37 = vld [vmem:[#allocation5 + $0xe0] ss:$16 sps:$4 sm:$0xff]   ;;  %v11919_v38 = vld [vmem:[#allocation5 + $0xe8] ss:$16 sps:$4 sm:$0xff]   ;;  %v11921_v39 = vld [vmem:[#allocation5 + $0x20c] ss:$16 sps:$4 sm:$0xff]  }
  0x4a   :  { %v11927_v40 = vld [vmem:[#allocation5 + $0x208] ss:$16 sps:$4 sm:$0xff]   ;;  %v11931_v41 = vld [vmem:[#allocation5 + $0x22c] ss:$16 sps:$4 sm:$0xff]   ;;  %v11989_v55 = vld [vmem:[#allocation5 + $0x264] ss:$16 sps:$4 sm:$0xff]  }
  0x4b   :  { %543 = vmatpush1.bf16.msra.mxu0 %v10666_v42  ;;  %v11937_v42 = vld [vmem:[#allocation5 + $0x228] ss:$16 sps:$4 sm:$0xff]   ;;  %14050 = vst [vmem:[#allocation33_spill] sm:$0xff] %v11989_v55  ;;  %v11992_v56 = vld [vmem:[#allocation5 + $0x2ac] ss:$16 sps:$4 sm:$0xff]   ;;  %vm11623_vm10 = vmmov 1  }
  0x4c   :  { %586 = vmatpush1.bf16.msra.mxu1 %v10669_v43  ;;  %544 = vmatprep.subr.bf16.mxu0 %v10674_v44  ;;  %v11942_v43 = vld [vmem:[#allocation5 + $0x24c] ss:$16 sps:$4 sm:$0xff]   ;;  %v11948_v44 = vld [vmem:[#allocation5 + $0x204] ss:$16 sps:$4 sm:$0xff]   ;;  %14051 = vst [vmem:[#allocation34_spill] sm:$0xff] %v11992_v56  ;;  %vm13537_vm11 = vmpackc.low %vm137_vm3, %vm11623_vm10  ;;  %vm6242_vm12 = vcmask 80896  }
  0x4d   :  { %587 = vmatprep.subr.bf16.mxu1 %v10677_v45  ;;  %14038 = vst [vmem:[#allocation21_spill] sm:$0xff] %v11942_v43  ;;  %14039 = vst [vmem:[#allocation22_spill] sm:$0xff] %v11948_v44  ;;  %v11951_v45 = vld [vmem:[#allocation5 + $0x200] ss:$16 sps:$4 sm:$0xff]   ;;  %v11998_v62 = vld [vmem:[#allocation5 + $0x2a8] ss:$16 sps:$4 sm:$0xff]  }
  0x4e   :  { %14040 = vst [vmem:[#allocation23_spill] sm:$0xff] %v11951_v45  ;;  %14053 = vst [vmem:[#allocation36_spill] sm:$0xff] %v11998_v62  ;;  %vm11624_vm13 = vmmov 0   ;;  %vm7733_vm14 = vcmask 1045504   ;;  %vm7730_vm15 = vcmask 48128   ;;  %vm8630_vm0 = vcmask 253952  }
  0x4f   :  { %545 = vmatpush1.bf16.msra.mxu0 %v10672_v46  ;;  %v11481_v46 = vld [vmem:[%s13978_s0 + $0x20] sm:$0x3]  ;;  %vm8732_vm2 = vcmask 254976   ;;  %s11627_s25 = smov [#allocation11]  }
  0x50   :  { %588 = vmatpush1.bf16.msra.mxu1 %v10675_v47  ;;  %546 = vmatprep.subr.bf16.mxu0 %v10680_v48  ;;  %v11959_v47 = vld [vmem:[#allocation5 + $0x224] ss:$16 sps:$4 sm:$0xff]   ;;  %v11962_v48 = vld [vmem:[#allocation5 + $0x26c] ss:$16 sps:$4 sm:$0xff]   ;;  %s8847_s26 = sshll.u32 %s11627_s25, 4  ;;  %s8848_s26 = int_to_ptr.vmem [resolvable:$true] %s8847_s26 }
  0x51   :  { %589 = vmatprep.subr.bf16.mxu1 %v10683_v49  ;;  %14042 = vst [vmem:[#allocation25_spill] sm:$0xff] %v11959_v47  ;;  %14043 = vst [vmem:[#allocation26_spill] sm:$0xff] %v11962_v48  ;;  %v11968_v49 = vld [vmem:[#allocation5 + $0x268] ss:$16 sps:$4 sm:$0xff]   ;;  %p11568_p3 = scmp.lt.s32.totalorder %s8848_s26, %s8848_s26 }
  0x52   :  { %14045 = vst [vmem:[#allocation28_spill] sm:$0xff] %v11968_v49 }
  0x53   :  { %547 = vmatpush1.bf16.msra.mxu0 %v10678_v50  ;;  %v11973_v50 = vld [vmem:[#allocation5 + $0x244] ss:$16 sps:$4 sm:$0xff]  }
  0x54   :  { %590 = vmatpush1.bf16.msra.mxu1 %v10681_v51  ;;  %778 = vmatprep.subr.bf16.mxu0 %v10686_v52  ;;  %14046 = vst [vmem:[#allocation29_spill] sm:$0xff] %v11973_v50  ;;  %v11975_v51 = vld [vmem:[#allocation5 + $0x28c] ss:$16 sps:$4 sm:$0xff]   ;;  %v11983_v52 = vld [vmem:[#allocation5 + $0x240] ss:$16 sps:$4 sm:$0xff]  }
  0x55   :  { %821 = vmatprep.subr.bf16.mxu1 %v10689_v53  ;;  %14047 = vst [vmem:[#allocation30_spill] sm:$0xff] %v11975_v51  ;;  %14048 = vst [vmem:[#allocation31_spill] sm:$0xff] %v11983_v52  ;;  %v11986_v53 = vld [vmem:[#allocation5 + $0x288] ss:$16 sps:$4 sm:$0xff]  }
  0x56   :  { %14049 = vst [vmem:[#allocation32_spill] sm:$0xff] %v11986_v53 }
 0x108   :  { %v10221_v59 = vpop.f32.mrb[0].mxu1 }
 0x109   :  { %v329_v0 = vpop.f32.mrb[1].mxu1  ;;  %v10208_v1 = vpop.f32.mrb[0].mxu0 }
 0x10a   :  { %v338_v4 = vpack.c.bf16 %v10221_v59, %v329_v0  ;;  %v207_v5 = vpop.f32.mrb[1].mxu0  ;;  %v11995_v59 = vld [vmem:[#allocation5 + $0x260] ss:$16 sps:$4 sm:$0xff]   ;;  %v12001_v0 = vld [vmem:[#allocation5 + $0x284] ss:$16 sps:$4 sm:$0xff]  }
 0x10b   :  { %v11845_v9 = vpack.c.bf16 %v10208_v1, %v207_v5  ;;  %14052 = vst [vmem:[#allocation35_spill] sm:$0xff] %v11995_v59  ;;  %14054 = vst [vmem:[#allocation37_spill] sm:$0xff] %v12001_v0  ;;  %v12004_v1 = vld [vmem:[#allocation5 + $0x2cc] ss:$16 sps:$4 sm:$0xff]   ;;  %v12010_v5 = vld [vmem:[#allocation5 + $0x2c8] ss:$16 sps:$4 sm:$0xff]  }
 0x10c   :  { %565 = vmatmul.mubr.bf16.vlgmr.msra.gmra.mrb[4].mxu0 %v338_v4  ;;  %608 = vmatmul.mubr.bf16.vlgmr.msra.gmra.mrb[4].mxu1 %v338_v4  ;;  %14055 = vst [vmem:[#allocation38_spill] sm:$0xff] %v12004_v1  ;;  %v12007_v4 = vld [vmem:[#allocation5 + $0x280] ss:$16 sps:$4 sm:$0xff]   ;;  %14057 = vst [vmem:[#allocation40_spill] sm:$0xff] %v12010_v5 }
 0x10d   :  { %779 = vmatpush1.bf16.msra.mxu0 %v11828_v57  ;;  %822 = vmatpush1.bf16.msra.mxu1 %v11830_v58  ;;  %14056 = vst [vmem:[#allocation39_spill] sm:$0xff] %v12007_v4 }
 0x10e   :  { %780 = vmatprep.subr.bf16.mxu0 %v11833_v60  ;;  %823 = vmatprep.subr.bf16.mxu1 %v11835_v61 }
 0x10f   :  { %810 = vmatprep.mubr.bf16.mxu0 %v13993_v54  ;;  %853 = vmatprep.mubr.bf16.mxu1 %v13993_v54 }
 0x111   :  { %781 = vmatpush1.bf16.msra.mxu0 %v11841_v7  ;;  %824 = vmatpush1.bf16.msra.mxu1 %v11843_v8 }
 0x112   :  { %782 = vmatprep.subr.bf16.mxu0 %v11847_v3  ;;  %825 = vmatprep.subr.bf16.mxu1 %v11849_v10 }
 0x115   :  { %783 = vmatpush1.bf16.msra.mxu0 %v11855_v13  ;;  %826 = vmatpush1.bf16.msra.mxu1 %v11857_v16 }
 0x116   :  { %784 = vmatprep.subr.bf16.mxu0 %v11861_v17  ;;  %827 = vmatprep.subr.bf16.mxu1 %v11863_v18 }
 0x119   :  { %785 = vmatpush1.bf16.msra.mxu0 %v11869_v20  ;;  %828 = vmatpush1.bf16.msra.mxu1 %v11871_v21 }
 0x11a   :  { %786 = vmatprep.subr.bf16.mxu0 %v11873_v23  ;;  %829 = vmatprep.subr.bf16.mxu1 %v11875_v24 }
 0x11d   :  { %787 = vmatpush1.bf16.msra.mxu0 %v11881_v25  ;;  %830 = vmatpush1.bf16.msra.mxu1 %v11883_v26 }
 0x11e   :  { %788 = vmatprep.subr.bf16.mxu0 %v11885_v27  ;;  %831 = vmatprep.subr.bf16.mxu1 %v11887_v28 }
 0x121   :  { %789 = vmatpush1.bf16.msra.mxu0 %v11893_v29  ;;  %832 = vmatpush1.bf16.msra.mxu1 %v11895_v30 }
 0x122   :  { %790 = vmatprep.subr.bf16.mxu0 %v11897_v31  ;;  %833 = vmatprep.subr.bf16.mxu1 %v11899_v32 }
 0x125   :  { %791 = vmatpush1.bf16.msra.mxu0 %v11905_v33  ;;  %834 = vmatpush1.bf16.msra.mxu1 %v11907_v34 }
 0x126   :  { %792 = vmatprep.subr.bf16.mxu0 %v11909_v35  ;;  %835 = vmatprep.subr.bf16.mxu1 %v11911_v36 }
 0x129   :  { %793 = vmatpush1.bf16.msra.mxu0 %v11917_v37  ;;  %836 = vmatpush1.bf16.msra.mxu1 %v11919_v38 }
 0x12a   :  { %10463 = vmatprep.subr.bf16.mxu0 %v11779_v12  ;;  %1190 = vmatprep.subr.bf16.mxu1 %v11921_v39 }
 0x12c   :  { %811 = vmatmul.mubr.bf16.vlgmr.msra.gmra.mrb[4].mxu0 %v11845_v9  ;;  %854 = vmatmul.mubr.bf16.vlgmr.msra.gmra.mrb[4].mxu1 %v11845_v9  ;;  %v12013_v9 = vld [vmem:[#allocation5 + $0x2a4] ss:$16 sps:$4 sm:$0xff]  }
 0x12d   :  { %10465 = vmatpush3.bf16.msra.mxu0 %v11779_v12  ;;  %10232 = vmatprep.mubr.msk.f32.mxu0 %vm130_vm1, %v11837_v63  ;;  %v11953_v12 = vld [vmem:[#allocation5 + $0x248] ss:$16 sps:$4 sm:$0xff]   ;;  %14058 = vst [vmem:[#allocation41_spill] sm:$0xff] %v12013_v9 }
 0x12e   :  { %10467 = vmatprep.subr.bf16.mxu0 %v11787_v14  ;;  %1191 = vmatpush1.bf16.msra.mxu1 %v11927_v40  ;;  %14041 = vst [vmem:[#allocation24_spill] sm:$0xff] %v11953_v12 }
 0x12f   :  { %1192 = vmatprep.subr.bf16.mxu1 %v11931_v41  ;;  %1222 = vmatprep.mubr.bf16.mxu1 %v13993_v54 }
 0x131   :  { %10469 = vmatpush3.bf16.msra.mxu0 %v11787_v14  ;;  %v11966_v14 = vld [vmem:[#allocation5 + $0x220] ss:$16 sps:$4 sm:$0xff]  }
 0x132   :  { %10230 = vmatprep.subr.msk.mxu0 %vm137_vm3, %v11481_v46  ;;  %1193 = vmatpush1.bf16.msra.mxu1 %v11937_v42  ;;  %14044 = vst [vmem:[#allocation27_spill] sm:$0xff] %v11966_v14 }
 0x133   :  { %1194 = vmatprep.subr.bf16.mxu1 %v11942_v43 }
 0x135   :  { %10231 = vmatpush3.msk.msra.mxu0 %vm137_vm3, %v11481_v46  ;;  %v12017_v46 = vld [vmem:[#allocation5 + $0x2a0] ss:$16 sps:$4 sm:$0xff]  }
 0x136   :  { %10233 = vmatmul.mubr.msk.f32.vlgmr.msra.gmra.mrb[2].mxu0 %vm130_vm1, %v11839_v6  ;;  %1147 = vmatprep.subr.bf16.mxu0 %v11948_v44  ;;  %14059 = vst [vmem:[#allocation42_spill] sm:$0xff] %v12017_v46 }
 0x137   :  { %1148 = vmatpush1.bf16.msra.mxu0 %v11951_v45  ;;  %1195 = vmatpush1.bf16.msra.mxu1 %v11953_v12 }
 0x138   :  { %1149 = vmatprep.subr.bf16.mxu0 %v11959_v47  ;;  %1196 = vmatprep.subr.bf16.mxu1 %v11962_v48 }
 0x139   :  { %1179 = vmatprep.mubr.bf16.mxu0 %v13993_v54  ;;  %v12021_v54 = vld [vmem:[#allocation5 + $0x2c4] ss:$16 sps:$4 sm:$0xff]  }
 0x13a   :  { %14060 = vst [vmem:[#allocation43_spill] sm:$0xff] %v12021_v54 }
 0x13b   :  { %1150 = vmatpush1.bf16.msra.mxu0 %v11966_v14  ;;  %1197 = vmatpush1.bf16.msra.mxu1 %v11968_v49 }
 0x13c   :  { %1151 = vmatprep.subr.bf16.mxu0 %v11973_v50  ;;  %1198 = vmatprep.subr.bf16.mxu1 %v11975_v51 }
 0x13f   :  { %1152 = vmatpush1.bf16.msra.mxu0 %v11983_v52  ;;  %1199 = vmatpush1.bf16.msra.mxu1 %v11986_v53  ;;  %v11498_v52 = vld [vmem:[#allocation5 + $0x184] ss:$16 sps:$4 sm:$0xff]  }
 0x140   :  { %1153 = vmatprep.subr.bf16.mxu0 %v11989_v55  ;;  %1200 = vmatprep.subr.bf16.mxu1 %v11992_v56 }
 0x143   :  { %1154 = vmatpush1.bf16.msra.mxu0 %v11995_v59  ;;  %1201 = vmatpush1.bf16.msra.mxu1 %v11998_v62  ;;  %v12024_v59 = vld [vmem:[#allocation5 + $0x2c0] ss:$16 sps:$4 sm:$0xff]  }
 0x144   :  { %1155 = vmatprep.subr.bf16.mxu0 %v12001_v0  ;;  %1202 = vmatprep.subr.bf16.mxu1 %v12004_v1  ;;  %14061 = vst [vmem:[#allocation44_spill] sm:$0xff] %v12024_v59  ;;  %v12027_v0 = vld [vmem:[#allocation5 + $0x2e4] ss:$16 sps:$4 sm:$0xff]   ;;  %v12030_v1 = vld [vmem:[#allocation5 + $0x2e0] ss:$16 sps:$4 sm:$0xff]  }
 0x145   :  { %14062 = vst [vmem:[#allocation45_spill] sm:$0xff] %v12027_v0  ;;  %14063 = vst [vmem:[#allocation46_spill] sm:$0xff] %v12030_v1 }
 0x147   :  { %1156 = vmatpush1.bf16.msra.mxu0 %v12007_v4  ;;  %1203 = vmatpush1.bf16.msra.mxu1 %v12010_v5  ;;  %v12034_v4 = vld [vmem:[#allocation5 + $0x2ec] ss:$16 sps:$4 sm:$0xff]  }
 0x148   :  { %1157 = vmatprep.subr.bf16.mxu0 %v12013_v9  ;;  %14064 = vst [vmem:[#allocation47_spill] sm:$0xff] %v12034_v4  ;;  %v12036_v9 = vld [vmem:[#allocation5 + $0x2e8] ss:$16 sps:$4 sm:$0xff]   ;;  %1204 = vmatprep.subr.bf16.mxu1 %v12034_v4 }
 0x149   :  { %14065 = vst [vmem:[#allocation48_spill] sm:$0xff] %v12036_v9 }
 0x14b   :  { %1158 = vmatpush1.bf16.msra.mxu0 %v12017_v46  ;;  %1205 = vmatpush1.bf16.msra.mxu1 %v12036_v9  ;;  %v11497_v9 = vld [vmem:[#allocation5 + $0x168] ss:$16 sps:$4 sm:$0xff]  }
 0x14c   :  { %1159 = vmatprep.subr.bf16.mxu0 %v12021_v54  ;;  %v8972_v54 = vld [vmem:[%s13978_s0 + $0x28] sm:$0xff] }
 0x14f   :  { %1160 = vmatpush1.bf16.msra.mxu0 %v12024_v59  ;;  %v8973_v59 = vld [vmem:[%s13978_s0 + $0x30] sm:$0xff] }
 0x150   :  { %1161 = vmatprep.subr.bf16.mxu0 %v12027_v0  ;;  %v12046_v46 = vpack.c.bf16 %v8973_v59, %v8972_v54  ;;  %v8975_v0 = vld [vmem:[%s13978_s0 + $0x40] sm:$0xff]  ;;  %v12066_v54 = vld [vmem:[%s13978_s0 + $0x48] sm:$0x3] }
 0x151   :  { %14066 = vst [vmem:[#allocation49_spill] sm:$0xff] %v12066_v54  ;;  %v11482_v59 = vld [vmem:[#allocation5 + $0x104] ss:$16 sps:$4 sm:$0xff]  }
 0x152   :  { %10471 = vmatprep.subr.bf16.mxu1 %v12046_v46 }
 0x153   :  { %1162 = vmatpush1.bf16.msra.mxu0 %v12030_v1  ;;  %v8974_v1 = vld [vmem:[%s13978_s0 + $0x38] sm:$0xff] }
 0x154   :  { %10479 = vmatprep.subr.bf16.mxu0 %v12046_v46  ;;  %v12056_v55 = vpack.c.bf16 %v8975_v0, %v8974_v1  ;;  %v11484_v0 = vld [vmem:[#allocation5 + $0x100] ss:$16 sps:$4 sm:$0xff]   ;;  %v11485_v1 = vld [vmem:[#allocation5 + $0x108] ss:$16 sps:$4 sm:$0xff]  }
 0x209   :  { %v10234_v4 = vpop.f32.mrb[2].mxu0 }
 0x20a   :  { %v944_v5 = vpop.f32.mrb[3].mxu0 }
 0x20b   :  { %v953_v62 = vpack.c.bf16 %v10234_v4, %v944_v5  ;;  %v11486_v4 = vld [vmem:[#allocation5 + $0x124] ss:$16 sps:$4 sm:$0xff]   ;;  %v11487_v5 = vld [vmem:[#allocation5 + $0x12c] ss:$16 sps:$4 sm:$0xff]  }
 0x20d   :  { %1180 = vmatmul.mubr.bf16.vlgmr.msra.gmra.mrb[4].mxu0 %v953_v62  ;;  %1223 = vmatmul.mubr.bf16.vlgmr.msra.gmra.mrb[4].mxu1 %v953_v62  ;;  %v11483_v62 = vld [vmem:[#allocation5 + $0x10c] ss:$16 sps:$4 sm:$0xff]  }
 0x20e   :  { %10481 = vmatpush3.bf16.msra.mxu0 %v12046_v46  ;;  %10258 = vmatprep.mubr.msk.f32.mxu0 %vm130_vm1, %v11790_v15  ;;  %v14067_v15 = vmov 0  }
 0x20f   :  { %10483 = vmatprep.subr.bf16.mxu0 %v12056_v55  ;;  %10473 = vmatpush3.bf16.msra.mxu1 %v12046_v46 }
 0x210   :  { %10475 = vmatprep.subr.bf16.mxu1 %v12056_v55  ;;  %10245 = vmatprep.mubr.msk.f32.mxu1 %vm130_vm1, %v11777_v11  ;;  %v11489_v11 = vld [vmem:[#allocation5 + $0x128] ss:$16 sps:$4 sm:$0xff]  }
 0x212   :  { %10485 = vmatpush3.bf16.msra.mxu0 %v12056_v55 }
 0x213   :  { %10256 = vmatprep.subr.msk.mxu0 %vm137_vm3, %v12066_v54  ;;  %10477 = vmatpush3.bf16.msra.mxu1 %v12056_v55 }
 0x214   :  { %10243 = vmatprep.subr.msk.mxu1 %vm137_vm3, %v12066_v54 }
 0x216   :  { %10257 = vmatpush3.msk.msra.mxu0 %vm137_vm3, %v12066_v54 }
 0x217   :  { %10259 = vmatmul.mubr.msk.f32.vlgmr.msra.gmra.mrb[8].mxu0 %vm130_vm1, %v11811_v19  ;;  %10244 = vmatpush3.msk.msra.mxu1 %vm137_vm3, %v12066_v54  ;;  %v11488_v19 = vld [vmem:[#allocation5 + $0x120] ss:$16 sps:$4 sm:$0xff]  }
 0x218   :  { %10246 = vmatmul.mubr.msk.f32.vlgmr.msra.gmra.mrb[2].mxu1 %vm130_vm1, %v11815_v22  ;;  %1708 = vmatprep.subr.bf16.mxu1 %v11482_v59  ;;  %v11490_v22 = vld [vmem:[#allocation5 + $0x144] ss:$16 sps:$4 sm:$0xff]   ;;  %v11491_v59 = vld [vmem:[#allocation5 + $0x14c] ss:$16 sps:$4 sm:$0xff]  }
 0x219   :  { %1751 = vmatprep.subr.bf16.mxu0 %v11483_v62  ;;  %1709 = vmatpush1.bf16.msra.mxu1 %v11484_v0  ;;  %v11492_v62 = vld [vmem:[#allocation5 + $0x140] ss:$16 sps:$4 sm:$0xff]   ;;  %v11493_v0 = vld [vmem:[#allocation5 + $0x148] ss:$16 sps:$4 sm:$0xff]  }
 0x21a   :  { %1752 = vmatpush1.bf16.msra.mxu0 %v11485_v1  ;;  %1710 = vmatprep.subr.bf16.mxu1 %v11486_v4  ;;  %v11494_v1 = vld [vmem:[#allocation5 + $0x164] ss:$16 sps:$4 sm:$0xff]   ;;  %v11495_v4 = vld [vmem:[#allocation5 + $0x16c] ss:$16 sps:$4 sm:$0xff]  }
 0x21b   :  { %1753 = vmatprep.subr.bf16.mxu0 %v11487_v5  ;;  %1740 = vmatprep.mubr.bf16.mxu1 %v14067_v15  ;;  %v11496_v5 = vld [vmem:[#allocation5 + $0x160] ss:$16 sps:$4 sm:$0xff]  }
 0x21c   :  { %1783 = vmatprep.mubr.bf16.mxu0 %v14067_v15 }
 0x21d   :  { %1711 = vmatpush1.bf16.msra.mxu1 %v11488_v19  ;;  %v11499_v19 = vld [vmem:[#allocation5 + $0x18c] ss:$16 sps:$4 sm:$0xff]  }
 0x21e   :  { %1754 = vmatpush1.bf16.msra.mxu0 %v11489_v11  ;;  %1712 = vmatprep.subr.bf16.mxu1 %v11490_v22  ;;  %v11500_v11 = vld [vmem:[#allocation5 + $0x180] ss:$16 sps:$4 sm:$0xff]   ;;  %v11501_v22 = vld [vmem:[#allocation5 + $0x188] ss:$16 sps:$4 sm:$0xff]  }
 0x21f   :  { %1755 = vmatprep.subr.bf16.mxu0 %v11491_v59  ;;  %v11502_v59 = vld [vmem:[#allocation5 + $0x1a4] ss:$16 sps:$4 sm:$0xff]  }
 0x221   :  { %1713 = vmatpush1.bf16.msra.mxu1 %v11492_v62  ;;  %v11503_v62 = vld [vmem:[#allocation5 + $0x1ac] ss:$16 sps:$4 sm:$0xff]  }
 0x222   :  { %1756 = vmatpush1.bf16.msra.mxu0 %v11493_v0  ;;  %1714 = vmatprep.subr.bf16.mxu1 %v11494_v1  ;;  %v11504_v0 = vld [vmem:[#allocation5 + $0x1a0] ss:$16 sps:$4 sm:$0xff]   ;;  %v11505_v1 = vld [vmem:[#allocation5 + $0x1a8] ss:$16 sps:$4 sm:$0xff]  }
 0x223   :  { %1757 = vmatprep.subr.bf16.mxu0 %v11495_v4  ;;  %v11506_v4 = vld [vmem:[#allocation5 + $0x1c4] ss:$16 sps:$4 sm:$0xff]  }
 0x225   :  { %1715 = vmatpush1.bf16.msra.mxu1 %v11496_v5  ;;  %v11507_v5 = vld [vmem:[#allocation5 + $0x1cc] ss:$16 sps:$4 sm:$0xff]  }
 0x226   :  { %1758 = vmatpush1.bf16.msra.mxu0 %v11497_v9  ;;  %1716 = vmatprep.subr.bf16.mxu1 %v11498_v52  ;;  %v11508_v9 = vld [vmem:[#allocation5 + $0x1c0] ss:$16 sps:$4 sm:$0xff]   ;;  %v11509_v52 = vld [vmem:[#allocation5 + $0x1c8] ss:$16 sps:$4 sm:$0xff]  }
 0x227   :  { %1759 = vmatprep.subr.bf16.mxu0 %v11499_v19  ;;  %v11510_v19 = vld [vmem:[#allocation5 + $0x1e4] ss:$16 sps:$4 sm:$0xff]  }
 0x229   :  { %1717 = vmatpush1.bf16.msra.mxu1 %v11500_v11  ;;  %v11511_v11 = vld [vmem:[#allocation5 + $0x1ec] ss:$16 sps:$4 sm:$0xff]  }
 0x22a   :  { %1760 = vmatpush1.bf16.msra.mxu0 %v11501_v22  ;;  %1718 = vmatprep.subr.bf16.mxu1 %v11502_v59  ;;  %v11512_v22 = vld [vmem:[#allocation5 + $0x1e0] ss:$16 sps:$4 sm:$0xff]   ;;  %v11513_v59 = vld [vmem:[#allocation5 + $0x1e8] ss:$16 sps:$4 sm:$0xff]  }
 0x22b   :  { %1761 = vmatprep.subr.bf16.mxu0 %v11503_v62  ;;  %v11514_v62 = vld [vmem:[#allocation5 + $0x4] ss:$16 sps:$4 sm:$0xff]  }
 0x22d   :  { %1719 = vmatpush1.bf16.msra.mxu1 %v11504_v0  ;;  %v11515_v0 = vld [vmem:[#allocation5 + $0xc] ss:$16 sps:$4 sm:$0xff]  }
 0x22e   :  { %1762 = vmatpush1.bf16.msra.mxu0 %v11505_v1  ;;  %1720 = vmatprep.subr.bf16.mxu1 %v11506_v4  ;;  %v14020_v1 = vsub.s32 0, %v11754_v2  ;;  %v1252_v4 = vsub.s32 2, %v11754_v2 }
 0x22f   :  { %1763 = vmatprep.subr.bf16.mxu0 %v11507_v5  ;;  %v111_v5 = vld [vmem:[%s13980_s2] sm:$0xf]  ;;  %s11625_s2 = smov 96  }
 0x231   :  { %1721 = vmatpush1.bf16.msra.mxu1 %v11508_v9  ;;  %v14024_v9 = vsub.s32 1, %v11754_v2 }
 0x232   :  { %1764 = vmatpush1.bf16.msra.mxu0 %v11509_v52  ;;  %1722 = vmatprep.subr.bf16.mxu1 %v11510_v19  ;;  %v1256_v52 = vsub.s32 3, %v11754_v2  ;;  %v12096_v19 = vrot.slane %v111_v5, %v14020_v1 }
 0x233   :  { %1765 = vmatprep.subr.bf16.mxu0 %v11511_v11  ;;  %v12098_v11 = vrot.slane %v111_v5, %v1252_v4 }
 0x235   :  { %1723 = vmatpush1.bf16.msra.mxu1 %v11512_v22  ;;  %v12102_v22 = vrot.slane %v111_v5, %v14024_v9 }
 0x236   :  { %1766 = vmatpush1.bf16.msra.mxu0 %v11513_v59  ;;  %1954 = vmatprep.subr.bf16.mxu1 %v11514_v62  ;;  %v12104_v59 = vrot.slane %v111_v5, %v1256_v52 }
 0x237   :  { %1997 = vmatprep.subr.bf16.mxu0 %v11515_v0 }
 0x2e0   :  { %v1181_v62 = vpop.f32.mrb[4].mxu0  ;;  %v1224_v0 = vpop.f32.mrb[4].mxu1 }
 0x2e1   :  { %v1262_v56 = vadd.f32 %v12096_v19, %v1181_v62  ;;  %v1264_v53 = vadd.f32 %v12098_v11, %v1224_v0  ;;  %v1183_v50 = vpop.f32.mrb[5].mxu0  ;;  %v1226_v14 = vpop.f32.mrb[5].mxu1 }
 0x2e2   :  { %v1263_v51 = vadd.f32 %v12102_v22, %v1183_v50  ;;  %v1265_v1 = vadd.f32 %v12104_v59, %v1226_v14  ;;  %v1185_v4 = vpop.f32.mrb[6].mxu0  ;;  %v1228_v49 = vpop.f32.mrb[6].mxu1 }
 0x2e3   :  { %v1270_v2 = vmax.f32 %v1262_v56, 0.0  ;;  %v1272_v9 = vmax.f32 %v1264_v53, 0.0  ;;  %v1266_v5 = vadd.f32 %v12096_v19, %v1185_v4  ;;  %v1268_v52 = vadd.f32 %v12098_v11, %v1228_v49  ;;  %v1187_v47 = vpop.f32.mrb[7].mxu0  ;;  %v1230_v48 = vpop.f32.mrb[7].mxu1 }
 0x2e4   :  { %v1271_v62 = vmax.f32 %v1263_v51, 0.0  ;;  %v1273_v45 = vmax.f32 %v1265_v1, 0.0  ;;  %v1267_v0 = vadd.f32 %v12102_v22, %v1187_v47  ;;  %v1269_v44 = vadd.f32 %v12104_v59, %v1230_v48 }
 0x2e5   :  { %v1287_v50 = vrot.slane %v1270_v2, 7  ;;  %v1289_v6 = vrot.slane %v1272_v9, 7  ;;  %v1274_v14 = vmax.f32 %v1266_v5, 0.0  ;;  %v1276_v12 = vmax.f32 %v1268_v52, 0.0 }
 0x2e6   :  { %v1288_v43 = vrot.slane %v1271_v62, 7  ;;  %v1290_v54 = vrot.slane %v1273_v45, 7  ;;  %v1275_v56 = vmax.f32 %v1267_v0, 0.0  ;;  %v1277_v53 = vmax.f32 %v1269_v44, 0.0 }
 0x2e7   :  { %1311 = vst [vmem:[#allocation2] sm:$0xfe] %v1287_v50  ;;  %1313 = vst [vmem:[#allocation2 + $0x10] sm:$0xfe] %v1289_v6  ;;  %v1291_v4 = vrot.slane %v1274_v14, 7  ;;  %v1295_v49 = vrot.slane %v1276_v12, 7 }
 0x2e8   :  { %1312 = vst [vmem:[#allocation2 + $0x8] sm:$0xfe] %v1288_v43  ;;  %1314 = vst [vmem:[#allocation2 + $0x18] sm:$0xfe] %v1290_v54  ;;  %v1293_v51 = vrot.slane %v1275_v56, 7  ;;  %v1297_v1 = vrot.slane %v1277_v53, 7 }
 0x2e9   :  { %v12115_v47 = vsel %vm1286_vm8, %v1287_v50, %v1291_v4  ;;  %1319 = vst [vmem:[#allocation2 + $0x40] sm:$0x1] %v1291_v4  ;;  %v12118_v2 = vsel %vm1286_vm8, %v1289_v6, %v1295_v49  ;;  %1321 = vst [vmem:[#allocation2 + $0x50] sm:$0x1] %v1295_v49  ;;  %v14072_v6 = vld [vmem:[#allocation22_spill] sm:$0xff] }
 0x2ea   :  { %v12121_v45 = vsel %vm1286_vm8, %v1288_v43, %v1293_v51  ;;  %1320 = vst [vmem:[#allocation2 + $0x48] sm:$0x1] %v1293_v51  ;;  %v12124_v44 = vsel %vm1286_vm8, %v1290_v54, %v1297_v1  ;;  %1322 = vst [vmem:[#allocation2 + $0x58] sm:$0x1] %v1297_v1  ;;  %v10260_v12 = vpop.f32.mrb[8].mxu0  ;;  %v12228_v56 = vld [vmem:[#allocation2 + $0x60] sm:$0xff] }
 0x2eb   :  { %v1506_v48 = vpop.f32.mrb[9].mxu0  ;;  %v10247_v9 = vpop.f32.mrb[2].mxu1  ;;  %v14098_v49 = vld [vmem:[#allocation18_spill] sm:$0xff]  ;;  %v10782_v51 = vld [vmem:[%s13981_s3 + $0x204] ss:$8 sps:$4 sm:$0xff]  }
 0x2ec   :  { %v1515_v5 = vpack.c.bf16 %v10260_v12, %v1506_v48  ;;  %v1398_v52 = vpop.f32.mrb[3].mxu1  ;;  %v10785_v1 = vld [vmem:[%s13981_s3 + $0x304] ss:$8 sps:$4 sm:$0xff]   ;;  %v10786_v48 = vld [vmem:[%s13981_s3 + $0x210] ss:$8 sps:$4 sm:$0xff]  }
 0x2ed   :  { %v1407_v62 = vpack.c.bf16 %v10247_v9, %v1398_v52  ;;  %v14099_v12 = vld [vmem:[#allocation19_spill] sm:$0xff]  ;;  %v10789_v9 = vld [vmem:[%s13981_s3 + $0x310] ss:$8 sps:$4 sm:$0xff]  }
 0x2ee   :  { %1741 = vmatmul.mubr.bf16.vlgmr.msra.gmra.mrb[8].mxu1 %v1515_v5  ;;  %1784 = vmatmul.mubr.bf16.vlgmr.msra.gmra.mrb[12].mxu0 %v1515_v5  ;;  %v2466_v43 = vld [vmem:[#allocation2 + $0x10] sm:$0xff]  ;;  %v10794_v5 = vld [vmem:[%s13981_s3 + $0x224] ss:$8 sps:$4 sm:$0xff]  }
 0x2ef   :  { %1955 = vmatpush1.bf16.msra.mxu1 %v11828_v57  ;;  %1998 = vmatpush1.bf16.msra.mxu0 %v11830_v58  ;;  %v14068_v57 = vld [vmem:[#allocation49_spill] sm:$0xff]  ;;  %v12216_v0 = vpack.c.bf16 %v12118_v2, %v2466_v43  ;;  %v10783_v2 = vld [vmem:[%s13981_s3 + $0x300] ss:$8 sps:$4 sm:$0xff]   ;;  %v10797_v52 = vld [vmem:[%s13981_s3 + $0x324] ss:$8 sps:$4 sm:$0xff]  }
 0x2f0   :  { %1956 = vmatprep.subr.bf16.mxu1 %v11833_v60  ;;  %1999 = vmatprep.subr.bf16.mxu0 %v11835_v61  ;;  %v14069_v58 = vld [vmem:[#allocation21_spill] sm:$0xff]  ;;  %v14070_v60 = vld [vmem:[#allocation24_spill] sm:$0xff]  ;;  %v12232_v53 = vld [vmem:[#allocation2 + $0x40] sm:$0x3] }
 0x2f1   :  { %1986 = vmatprep.mubr.bf16.mxu1 %v14067_v15  ;;  %2029 = vmatprep.mubr.bf16.mxu0 %v14067_v15  ;;  %v14071_v61 = vld [vmem:[#allocation20_spill] sm:$0xff]  ;;  %v12220_v50 = vld [vmem:[#allocation2 + $0x48] sm:$0x3]  ;;  %v12222_v14 = vld [vmem:[#allocation2 + $0x58] sm:$0x3] }
 0x2f2   :  { %v12234_v4 = vld [vmem:[#allocation2 + $0x50] sm:$0x3]  ;;  %v10851_v43 = vld [vmem:[%s13981_s3 + $0x3b4] ss:$8 sps:$4 sm:$0xff]  }
 0x2f3   :  { %1957 = vmatpush1.bf16.msra.mxu1 %v11841_v7  ;;  %2000 = vmatpush1.bf16.msra.mxu0 %v11843_v8  ;;  %v14073_v7 = vld [vmem:[#allocation23_spill] sm:$0xff]  ;;  %v14074_v8 = vld [vmem:[#allocation26_spill] sm:$0xff] }
 0x2f4   :  { %1958 = vmatprep.subr.bf16.mxu1 %v11847_v3  ;;  %2001 = vmatprep.subr.bf16.mxu0 %v11849_v10  ;;  %v14075_v3 = vld [vmem:[#allocation25_spill] sm:$0xff]  ;;  %v14076_v10 = vld [vmem:[#allocation28_spill] sm:$0xff] }
 0x2f7   :  { %1959 = vmatpush1.bf16.msra.mxu1 %v11855_v13  ;;  %2002 = vmatpush1.bf16.msra.mxu0 %v11857_v16  ;;  %v14077_v13 = vld [vmem:[#allocation30_spill] sm:$0xff]  ;;  %v14078_v16 = vld [vmem:[#allocation27_spill] sm:$0xff] }
 0x2f8   :  { %1960 = vmatprep.subr.bf16.mxu1 %v11861_v17  ;;  %2003 = vmatprep.subr.bf16.mxu0 %v11863_v18  ;;  %v14079_v17 = vld [vmem:[#allocation29_spill] sm:$0xff]  ;;  %v14080_v18 = vld [vmem:[#allocation32_spill] sm:$0xff] }
 0x2fb   :  { %1961 = vmatpush1.bf16.msra.mxu1 %v11869_v20  ;;  %2004 = vmatpush1.bf16.msra.mxu0 %v11871_v21  ;;  %v14081_v20 = vld [vmem:[#allocation34_spill] sm:$0xff]  ;;  %v14082_v21 = vld [vmem:[#allocation31_spill] sm:$0xff] }
 0x2fc   :  { %1962 = vmatprep.subr.bf16.mxu1 %v11873_v23  ;;  %2005 = vmatprep.subr.bf16.mxu0 %v11875_v24  ;;  %v14083_v23 = vld [vmem:[#allocation33_spill] sm:$0xff]  ;;  %v14084_v24 = vld [vmem:[#allocation36_spill] sm:$0xff] }
 0x2ff   :  { %1963 = vmatpush1.bf16.msra.mxu1 %v11881_v25  ;;  %2006 = vmatpush1.bf16.msra.mxu0 %v11883_v26  ;;  %v14085_v25 = vld [vmem:[#allocation38_spill] sm:$0xff]  ;;  %v14087_v26 = vld [vmem:[#allocation37_spill] sm:$0xff] }
 0x300   :  { %1964 = vmatprep.subr.bf16.mxu1 %v11885_v27  ;;  %2007 = vmatprep.subr.bf16.mxu0 %v11887_v28  ;;  %v14088_v27 = vld [vmem:[#allocation40_spill] sm:$0xff] }
 0x301   :  { %v2465_v28 = vld [vmem:[#allocation2 + $0x8] sm:$0xff] }
 0x303   :  { %1965 = vmatpush1.bf16.msra.mxu1 %v11893_v29  ;;  %2008 = vmatpush1.bf16.msra.mxu0 %v11895_v30  ;;  %v14089_v29 = vld [vmem:[#allocation47_spill] sm:$0xff] }
 0x304   :  { %1966 = vmatprep.subr.bf16.mxu1 %v11897_v31  ;;  %2009 = vmatprep.subr.bf16.mxu0 %v11899_v32  ;;  %v14090_v30 = vld [vmem:[#allocation39_spill] sm:$0xff]  ;;  %v14091_v31 = vld [vmem:[#allocation41_spill] sm:$0xff]  ;;  %v12199_v32 = vpack.c.bf16 %v12121_v45, %v2465_v28 }
 0x305   :  { %v10788_v45 = vld [vmem:[%s13981_s3 + $0x214] ss:$8 sps:$4 sm:$0xff]   ;;  %v10830_v28 = vld [vmem:[%s13981_s3 + $0x284] ss:$8 sps:$4 sm:$0xff]  }
 0x307   :  { %1967 = vmatpush1.bf16.msra.mxu1 %v11905_v33  ;;  %2010 = vmatpush1.bf16.msra.mxu0 %v11907_v34  ;;  %v14092_v33 = vld [vmem:[#allocation48_spill] sm:$0xff]  ;;  %v14093_v34 = vld [vmem:[#allocation42_spill] sm:$0xff] }
 0x308   :  { %1968 = vmatprep.subr.bf16.mxu1 %v11909_v35  ;;  %2011 = vmatprep.subr.bf16.mxu0 %v11911_v36  ;;  %v14094_v35 = vld [vmem:[#allocation43_spill] sm:$0xff]  ;;  %v14095_v36 = vld [vmem:[#allocation44_spill] sm:$0xff] }
 0x30b   :  { %1969 = vmatpush1.bf16.msra.mxu1 %v11917_v37  ;;  %2012 = vmatpush1.bf16.msra.mxu0 %v11919_v38  ;;  %v2467_v37 = vld [vmem:[#allocation2 + $0x18] sm:$0xff] }
 0x30c   :  { %10487 = vmatprep.subr.bf16.mxu1 %v12046_v46  ;;  %2351 = vmatprep.subr.bf16.mxu0 %v11921_v39  ;;  %v14096_v38 = vld [vmem:[#allocation45_spill] sm:$0xff]  ;;  %v12208_v39 = vpack.c.bf16 %v12124_v44, %v2467_v37  ;;  %v10842_v37 = vld [vmem:[%s13981_s3 + $0x2a4] ss:$8 sps:$4 sm:$0xff]  }
 0x30d   :  { %v10791_v44 = vld [vmem:[%s13981_s3 + $0x314] ss:$8 sps:$4 sm:$0xff]  }
 0x30e   :  { %1987 = vmatmul.mubr.bf16.vlgmr.msra.gmra.mrb[8].mxu1 %v1407_v62  ;;  %2030 = vmatmul.mubr.bf16.vlgmr.msra.gmra.mrb[12].mxu0 %v1407_v62  ;;  %v10792_v62 = vld [vmem:[%s13981_s3 + $0x220] ss:$8 sps:$4 sm:$0xff]  }
 0x30f   :  { %10489 = vmatpush3.bf16.msra.mxu1 %v12046_v46  ;;  %2352 = vmatpush1.bf16.msra.mxu0 %v11927_v40  ;;  %v14097_v40 = vld [vmem:[#allocation46_spill] sm:$0xff] }
 0x310   :  { %10491 = vmatprep.subr.bf16.mxu1 %v12056_v55  ;;  %2353 = vmatprep.subr.bf16.mxu0 %v11931_v41 }
 0x311   :  { %10271 = vmatprep.mubr.msk.f32.mxu1 %vm130_vm1, %v11837_v63  ;;  %2383 = vmatprep.mubr.bf16.mxu0 %v14067_v15 }
 0x313   :  { %10493 = vmatpush3.bf16.msra.mxu1 %v12056_v55  ;;  %2354 = vmatpush1.bf16.msra.mxu0 %v11937_v42  ;;  %v2464_v42 = vld [vmem:[#allocation2] sm:$0xff] }
 0x314   :  { %10269 = vmatprep.subr.msk.mxu1 %vm137_vm3, %v14068_v57  ;;  %2355 = vmatprep.subr.bf16.mxu0 %v14069_v58  ;;  %v12213_v54 = vpack.c.bf16 %v12115_v47, %v2464_v42  ;;  %v10780_v47 = vld [vmem:[%s13981_s3 + $0x200] ss:$8 sps:$4 sm:$0xff]   ;;  %v10800_v58 = vld [vmem:[%s13981_s3 + $0x234] ss:$8 sps:$4 sm:$0xff]  }
 0x315   :  { %v10848_v42 = vld [vmem:[%s13981_s3 + $0x2b4] ss:$8 sps:$4 sm:$0xff]  }
 0x317   :  { %10270 = vmatpush3.msk.msra.mxu1 %vm137_vm3, %v14068_v57  ;;  %2356 = vmatpush1.bf16.msra.mxu0 %v14070_v60  ;;  %v10795_v57 = vld [vmem:[%s13981_s3 + $0x320] ss:$8 sps:$4 sm:$0xff]   ;;  %v10803_v60 = vld [vmem:[%s13981_s3 + $0x334] ss:$8 sps:$4 sm:$0xff]  }
 0x318   :  { %10272 = vmatmul.mubr.msk.f32.vlgmr.msra.gmra.mrb[12].mxu1 %vm130_vm1, %v14071_v61  ;;  %2308 = vmatprep.subr.bf16.mxu1 %v14072_v6  ;;  %v10798_v61 = vld [vmem:[%s13981_s3 + $0x230] ss:$8 sps:$4 sm:$0xff]   ;;  %vm8658_vm1 = vcmask 261120  }
 0x319   :  { %2309 = vmatpush1.bf16.msra.mxu1 %v14073_v7  ;;  %2357 = vmatprep.subr.bf16.mxu0 %v14074_v8  ;;  %v10801_v6 = vld [vmem:[%s13981_s3 + $0x330] ss:$8 sps:$4 sm:$0xff]   ;;  %v10806_v7 = vld [vmem:[%s13981_s3 + $0x244] ss:$8 sps:$4 sm:$0xff]  }
 0x31a   :  { %2310 = vmatprep.subr.bf16.mxu1 %v14075_v3  ;;  %2340 = vmatprep.mubr.bf16.mxu1 %v14067_v15  ;;  %v14086_v15 = vld [vmem:[#allocation35_spill] sm:$0xff] }
 0x31b   :  { %2358 = vmatpush1.bf16.msra.mxu0 %v14076_v10  ;;  %v10809_v8 = vld [vmem:[%s13981_s3 + $0x344] ss:$8 sps:$4 sm:$0xff]   ;;  %v10804_v3 = vld [vmem:[%s13981_s3 + $0x240] ss:$8 sps:$4 sm:$0xff]  }
 0x31c   :  { %2359 = vmatprep.subr.bf16.mxu0 %v14077_v13  ;;  %v10807_v10 = vld [vmem:[%s13981_s3 + $0x340] ss:$8 sps:$4 sm:$0xff]   ;;  %v10812_v13 = vld [vmem:[%s13981_s3 + $0x254] ss:$8 sps:$4 sm:$0xff]  }
 0x31d   :  { %2311 = vmatpush1.bf16.msra.mxu1 %v14078_v16  ;;  %v10815_v16 = vld [vmem:[%s13981_s3 + $0x354] ss:$8 sps:$4 sm:$0xff]  }
 0x31e   :  { %2312 = vmatprep.subr.bf16.mxu1 %v14079_v17  ;;  %v10810_v17 = vld [vmem:[%s13981_s3 + $0x250] ss:$8 sps:$4 sm:$0xff]  }
 0x31f   :  { %2360 = vmatpush1.bf16.msra.mxu0 %v14080_v18  ;;  %v10813_v18 = vld [vmem:[%s13981_s3 + $0x350] ss:$8 sps:$4 sm:$0xff]  }
 0x320   :  { %2361 = vmatprep.subr.bf16.mxu0 %v14081_v20  ;;  %v10818_v20 = vld [vmem:[%s13981_s3 + $0x264] ss:$8 sps:$4 sm:$0xff]  }
 0x321   :  { %2313 = vmatpush1.bf16.msra.mxu1 %v14082_v21  ;;  %v10821_v21 = vld [vmem:[%s13981_s3 + $0x364] ss:$8 sps:$4 sm:$0xff]  }
 0x322   :  { %2314 = vmatprep.subr.bf16.mxu1 %v14083_v23  ;;  %v10816_v23 = vld [vmem:[%s13981_s3 + $0x260] ss:$8 sps:$4 sm:$0xff]  }
 0x323   :  { %2362 = vmatpush1.bf16.msra.mxu0 %v14084_v24  ;;  %v10819_v24 = vld [vmem:[%s13981_s3 + $0x360] ss:$8 sps:$4 sm:$0xff]  }
 0x324   :  { %2363 = vmatprep.subr.bf16.mxu0 %v14085_v25  ;;  %v10824_v25 = vld [vmem:[%s13981_s3 + $0x274] ss:$8 sps:$4 sm:$0xff]  }
 0x325   :  { %2315 = vmatpush1.bf16.msra.mxu1 %v14086_v15  ;;  %v10827_v15 = vld [vmem:[%s13981_s3 + $0x374] ss:$8 sps:$4 sm:$0xff]  }
 0x326   :  { %2316 = vmatprep.subr.bf16.mxu1 %v14087_v26  ;;  %v10822_v26 = vld [vmem:[%s13981_s3 + $0x270] ss:$8 sps:$4 sm:$0xff]  }
 0x327   :  { %2364 = vmatpush1.bf16.msra.mxu0 %v14088_v27  ;;  %v10825_v27 = vld [vmem:[%s13981_s3 + $0x370] ss:$8 sps:$4 sm:$0xff]  }
 0x328   :  { %2365 = vmatprep.subr.bf16.mxu0 %v14089_v29  ;;  %v10833_v29 = vld [vmem:[%s13981_s3 + $0x384] ss:$8 sps:$4 sm:$0xff]  }
 0x329   :  { %2317 = vmatpush1.bf16.msra.mxu1 %v14090_v30  ;;  %v10828_v30 = vld [vmem:[%s13981_s3 + $0x280] ss:$8 sps:$4 sm:$0xff]  }
 0x32a   :  { %2318 = vmatprep.subr.bf16.mxu1 %v14091_v31  ;;  %v10831_v31 = vld [vmem:[%s13981_s3 + $0x380] ss:$8 sps:$4 sm:$0xff]  }
 0x32b   :  { %2366 = vmatpush1.bf16.msra.mxu0 %v14092_v33  ;;  %v10836_v33 = vld [vmem:[%s13981_s3 + $0x294] ss:$8 sps:$4 sm:$0xff]  }
 0x32c   :  { %10495 = vmatprep.subr.bf16.mxu0 %v12199_v32 }
 0x32d   :  { %2319 = vmatpush1.bf16.msra.mxu1 %v14093_v34  ;;  %v10839_v34 = vld [vmem:[%s13981_s3 + $0x394] ss:$8 sps:$4 sm:$0xff]  }
 0x32e   :  { %2320 = vmatprep.subr.bf16.mxu1 %v14094_v35  ;;  %v10834_v35 = vld [vmem:[%s13981_s3 + $0x290] ss:$8 sps:$4 sm:$0xff]  }
 0x331   :  { %2321 = vmatpush1.bf16.msra.mxu1 %v14095_v36  ;;  %v10837_v36 = vld [vmem:[%s13981_s3 + $0x390] ss:$8 sps:$4 sm:$0xff]  }
 0x332   :  { %2322 = vmatprep.subr.bf16.mxu1 %v14096_v38  ;;  %v10845_v38 = vld [vmem:[%s13981_s3 + $0x3a4] ss:$8 sps:$4 sm:$0xff]  }
 0x335   :  { %2323 = vmatpush1.bf16.msra.mxu1 %v14097_v40  ;;  %v10840_v40 = vld [vmem:[%s13981_s3 + $0x2a0] ss:$8 sps:$4 sm:$0xff]  }
 0x336   :  { %10499 = vmatprep.subr.bf16.mxu1 %v12208_v39 }
 0x3eb   :  { %v10273_v41 = vpop.f32.mrb[12].mxu1 }
 0x3ec   :  { %v2106_v55 = vpop.f32.mrb[13].mxu1 }
 0x3ed   :  { %v2115_v46 = vpack.c.bf16 %v10273_v41, %v2106_v55  ;;  %v10843_v41 = vld [vmem:[%s13981_s3 + $0x3a0] ss:$8 sps:$4 sm:$0xff]   ;;  %v10846_v55 = vld [vmem:[%s13981_s3 + $0x2b0] ss:$8 sps:$4 sm:$0xff]  }
 0x3ef   :  { %2341 = vmatmul.mubr.bf16.vlgmr.msra.gmra.mrb[8].mxu1 %v2115_v46  ;;  %2384 = vmatmul.mubr.bf16.vlgmr.msra.gmra.mrb[12].mxu0 %v2115_v46  ;;  %v10849_v46 = vld [vmem:[%s13981_s3 + $0x3b0] ss:$8 sps:$4 sm:$0xff]  }
 0x3f0   :  { %10497 = vmatpush1.bf16.msra.mxu0 %v12213_v54  ;;  %10501 = vmatpush1.bf16.msra.mxu1 %v12216_v0 }
 0x3f1   :  { %9082 = vmatprep.subr.msk.mxu0 %vm137_vm3, %v12220_v50  ;;  %9085 = vmatprep.subr.msk.mxu1 %vm137_vm3, %v12222_v14 }
 0x3f2   :  { %2555 = vmatprep.mubr.f32.mxu0 %v12228_v56  ;;  %2626 = vmatprep.mubr.f32.mxu1 %v12228_v56 }
 0x3f4   :  { %9083 = vmatpush1.msk.msra.mxu0 %vm137_vm3, %v12232_v53  ;;  %9086 = vmatpush1.msk.msra.mxu1 %vm137_vm3, %v12234_v4 }
 0x3f5   :  { %10503 = vmatprep.subr.bf16.mxu0 %v12199_v32  ;;  %10507 = vmatprep.subr.bf16.mxu1 %v12208_v39 }
 0x3f7   :  { %9084 = vmatmul.mubr.msk.f32.vlgmr.msra.gmra.mrb[10].mxu0 %vm2476_vm9, %v14098_v49  ;;  %9087 = vmatmul.mubr.msk.f32.vlgmr.msra.gmra.mrb[14].mxu1 %vm2476_vm9, %v14098_v49 }
 0x3f8   :  { %10505 = vmatpush1.bf16.msra.mxu0 %v12213_v54  ;;  %10509 = vmatpush1.bf16.msra.mxu1 %v12216_v0 }
 0x3f9   :  { %9088 = vmatprep.subr.msk.mxu0 %vm137_vm3, %v12220_v50  ;;  %9091 = vmatprep.subr.msk.mxu1 %vm137_vm3, %v12222_v14 }
 0x3fa   :  { %2767 = vmatprep.mubr.f32.mxu0 %v12228_v56  ;;  %2838 = vmatprep.mubr.f32.mxu1 %v12228_v56 }
 0x3fc   :  { %9089 = vmatpush1.msk.msra.mxu0 %vm137_vm3, %v12232_v53  ;;  %9092 = vmatpush1.msk.msra.mxu1 %vm137_vm3, %v12234_v4 }
 0x3fd   :  { %9090 = vmatmul.mubr.msk.f32.vlgmr.msra.gmra.mrb[16].mxu0 %vm2476_vm9, %v14099_v12  ;;  %9093 = vmatmul.mubr.msk.f32.vlgmr.msra.gmra.mrb[16].mxu1 %vm2476_vm9, %v14099_v12 }
 0x3fe   :  { %3234 = vmatprep.subr.bf16.mxu0 %v10782_v51  ;;  %3275 = vmatprep.subr.bf16.mxu1 %v10785_v1  ;;  %v10854_v51 = vld [vmem:[%s13981_s3 + $0x2c4] ss:$8 sps:$4 sm:$0xff]  }
 0x3ff   :  { %3235 = vmatpush1.bf16.msra.mxu0 %v10780_v47  ;;  %3276 = vmatpush1.bf16.msra.mxu1 %v10783_v2  ;;  %v10857_v1 = vld [vmem:[%s13981_s3 + $0x3c4] ss:$8 sps:$4 sm:$0xff]   ;;  %v10852_v47 = vld [vmem:[%s13981_s3 + $0x2c0] ss:$8 sps:$4 sm:$0xff]  }
 0x400   :  { %3236 = vmatprep.subr.bf16.mxu0 %v10788_v45  ;;  %3277 = vmatprep.subr.bf16.mxu1 %v10791_v44  ;;  %v10855_v2 = vld [vmem:[%s13981_s3 + $0x3c0] ss:$8 sps:$4 sm:$0xff]   ;;  %v10860_v45 = vld [vmem:[%s13981_s3 + $0x2d4] ss:$8 sps:$4 sm:$0xff]  }
 0x401   :  { %v10863_v44 = vld [vmem:[%s13981_s3 + $0x3d4] ss:$8 sps:$4 sm:$0xff]  }
 0x403   :  { %3237 = vmatpush1.bf16.msra.mxu0 %v10786_v48  ;;  %3278 = vmatpush1.bf16.msra.mxu1 %v10789_v9  ;;  %v10858_v48 = vld [vmem:[%s13981_s3 + $0x2d0] ss:$8 sps:$4 sm:$0xff]  }
 0x404   :  { %3238 = vmatprep.subr.bf16.mxu0 %v10794_v5  ;;  %3279 = vmatprep.subr.bf16.mxu1 %v10797_v52  ;;  %v10861_v9 = vld [vmem:[%s13981_s3 + $0x3d0] ss:$8 sps:$4 sm:$0xff]   ;;  %v10866_v5 = vld [vmem:[%s13981_s3 + $0x2e4] ss:$8 sps:$4 sm:$0xff]  }
 0x405   :  { %v10869_v52 = vld [vmem:[%s13981_s3 + $0x3e4] ss:$8 sps:$4 sm:$0xff]  }
 0x407   :  { %3239 = vmatpush1.bf16.msra.mxu0 %v10792_v62  ;;  %3280 = vmatpush1.bf16.msra.mxu1 %v10795_v57  ;;  %v10864_v62 = vld [vmem:[%s13981_s3 + $0x2e0] ss:$8 sps:$4 sm:$0xff]  }
 0x408   :  { %3240 = vmatprep.subr.bf16.mxu0 %v10800_v58  ;;  %3281 = vmatprep.subr.bf16.mxu1 %v10803_v60  ;;  %v10867_v57 = vld [vmem:[%s13981_s3 + $0x3e0] ss:$8 sps:$4 sm:$0xff]   ;;  %v10872_v58 = vld [vmem:[%s13981_s3 + $0x2f4] ss:$8 sps:$4 sm:$0xff]  }
 0x409   :  { %v10875_v60 = vld [vmem:[%s13981_s3 + $0x3f4] ss:$8 sps:$4 sm:$0xff]  }
 0x40b   :  { %3241 = vmatpush1.bf16.msra.mxu0 %v10798_v61  ;;  %3282 = vmatpush1.bf16.msra.mxu1 %v10801_v6  ;;  %v10870_v61 = vld [vmem:[%s13981_s3 + $0x2f0] ss:$8 sps:$4 sm:$0xff]  }
 0x40c   :  { %3242 = vmatprep.subr.bf16.mxu0 %v10806_v7  ;;  %3283 = vmatprep.subr.bf16.mxu1 %v10809_v8  ;;  %v10873_v6 = vld [vmem:[%s13981_s3 + $0x3f0] ss:$8 sps:$4 sm:$0xff]   ;;  %v10878_v7 = vld [vmem:[%s13981_s3 + $0x4] ss:$8 sps:$4 sm:$0xff]  }
 0x40d   :  { %v10881_v8 = vld [vmem:[%s13981_s3 + $0x104] ss:$8 sps:$4 sm:$0xff]  }
 0x40f   :  { %3243 = vmatpush1.bf16.msra.mxu0 %v10804_v3  ;;  %3284 = vmatpush1.bf16.msra.mxu1 %v10807_v10 }
 0x410   :  { %3244 = vmatprep.subr.bf16.mxu0 %v10812_v13  ;;  %3285 = vmatprep.subr.bf16.mxu1 %v10815_v16 }
 0x413   :  { %3245 = vmatpush1.bf16.msra.mxu0 %v10810_v17  ;;  %3286 = vmatpush1.bf16.msra.mxu1 %v10813_v18 }
 0x414   :  { %3246 = vmatprep.subr.bf16.mxu0 %v10818_v20  ;;  %3287 = vmatprep.subr.bf16.mxu1 %v10821_v21 }
 0x417   :  { %3247 = vmatpush1.bf16.msra.mxu0 %v10816_v23  ;;  %3288 = vmatpush1.bf16.msra.mxu1 %v10819_v24 }
 0x418   :  { %3248 = vmatprep.subr.bf16.mxu0 %v10824_v25  ;;  %3289 = vmatprep.subr.bf16.mxu1 %v10827_v15 }
 0x41b   :  { %3249 = vmatpush1.bf16.msra.mxu0 %v10822_v26  ;;  %3290 = vmatpush1.bf16.msra.mxu1 %v10825_v27 }
 0x41c   :  { %3250 = vmatprep.subr.bf16.mxu0 %v10830_v28  ;;  %3291 = vmatprep.subr.bf16.mxu1 %v10833_v29 }
 0x41f   :  { %3251 = vmatpush1.bf16.msra.mxu0 %v10828_v30  ;;  %3292 = vmatpush1.bf16.msra.mxu1 %v10831_v31 }
 0x420   :  { %3252 = vmatprep.subr.bf16.mxu0 %v10836_v33  ;;  %3293 = vmatprep.subr.bf16.mxu1 %v10839_v34 }
 0x423   :  { %3253 = vmatpush1.bf16.msra.mxu0 %v10834_v35  ;;  %3294 = vmatpush1.bf16.msra.mxu1 %v10837_v36 }
 0x424   :  { %3254 = vmatprep.subr.bf16.mxu0 %v10842_v37  ;;  %3295 = vmatprep.subr.bf16.mxu1 %v10845_v38 }
 0x427   :  { %3255 = vmatpush1.bf16.msra.mxu0 %v10840_v40  ;;  %3296 = vmatpush1.bf16.msra.mxu1 %v10843_v41 }
 0x428   :  { %3256 = vmatprep.subr.bf16.mxu0 %v10848_v42  ;;  %3297 = vmatprep.subr.bf16.mxu1 %v10851_v43 }
 0x42b   :  { %3257 = vmatpush1.bf16.msra.mxu0 %v10846_v55  ;;  %3298 = vmatpush1.bf16.msra.mxu1 %v10849_v46 }
 0x42c   :  { %3258 = vmatprep.subr.bf16.mxu0 %v10854_v51  ;;  %3299 = vmatprep.subr.bf16.mxu1 %v10857_v1 }
 0x42f   :  { %3259 = vmatpush1.bf16.msra.mxu0 %v10852_v47  ;;  %3300 = vmatpush1.bf16.msra.mxu1 %v10855_v2 }
 0x430   :  { %3260 = vmatprep.subr.bf16.mxu0 %v10860_v45  ;;  %3301 = vmatprep.subr.bf16.mxu1 %v10863_v44 }
 0x433   :  { %3261 = vmatpush1.bf16.msra.mxu0 %v10858_v48  ;;  %3302 = vmatpush1.bf16.msra.mxu1 %v10861_v9 }
 0x434   :  { %3262 = vmatprep.subr.bf16.mxu0 %v10866_v5  ;;  %3303 = vmatprep.subr.bf16.mxu1 %v10869_v52 }
 0x437   :  { %3263 = vmatpush1.bf16.msra.mxu0 %v10864_v62  ;;  %3304 = vmatpush1.bf16.msra.mxu1 %v10867_v57 }
 0x438   :  { %3264 = vmatprep.subr.bf16.mxu0 %v10872_v58  ;;  %3305 = vmatprep.subr.bf16.mxu1 %v10875_v60  ;;  %v10876_v60 = vld [vmem:[%s13981_s3] ss:$8 sps:$4 sm:$0xff]  }
 0x43b   :  { %3265 = vmatpush1.bf16.msra.mxu0 %v10870_v61  ;;  %3306 = vmatpush1.bf16.msra.mxu1 %v10873_v6  ;;  %v10879_v61 = vld [vmem:[%s13981_s3 + $0x100] ss:$8 sps:$4 sm:$0xff]  }
 0x43c   :  { %3636 = vmatprep.subr.bf16.mxu0 %v10878_v7  ;;  %3677 = vmatprep.subr.bf16.mxu1 %v10881_v8  ;;  %v10884_v7 = vld [vmem:[%s13981_s3 + $0x14] ss:$8 sps:$4 sm:$0xff]  }
 0x43d   :  { %v10887_v8 = vld [vmem:[%s13981_s3 + $0x114] ss:$8 sps:$4 sm:$0xff]  }
 0x4c2   :  { %v2342_v3 = vpop.f32.mrb[8].mxu1  ;;  %v2385_v10 = vpop.f32.mrb[12].mxu0 }
 0x4c3   :  { %v2402_v13 = vadd.f32 %v2342_v3, %v12096_v19  ;;  %v2404_v16 = vadd.f32 %v2385_v10, %v12098_v11  ;;  %v2344_v17 = vpop.f32.mrb[9].mxu1  ;;  %v2387_v18 = vpop.f32.mrb[13].mxu0 }
 0x4c4   :  { %v2403_v20 = vadd.f32 %v2344_v17, %v12102_v22  ;;  %v2405_v21 = vadd.f32 %v2387_v18, %v12104_v59  ;;  %v2346_v23 = vpop.f32.mrb[10].mxu1  ;;  %v2389_v24 = vpop.f32.mrb[14].mxu0  ;;  %v10890_v17 = vld [vmem:[%s13981_s3 + $0x24] ss:$8 sps:$4 sm:$0xff]  }
 0x4c5   :  { %v2410_v25 = vmax.f32 %v2402_v13, 0.0  ;;  %v2412_v15 = vmax.f32 %v2404_v16, 0.0  ;;  %v2406_v26 = vadd.f32 %v2346_v23, %v12096_v19  ;;  %v2408_v27 = vadd.f32 %v2389_v24, %v12098_v11  ;;  %v2348_v28 = vpop.f32.mrb[11].mxu1  ;;  %v2391_v29 = vpop.f32.mrb[15].mxu0  ;;  %v10882_v13 = vld [vmem:[%s13981_s3 + $0x10] ss:$8 sps:$4 sm:$0xff]  }
 0x4c6   :  { %v2411_v30 = vmax.f32 %v2403_v20, 0.0  ;;  %v2413_v31 = vmax.f32 %v2405_v21, 0.0  ;;  %v2407_v33 = vadd.f32 %v2348_v28, %v12102_v22  ;;  %v2409_v34 = vadd.f32 %v2391_v29, %v12104_v59  ;;  %v10885_v16 = vld [vmem:[%s13981_s3 + $0x110] ss:$8 sps:$4 sm:$0xff]   ;;  %v10893_v18 = vld [vmem:[%s13981_s3 + $0x124] ss:$8 sps:$4 sm:$0xff]  }
 0x4c7   :  { %v2426_v35 = vrot.slane %v2410_v25, 7  ;;  %v2428_v36 = vrot.slane %v2412_v15, 7  ;;  %v2414_v37 = vmax.f32 %v2406_v26, 0.0  ;;  %v2416_v38 = vmax.f32 %v2408_v27, 0.0  ;;  %v10888_v20 = vld [vmem:[%s13981_s3 + $0x20] ss:$8 sps:$4 sm:$0xff]  }
 0x4c8   :  { %v2427_v40 = vrot.slane %v2411_v30, 7  ;;  %v2429_v41 = vrot.slane %v2413_v31, 7  ;;  %v2415_v42 = vmax.f32 %v2407_v33, 0.0  ;;  %v2417_v43 = vmax.f32 %v2409_v34, 0.0  ;;  %v10891_v21 = vld [vmem:[%s13981_s3 + $0x120] ss:$8 sps:$4 sm:$0xff]  }
 0x4c9   :  { %2451 = vst [vmem:[#allocation2 + $0x60] sm:$0xfe] %v2426_v35  ;;  %2453 = vst [vmem:[#allocation2 + $0x70] sm:$0xfe] %v2428_v36  ;;  %v2430_v19 = vrot.slane %v2414_v37, 7  ;;  %v2434_v11 = vrot.slane %v2416_v38, 7 }
 0x4ca   :  { %2452 = vst [vmem:[#allocation2 + $0x68] sm:$0xfe] %v2427_v40  ;;  %2454 = vst [vmem:[#allocation2 + $0x78] sm:$0xfe] %v2429_v41  ;;  %v2432_v55 = vrot.slane %v2415_v42, 7  ;;  %v2436_v46 = vrot.slane %v2417_v43, 7 }
 0x4cb   :  { %v12468_v51 = vpop.f32.mrb[14].mxu1  ;;  %v12470_v22 = vpop.f32.mrb[10].mxu0  ;;  %v2431_v59 = vsel %vm1286_vm8, %v2426_v35, %v2430_v19  ;;  %2459 = vst [vmem:[#allocation2 + $0xa0] sm:$0x1] %v2430_v19  ;;  %v2435_v1 = vsel %vm1286_vm8, %v2428_v36, %v2434_v11  ;;  %2461 = vst [vmem:[#allocation2 + $0xb0] sm:$0x1] %v2434_v11 }
 0x4cc   :  { %v2630_v47 = vpop.f32.mrb[15].mxu1  ;;  %v2559_v2 = vpop.f32.mrb[11].mxu0  ;;  %2455 = vst [vmem:[#allocation2 + $0x80] sm:$0xff] %v2431_v59  ;;  %2457 = vst [vmem:[#allocation2 + $0x90] sm:$0xff] %v2435_v1  ;;  %v12475_v45 = vsel %vm1286_vm8, %v2427_v40, %v2432_v55  ;;  %v12478_v44 = vsel %vm1286_vm8, %v2429_v41, %v2436_v46  ;;  %v10896_v23 = vld [vmem:[%s13981_s3 + $0x34] ss:$8 sps:$4 sm:$0xff]  }
 0x4cd   :  { %2460 = vst [vmem:[#allocation2 + $0xa8] sm:$0x1] %v2432_v55  ;;  %2462 = vst [vmem:[#allocation2 + $0xb8] sm:$0x1] %v2436_v46  ;;  %v2636_v3 = vpack.c.bf16 %v2630_v47, %v2630_v47  ;;  %v2634_v10 = vpack.c.bf16 %v2559_v2, %v2559_v2  ;;  %v10899_v24 = vld [vmem:[%s13981_s3 + $0x134] ss:$8 sps:$4 sm:$0xff]  }
 0x4ce   :  { %v10894_v25 = vld [vmem:[%s13981_s3 + $0x30] ss:$8 sps:$4 sm:$0xff]   ;;  %v10902_v26 = vld [vmem:[%s13981_s3 + $0x44] ss:$8 sps:$4 sm:$0xff]   ;;  %v10900_v28 = vld [vmem:[%s13981_s3 + $0x40] ss:$8 sps:$4 sm:$0xff]  }
 0x4cf   :  { %v10897_v15 = vld [vmem:[%s13981_s3 + $0x130] ss:$8 sps:$4 sm:$0xff]   ;;  %v10905_v27 = vld [vmem:[%s13981_s3 + $0x144] ss:$8 sps:$4 sm:$0xff]   ;;  %v10903_v29 = vld [vmem:[%s13981_s3 + $0x140] ss:$8 sps:$4 sm:$0xff]  }
 0x4d0   :  { %v2769_v48 = vpop.f32.mrb[16].mxu0  ;;  %v2840_v9 = vpop.f32.mrb[16].mxu1  ;;  %v10908_v30 = vld [vmem:[%s13981_s3 + $0x54] ss:$8 sps:$4 sm:$0xff]   ;;  %v10906_v33 = vld [vmem:[%s13981_s3 + $0x50] ss:$8 sps:$4 sm:$0xff]  }
 0x4d1   :  { %v2845_v5 = vpack.c.bf16 %v2769_v48, %v2769_v48  ;;  %v2771_v52 = vpop.f32.mrb[17].mxu0  ;;  %v2842_v62 = vpop.f32.mrb[17].mxu1  ;;  %v2847_v6 = vpack.c.bf16 %v2840_v9, %v2840_v9  ;;  %v10911_v31 = vld [vmem:[%s13981_s3 + $0x154] ss:$8 sps:$4 sm:$0xff]   ;;  %v10909_v34 = vld [vmem:[%s13981_s3 + $0x150] ss:$8 sps:$4 sm:$0xff]  }
 0x4d2   :  { %v2846_v57 = vpack.c.bf16 %v2771_v52, %v2771_v52  ;;  %v2848_v58 = vpack.c.bf16 %v2842_v62, %v2842_v62  ;;  %v10914_v35 = vld [vmem:[%s13981_s3 + $0x64] ss:$8 sps:$4 sm:$0xff]   ;;  %v10912_v37 = vld [vmem:[%s13981_s3 + $0x60] ss:$8 sps:$4 sm:$0xff]   ;;  %v10920_v40 = vld [vmem:[%s13981_s3 + $0x74] ss:$8 sps:$4 sm:$0xff]  }
 0x4d3   :  { %v10917_v36 = vld [vmem:[%s13981_s3 + $0x164] ss:$8 sps:$4 sm:$0xff]   ;;  %v10915_v38 = vld [vmem:[%s13981_s3 + $0x160] ss:$8 sps:$4 sm:$0xff]   ;;  %v10923_v41 = vld [vmem:[%s13981_s3 + $0x174] ss:$8 sps:$4 sm:$0xff]  }
 0x4d4   :  { %3266 = vmatprep.mubr.bf16.mxu0 %v2846_v57  ;;  %3307 = vmatprep.mubr.bf16.mxu1 %v2848_v58  ;;  %v10918_v42 = vld [vmem:[%s13981_s3 + $0x70] ss:$8 sps:$4 sm:$0xff]   ;;  %v10926_v19 = vld [vmem:[%s13981_s3 + $0x84] ss:$8 sps:$4 sm:$0xff]   ;;  %v10924_v55 = vld [vmem:[%s13981_s3 + $0x80] ss:$8 sps:$4 sm:$0xff]  }
 0x4d5   :  { %3267 = vmatmul.mubr.bf16.vlgmr.msra.gmra.mrb[20].mxu0 %v2845_v5  ;;  %3308 = vmatmul.mubr.bf16.vlgmr.msra.gmra.mrb[20].mxu1 %v2847_v6  ;;  %v10921_v43 = vld [vmem:[%s13981_s3 + $0x170] ss:$8 sps:$4 sm:$0xff]   ;;  %v10929_v11 = vld [vmem:[%s13981_s3 + $0x184] ss:$8 sps:$4 sm:$0xff]   ;;  %v10927_v46 = vld [vmem:[%s13981_s3 + $0x180] ss:$8 sps:$4 sm:$0xff]  }
 0x4d6   :  { %3637 = vmatpush1.bf16.msra.mxu0 %v10876_v60  ;;  %3678 = vmatpush1.bf16.msra.mxu1 %v10879_v61  ;;  %v10932_v59 = vld [vmem:[%s13981_s3 + $0x94] ss:$8 sps:$4 sm:$0xff]   ;;  %v10930_v47 = vld [vmem:[%s13981_s3 + $0x90] ss:$8 sps:$4 sm:$0xff]   ;;  %v10938_v48 = vld [vmem:[%s13981_s3 + $0xa4] ss:$8 sps:$4 sm:$0xff]  }
 0x4d7   :  { %3668 = vmatprep.mubr.bf16.mxu0 %v2634_v10  ;;  %3709 = vmatprep.mubr.bf16.mxu1 %v2636_v3  ;;  %v10935_v1 = vld [vmem:[%s13981_s3 + $0x194] ss:$8 sps:$4 sm:$0xff]   ;;  %v10933_v2 = vld [vmem:[%s13981_s3 + $0x190] ss:$8 sps:$4 sm:$0xff]   ;;  %v10941_v9 = vld [vmem:[%s13981_s3 + $0x1a4] ss:$8 sps:$4 sm:$0xff]  }
 0x4d8   :  { %3638 = vmatprep.subr.bf16.mxu0 %v10884_v7  ;;  %3679 = vmatprep.subr.bf16.mxu1 %v10887_v8  ;;  %v10936_v5 = vld [vmem:[%s13981_s3 + $0xa0] ss:$8 sps:$4 sm:$0xff]   ;;  %v10944_v62 = vld [vmem:[%s13981_s3 + $0xb4] ss:$8 sps:$4 sm:$0xff]   ;;  %v10942_v58 = vld [vmem:[%s13981_s3 + $0xb0] ss:$8 sps:$4 sm:$0xff]  }
 0x4d9   :  { %v10939_v52 = vld [vmem:[%s13981_s3 + $0x1a0] ss:$8 sps:$4 sm:$0xff]   ;;  %v10947_v57 = vld [vmem:[%s13981_s3 + $0x1b4] ss:$8 sps:$4 sm:$0xff]   ;;  %v10945_v60 = vld [vmem:[%s13981_s3 + $0x1b0] ss:$8 sps:$4 sm:$0xff]  }
 0x4da   :  { %3639 = vmatpush1.bf16.msra.mxu0 %v10882_v13  ;;  %3680 = vmatpush1.bf16.msra.mxu1 %v10885_v16  ;;  %v10950_v61 = vld [vmem:[%s13981_s3 + $0xc4] ss:$8 sps:$4 sm:$0xff]   ;;  %v10948_v7 = vld [vmem:[%s13981_s3 + $0xc0] ss:$8 sps:$4 sm:$0xff]   ;;  %v10956_v3 = vld [vmem:[%s13981_s3 + $0xd4] ss:$8 sps:$4 sm:$0xff]  }
 0x4db   :  { %3640 = vmatprep.subr.bf16.mxu0 %v10890_v17  ;;  %3681 = vmatprep.subr.bf16.mxu1 %v10893_v18  ;;  %v10953_v6 = vld [vmem:[%s13981_s3 + $0x1c4] ss:$8 sps:$4 sm:$0xff]   ;;  %v10951_v8 = vld [vmem:[%s13981_s3 + $0x1c0] ss:$8 sps:$4 sm:$0xff]   ;;  %v10959_v10 = vld [vmem:[%s13981_s3 + $0x1d4] ss:$8 sps:$4 sm:$0xff]  }
 0x4dc   :  { %v10954_v13 = vld [vmem:[%s13981_s3 + $0xd0] ss:$8 sps:$4 sm:$0xff]   ;;  %v10962_v17 = vld [vmem:[%s13981_s3 + $0xe4] ss:$8 sps:$4 sm:$0xff]  }
 0x4dd   :  { %v10957_v16 = vld [vmem:[%s13981_s3 + $0x1d0] ss:$8 sps:$4 sm:$0xff]   ;;  %v10965_v18 = vld [vmem:[%s13981_s3 + $0x1e4] ss:$8 sps:$4 sm:$0xff]  }
 0x4de   :  { %3641 = vmatpush1.bf16.msra.mxu0 %v10888_v20  ;;  %3682 = vmatpush1.bf16.msra.mxu1 %v10891_v21  ;;  %v10960_v20 = vld [vmem:[%s13981_s3 + $0xe0] ss:$8 sps:$4 sm:$0xff]  }
 0x4df   :  { %3642 = vmatprep.subr.bf16.mxu0 %v10896_v23  ;;  %3683 = vmatprep.subr.bf16.mxu1 %v10899_v24  ;;  %v10963_v21 = vld [vmem:[%s13981_s3 + $0x1e0] ss:$8 sps:$4 sm:$0xff]   ;;  %v10968_v23 = vld [vmem:[%s13981_s3 + $0xf4] ss:$8 sps:$4 sm:$0xff]  }
 0x4e0   :  { %v10971_v24 = vld [vmem:[%s13981_s3 + $0x1f4] ss:$8 sps:$4 sm:$0xff]  }
 0x4e2   :  { %3643 = vmatpush1.bf16.msra.mxu0 %v10894_v25  ;;  %3684 = vmatpush1.bf16.msra.mxu1 %v10897_v15  ;;  %v10966_v25 = vld [vmem:[%s13981_s3 + $0xf0] ss:$8 sps:$4 sm:$0xff]  }
 0x4e3   :  { %3644 = vmatprep.subr.bf16.mxu0 %v10902_v26  ;;  %3685 = vmatprep.subr.bf16.mxu1 %v10905_v27  ;;  %v10969_v15 = vld [vmem:[%s13981_s3 + $0x1f0] ss:$8 sps:$4 sm:$0xff]   ;;  %v2635_v26 = vpack.c.bf16 %v12468_v51, %v12468_v51  ;;  %v2633_v27 = vpack.c.bf16 %v12470_v22, %v12470_v22  ;;  %v10974_v51 = vld [vmem:[%s13981_s3 + $0x404] ss:$8 sps:$4 sm:$0xff]   ;;  %v10984_v22 = vld [vmem:[%s13981_s3 + $0x420] ss:$8 sps:$4 sm:$0xff]  }
 0x4e6   :  { %3645 = vmatpush1.bf16.msra.mxu0 %v10900_v28  ;;  %3686 = vmatpush1.bf16.msra.mxu1 %v10903_v29  ;;  %v10987_v28 = vld [vmem:[%s13981_s3 + $0x520] ss:$8 sps:$4 sm:$0xff]   ;;  %v10992_v29 = vld [vmem:[%s13981_s3 + $0x434] ss:$8 sps:$4 sm:$0xff]  }
 0x4e7   :  { %3646 = vmatprep.subr.bf16.mxu0 %v10908_v30  ;;  %3687 = vmatprep.subr.bf16.mxu1 %v10911_v31  ;;  %v10995_v30 = vld [vmem:[%s13981_s3 + $0x534] ss:$8 sps:$4 sm:$0xff]   ;;  %v10990_v31 = vld [vmem:[%s13981_s3 + $0x430] ss:$8 sps:$4 sm:$0xff]  }
 0x4ea   :  { %3647 = vmatpush1.bf16.msra.mxu0 %v10906_v33  ;;  %3688 = vmatpush1.bf16.msra.mxu1 %v10909_v34  ;;  %v10993_v33 = vld [vmem:[%s13981_s3 + $0x530] ss:$8 sps:$4 sm:$0xff]   ;;  %v10998_v34 = vld [vmem:[%s13981_s3 + $0x444] ss:$8 sps:$4 sm:$0xff]  }
 0x4eb   :  { %3648 = vmatprep.subr.bf16.mxu0 %v10914_v35  ;;  %3689 = vmatprep.subr.bf16.mxu1 %v10917_v36  ;;  %v11001_v35 = vld [vmem:[%s13981_s3 + $0x544] ss:$8 sps:$4 sm:$0xff]   ;;  %v10996_v36 = vld [vmem:[%s13981_s3 + $0x440] ss:$8 sps:$4 sm:$0xff]  }
 0x4ee   :  { %3649 = vmatpush1.bf16.msra.mxu0 %v10912_v37  ;;  %3690 = vmatpush1.bf16.msra.mxu1 %v10915_v38  ;;  %v10999_v37 = vld [vmem:[%s13981_s3 + $0x540] ss:$8 sps:$4 sm:$0xff]   ;;  %v11004_v38 = vld [vmem:[%s13981_s3 + $0x454] ss:$8 sps:$4 sm:$0xff]  }
 0x4ef   :  { %3650 = vmatprep.subr.bf16.mxu0 %v10920_v40  ;;  %3691 = vmatprep.subr.bf16.mxu1 %v10923_v41  ;;  %v11007_v40 = vld [vmem:[%s13981_s3 + $0x554] ss:$8 sps:$4 sm:$0xff]   ;;  %v11002_v41 = vld [vmem:[%s13981_s3 + $0x450] ss:$8 sps:$4 sm:$0xff]  }
 0x4f2   :  { %3651 = vmatpush1.bf16.msra.mxu0 %v10918_v42  ;;  %3692 = vmatpush1.bf16.msra.mxu1 %v10921_v43  ;;  %v11005_v42 = vld [vmem:[%s13981_s3 + $0x550] ss:$8 sps:$4 sm:$0xff]   ;;  %v11010_v43 = vld [vmem:[%s13981_s3 + $0x464] ss:$8 sps:$4 sm:$0xff]  }
 0x4f3   :  { %3652 = vmatprep.subr.bf16.mxu0 %v10926_v19  ;;  %3693 = vmatprep.subr.bf16.mxu1 %v10929_v11  ;;  %v11013_v19 = vld [vmem:[%s13981_s3 + $0x564] ss:$8 sps:$4 sm:$0xff]   ;;  %v11008_v11 = vld [vmem:[%s13981_s3 + $0x460] ss:$8 sps:$4 sm:$0xff]  }
 0x4f6   :  { %3653 = vmatpush1.bf16.msra.mxu0 %v10924_v55  ;;  %3694 = vmatpush1.bf16.msra.mxu1 %v10927_v46  ;;  %v11011_v55 = vld [vmem:[%s13981_s3 + $0x560] ss:$8 sps:$4 sm:$0xff]   ;;  %v11016_v46 = vld [vmem:[%s13981_s3 + $0x474] ss:$8 sps:$4 sm:$0xff]  }
 0x4f7   :  { %3654 = vmatprep.subr.bf16.mxu0 %v10932_v59  ;;  %3695 = vmatprep.subr.bf16.mxu1 %v10935_v1  ;;  %v11019_v59 = vld [vmem:[%s13981_s3 + $0x574] ss:$8 sps:$4 sm:$0xff]   ;;  %v11014_v1 = vld [vmem:[%s13981_s3 + $0x470] ss:$8 sps:$4 sm:$0xff]  }
 0x4fa   :  { %3655 = vmatpush1.bf16.msra.mxu0 %v10930_v47  ;;  %3696 = vmatpush1.bf16.msra.mxu1 %v10933_v2  ;;  %v11017_v47 = vld [vmem:[%s13981_s3 + $0x570] ss:$8 sps:$4 sm:$0xff]   ;;  %v11022_v2 = vld [vmem:[%s13981_s3 + $0x484] ss:$8 sps:$4 sm:$0xff]  }
 0x4fb   :  { %3656 = vmatprep.subr.bf16.mxu0 %v10938_v48  ;;  %3697 = vmatprep.subr.bf16.mxu1 %v10941_v9  ;;  %v11025_v48 = vld [vmem:[%s13981_s3 + $0x584] ss:$8 sps:$4 sm:$0xff]   ;;  %v11020_v9 = vld [vmem:[%s13981_s3 + $0x480] ss:$8 sps:$4 sm:$0xff]  }
 0x4fe   :  { %3657 = vmatpush1.bf16.msra.mxu0 %v10936_v5  ;;  %3698 = vmatpush1.bf16.msra.mxu1 %v10939_v52  ;;  %v11023_v5 = vld [vmem:[%s13981_s3 + $0x580] ss:$8 sps:$4 sm:$0xff]   ;;  %v11028_v52 = vld [vmem:[%s13981_s3 + $0x494] ss:$8 sps:$4 sm:$0xff]  }
 0x4ff   :  { %3658 = vmatprep.subr.bf16.mxu0 %v10944_v62  ;;  %3699 = vmatprep.subr.bf16.mxu1 %v10947_v57  ;;  %v11031_v62 = vld [vmem:[%s13981_s3 + $0x594] ss:$8 sps:$4 sm:$0xff]   ;;  %v11026_v57 = vld [vmem:[%s13981_s3 + $0x490] ss:$8 sps:$4 sm:$0xff]  }
 0x502   :  { %3659 = vmatpush1.bf16.msra.mxu0 %v10942_v58  ;;  %3700 = vmatpush1.bf16.msra.mxu1 %v10945_v60  ;;  %v11029_v58 = vld [vmem:[%s13981_s3 + $0x590] ss:$8 sps:$4 sm:$0xff]   ;;  %v11034_v60 = vld [vmem:[%s13981_s3 + $0x4a4] ss:$8 sps:$4 sm:$0xff]  }
 0x503   :  { %3660 = vmatprep.subr.bf16.mxu0 %v10950_v61  ;;  %3701 = vmatprep.subr.bf16.mxu1 %v10953_v6  ;;  %v11037_v61 = vld [vmem:[%s13981_s3 + $0x5a4] ss:$8 sps:$4 sm:$0xff]   ;;  %v11032_v6 = vld [vmem:[%s13981_s3 + $0x4a0] ss:$8 sps:$4 sm:$0xff]  }
 0x506   :  { %3661 = vmatpush1.bf16.msra.mxu0 %v10948_v7  ;;  %3702 = vmatpush1.bf16.msra.mxu1 %v10951_v8  ;;  %v11035_v7 = vld [vmem:[%s13981_s3 + $0x5a0] ss:$8 sps:$4 sm:$0xff]   ;;  %v11040_v8 = vld [vmem:[%s13981_s3 + $0x4b4] ss:$8 sps:$4 sm:$0xff]  }
 0x507   :  { %3662 = vmatprep.subr.bf16.mxu0 %v10956_v3  ;;  %3703 = vmatprep.subr.bf16.mxu1 %v10959_v10  ;;  %v11043_v3 = vld [vmem:[%s13981_s3 + $0x5b4] ss:$8 sps:$4 sm:$0xff]   ;;  %v11038_v10 = vld [vmem:[%s13981_s3 + $0x4b0] ss:$8 sps:$4 sm:$0xff]  }
 0x50a   :  { %3663 = vmatpush1.bf16.msra.mxu0 %v10954_v13  ;;  %3704 = vmatpush1.bf16.msra.mxu1 %v10957_v16  ;;  %v11041_v13 = vld [vmem:[%s13981_s3 + $0x5b0] ss:$8 sps:$4 sm:$0xff]   ;;  %v11046_v16 = vld [vmem:[%s13981_s3 + $0x4c4] ss:$8 sps:$4 sm:$0xff]  }
 0x50b   :  { %3664 = vmatprep.subr.bf16.mxu0 %v10962_v17  ;;  %3705 = vmatprep.subr.bf16.mxu1 %v10965_v18  ;;  %v11049_v17 = vld [vmem:[%s13981_s3 + $0x5c4] ss:$8 sps:$4 sm:$0xff]   ;;  %v11044_v18 = vld [vmem:[%s13981_s3 + $0x4c0] ss:$8 sps:$4 sm:$0xff]  }
 0x50e   :  { %3665 = vmatpush1.bf16.msra.mxu0 %v10960_v20  ;;  %3706 = vmatpush1.bf16.msra.mxu1 %v10963_v21  ;;  %v11047_v20 = vld [vmem:[%s13981_s3 + $0x5c0] ss:$8 sps:$4 sm:$0xff]   ;;  %v11052_v21 = vld [vmem:[%s13981_s3 + $0x4d4] ss:$8 sps:$4 sm:$0xff]  }
 0x50f   :  { %3666 = vmatprep.subr.bf16.mxu0 %v10968_v23  ;;  %3707 = vmatprep.subr.bf16.mxu1 %v10971_v24  ;;  %v11055_v23 = vld [vmem:[%s13981_s3 + $0x5d4] ss:$8 sps:$4 sm:$0xff]   ;;  %v11050_v24 = vld [vmem:[%s13981_s3 + $0x4d0] ss:$8 sps:$4 sm:$0xff]  }
 0x512   :  { %3667 = vmatpush1.bf16.msra.mxu0 %v10966_v25  ;;  %3708 = vmatpush1.bf16.msra.mxu1 %v10969_v15  ;;  %v11053_v25 = vld [vmem:[%s13981_s3 + $0x5d0] ss:$8 sps:$4 sm:$0xff]   ;;  %v11058_v15 = vld [vmem:[%s13981_s3 + $0x4e4] ss:$8 sps:$4 sm:$0xff]  }
 0x513   :  { %10511 = vmatprep.subr.bf16.mxu0 %v12199_v32  ;;  %10515 = vmatprep.subr.bf16.mxu1 %v12208_v39  ;;  %v10977_v32 = vld [vmem:[%s13981_s3 + $0x504] ss:$8 sps:$4 sm:$0xff]   ;;  %v10972_v39 = vld [vmem:[%s13981_s3 + $0x400] ss:$8 sps:$4 sm:$0xff]  }
 0x515   :  { %3669 = vmatmul.mubr.bf16.vlgmr.msra.gmra.mrb[24].mxu0 %v2633_v27  ;;  %3710 = vmatmul.mubr.bf16.vlgmr.msra.gmra.mrb[24].mxu1 %v2635_v26  ;;  %v11061_v26 = vld [vmem:[%s13981_s3 + $0x5e4] ss:$8 sps:$4 sm:$0xff]   ;;  %v11056_v27 = vld [vmem:[%s13981_s3 + $0x4e0] ss:$8 sps:$4 sm:$0xff]  }
 0x516   :  { %10513 = vmatpush1.bf16.msra.mxu0 %v12213_v54  ;;  %10517 = vmatpush1.bf16.msra.mxu1 %v12216_v0  ;;  %v10975_v54 = vld [vmem:[%s13981_s3 + $0x500] ss:$8 sps:$4 sm:$0xff]   ;;  %v10980_v0 = vld [vmem:[%s13981_s3 + $0x414] ss:$8 sps:$4 sm:$0xff]  }
 0x517   :  { %9286 = vmatprep.subr.msk.mxu0 %vm137_vm3, %v12220_v50  ;;  %9289 = vmatprep.subr.msk.mxu1 %vm137_vm3, %v12222_v14  ;;  %v10983_v50 = vld [vmem:[%s13981_s3 + $0x514] ss:$8 sps:$4 sm:$0xff]   ;;  %v10978_v14 = vld [vmem:[%s13981_s3 + $0x410] ss:$8 sps:$4 sm:$0xff]  }
 0x518   :  { %3784 = vmatprep.mubr.f32.mxu0 %v12228_v56  ;;  %3855 = vmatprep.mubr.f32.mxu1 %v12228_v56  ;;  %v10981_v56 = vld [vmem:[%s13981_s3 + $0x510] ss:$8 sps:$4 sm:$0xff]  }
 0x51a   :  { %9287 = vmatpush1.msk.msra.mxu0 %vm137_vm3, %v12232_v53  ;;  %9290 = vmatpush1.msk.msra.mxu1 %vm137_vm3, %v12234_v4  ;;  %v10986_v53 = vld [vmem:[%s13981_s3 + $0x424] ss:$8 sps:$4 sm:$0xff]  }
 0x51b   :  { %4251 = vmatprep.subr.bf16.mxu0 %v10974_v51  ;;  %4292 = vmatprep.subr.bf16.mxu1 %v10977_v32  ;;  %v10989_v4 = vld [vmem:[%s13981_s3 + $0x524] ss:$8 sps:$4 sm:$0xff]   ;;  %v11059_v51 = vld [vmem:[%s13981_s3 + $0x5e0] ss:$8 sps:$4 sm:$0xff]   ;;  %v11064_v32 = vld [vmem:[%s13981_s3 + $0x4f4] ss:$8 sps:$4 sm:$0xff]  }
 0x51d   :  { %9288 = vmatmul.mubr.msk.f32.vlgmr.msra.gmra.mrb[18].mxu0 %vm2476_vm9, %v11837_v63  ;;  %9291 = vmatmul.mubr.msk.f32.vlgmr.msra.gmra.mrb[18].mxu1 %vm2476_vm9, %v11837_v63 }
 0x51e   :  { %4252 = vmatpush1.bf16.msra.mxu0 %v10972_v39  ;;  %4293 = vmatpush1.bf16.msra.mxu1 %v10975_v54  ;;  %v11067_v39 = vld [vmem:[%s13981_s3 + $0x5f4] ss:$8 sps:$4 sm:$0xff]   ;;  %v4361_v54 = vld [vmem:[#allocation2 + $0x68] sm:$0xff] }
 0x51f   :  { %4253 = vmatprep.subr.bf16.mxu0 %v10980_v0  ;;  %4294 = vmatprep.subr.bf16.mxu1 %v10983_v50  ;;  %v11062_v0 = vld [vmem:[%s13981_s3 + $0x4f0] ss:$8 sps:$4 sm:$0xff]  }
 0x520   :  { %v11065_v50 = vld [vmem:[%s13981_s3 + $0x5f0] ss:$8 sps:$4 sm:$0xff]  }
 0x522   :  { %4254 = vmatpush1.bf16.msra.mxu0 %v10978_v14  ;;  %4295 = vmatpush1.bf16.msra.mxu1 %v10981_v56  ;;  %v4363_v14 = vld [vmem:[#allocation2 + $0x78] sm:$0xff]  ;;  %v12881_v56 = vpack.c.bf16 %v12475_v45, %v4361_v54 }
 0x523   :  { %4255 = vmatprep.subr.bf16.mxu0 %v10986_v53  ;;  %4296 = vmatprep.subr.bf16.mxu1 %v10989_v4  ;;  %v12884_v53 = vpack.c.bf16 %v12478_v44, %v4363_v14  ;;  %v11086_v54 = vld [vmem:[%s13981_s3 + $0x230] ss:$8 sps:$4 sm:$0xff]   ;;  %v11097_v14 = vld [vmem:[%s13981_s3 + $0x344] ss:$8 sps:$4 sm:$0xff]  }
 0x526   :  { %4256 = vmatpush1.bf16.msra.mxu0 %v10984_v22  ;;  %4297 = vmatpush1.bf16.msra.mxu1 %v10987_v28 }
 0x527   :  { %4257 = vmatprep.subr.bf16.mxu0 %v10992_v29  ;;  %4298 = vmatprep.subr.bf16.mxu1 %v10995_v30 }
 0x52a   :  { %4258 = vmatpush1.bf16.msra.mxu0 %v10990_v31  ;;  %4299 = vmatpush1.bf16.msra.mxu1 %v10993_v33 }
 0x52b   :  { %4259 = vmatprep.subr.bf16.mxu0 %v10998_v34  ;;  %4300 = vmatprep.subr.bf16.mxu1 %v11001_v35 }
 0x52e   :  { %4260 = vmatpush1.bf16.msra.mxu0 %v10996_v36  ;;  %4301 = vmatpush1.bf16.msra.mxu1 %v10999_v37 }
 0x52f   :  { %4261 = vmatprep.subr.bf16.mxu0 %v11004_v38  ;;  %4302 = vmatprep.subr.bf16.mxu1 %v11007_v40 }
 0x532   :  { %4262 = vmatpush1.bf16.msra.mxu0 %v11002_v41  ;;  %4303 = vmatpush1.bf16.msra.mxu1 %v11005_v42 }
 0x533   :  { %4263 = vmatprep.subr.bf16.mxu0 %v11010_v43  ;;  %4304 = vmatprep.subr.bf16.mxu1 %v11013_v19 }
 0x536   :  { %4264 = vmatpush1.bf16.msra.mxu0 %v11008_v11  ;;  %4305 = vmatpush1.bf16.msra.mxu1 %v11011_v55 }
 0x537   :  { %4265 = vmatprep.subr.bf16.mxu0 %v11016_v46  ;;  %4306 = vmatprep.subr.bf16.mxu1 %v11019_v59 }
 0x53a   :  { %4266 = vmatpush1.bf16.msra.mxu0 %v11014_v1  ;;  %4307 = vmatpush1.bf16.msra.mxu1 %v11017_v47 }
 0x53b   :  { %4267 = vmatprep.subr.bf16.mxu0 %v11022_v2  ;;  %4308 = vmatprep.subr.bf16.mxu1 %v11025_v48 }
 0x53e   :  { %4268 = vmatpush1.bf16.msra.mxu0 %v11020_v9  ;;  %4309 = vmatpush1.bf16.msra.mxu1 %v11023_v5  ;;  %v4364_v9 = vld [vmem:[#allocation2 + $0x80] sm:$0xff]  ;;  %v4366_v5 = vld [vmem:[#allocation2 + $0x90] sm:$0xff] }
 0x53f   :  { %4269 = vmatprep.subr.bf16.mxu0 %v11028_v52  ;;  %4310 = vmatprep.subr.bf16.mxu1 %v11031_v62 }
 0x542   :  { %4270 = vmatpush1.bf16.msra.mxu0 %v11026_v57  ;;  %4311 = vmatpush1.bf16.msra.mxu1 %v11029_v58  ;;  %v4360_v58 = vld [vmem:[#allocation2 + $0x60] sm:$0xff] }
 0x543   :  { %4271 = vmatprep.subr.bf16.mxu0 %v11034_v60  ;;  %4312 = vmatprep.subr.bf16.mxu1 %v11037_v61  ;;  %v4362_v60 = vld [vmem:[#allocation2 + $0x70] sm:$0xff]  ;;  %v12892_v61 = vpack.c.bf16 %v4364_v9, %v4360_v58  ;;  %v11131_v9 = vld [vmem:[%s13981_s3 + $0x3a0] ss:$8 sps:$4 sm:$0xff]   ;;  %v11142_v58 = vld [vmem:[%s13981_s3 + $0x2c4] ss:$8 sps:$4 sm:$0xff]  }
 0x546   :  { %4272 = vmatpush1.bf16.msra.mxu0 %v11032_v6  ;;  %4313 = vmatpush1.bf16.msra.mxu1 %v11035_v7  ;;  %v12894_v6 = vpack.c.bf16 %v4366_v5, %v4362_v60  ;;  %v12898_v7 = vld [vmem:[#allocation2 + $0xa8] sm:$0x3]  ;;  %v11136_v5 = vld [vmem:[%s13981_s3 + $0x2b4] ss:$8 sps:$4 sm:$0xff]   ;;  %v11145_v60 = vld [vmem:[%s13981_s3 + $0x3c4] ss:$8 sps:$4 sm:$0xff]  }
 0x547   :  { %4273 = vmatprep.subr.bf16.mxu0 %v11040_v8  ;;  %4314 = vmatprep.subr.bf16.mxu1 %v11043_v3  ;;  %v12900_v8 = vld [vmem:[#allocation2 + $0xb8] sm:$0x3]  ;;  %v12906_v3 = vld [vmem:[#allocation3] sm:$0xff] }
 0x54a   :  { %4274 = vmatpush1.bf16.msra.mxu0 %v11038_v10  ;;  %4315 = vmatpush1.bf16.msra.mxu1 %v11041_v13  ;;  %v12910_v10 = vld [vmem:[#allocation2 + $0xa0] sm:$0x3]  ;;  %v12912_v13 = vld [vmem:[#allocation2 + $0xb0] sm:$0x3] }
 0x54b   :  { %4275 = vmatprep.subr.bf16.mxu0 %v11046_v16  ;;  %4316 = vmatprep.subr.bf16.mxu1 %v11049_v17  ;;  %v11070_v16 = vld [vmem:[%s13981_s3 + $0x204] ss:$8 sps:$4 sm:$0xff]  }
 0x54c   :  { %v11073_v17 = vld [vmem:[%s13981_s3 + $0x304] ss:$8 sps:$4 sm:$0xff]  }
 0x54e   :  { %4276 = vmatpush1.bf16.msra.mxu0 %v11044_v18  ;;  %4317 = vmatpush1.bf16.msra.mxu1 %v11047_v20  ;;  %v11068_v18 = vld [vmem:[%s13981_s3 + $0x200] ss:$8 sps:$4 sm:$0xff]  }
 0x54f   :  { %4277 = vmatprep.subr.bf16.mxu0 %v11052_v21  ;;  %4318 = vmatprep.subr.bf16.mxu1 %v11055_v23  ;;  %v11071_v20 = vld [vmem:[%s13981_s3 + $0x300] ss:$8 sps:$4 sm:$0xff]   ;;  %v11076_v21 = vld [vmem:[%s13981_s3 + $0x214] ss:$8 sps:$4 sm:$0xff]  }
 0x550   :  { %v11079_v23 = vld [vmem:[%s13981_s3 + $0x314] ss:$8 sps:$4 sm:$0xff]  }
 0x552   :  { %4278 = vmatpush1.bf16.msra.mxu0 %v11050_v24  ;;  %4319 = vmatpush1.bf16.msra.mxu1 %v11053_v25  ;;  %v11074_v24 = vld [vmem:[%s13981_s3 + $0x210] ss:$8 sps:$4 sm:$0xff]  }
 0x553   :  { %4279 = vmatprep.subr.bf16.mxu0 %v11058_v15  ;;  %4320 = vmatprep.subr.bf16.mxu1 %v11061_v26  ;;  %v11077_v25 = vld [vmem:[%s13981_s3 + $0x310] ss:$8 sps:$4 sm:$0xff]   ;;  %v11082_v15 = vld [vmem:[%s13981_s3 + $0x224] ss:$8 sps:$4 sm:$0xff]  }
 0x554   :  { %v11085_v26 = vld [vmem:[%s13981_s3 + $0x324] ss:$8 sps:$4 sm:$0xff]  }
 0x556   :  { %4280 = vmatpush1.bf16.msra.mxu0 %v11056_v27  ;;  %4321 = vmatpush1.bf16.msra.mxu1 %v11059_v51  ;;  %v11080_v27 = vld [vmem:[%s13981_s3 + $0x220] ss:$8 sps:$4 sm:$0xff]  }
 0x557   :  { %4281 = vmatprep.subr.bf16.mxu0 %v11064_v32  ;;  %4322 = vmatprep.subr.bf16.mxu1 %v11067_v39  ;;  %v11083_v51 = vld [vmem:[%s13981_s3 + $0x320] ss:$8 sps:$4 sm:$0xff]   ;;  %v11088_v32 = vld [vmem:[%s13981_s3 + $0x234] ss:$8 sps:$4 sm:$0xff]  }
 0x558   :  { %v11091_v39 = vld [vmem:[%s13981_s3 + $0x334] ss:$8 sps:$4 sm:$0xff]  }
 0x55a   :  { %4282 = vmatpush1.bf16.msra.mxu0 %v11062_v0  ;;  %4323 = vmatpush1.bf16.msra.mxu1 %v11065_v50  ;;  %v11089_v0 = vld [vmem:[%s13981_s3 + $0x330] ss:$8 sps:$4 sm:$0xff]   ;;  %v11094_v50 = vld [vmem:[%s13981_s3 + $0x244] ss:$8 sps:$4 sm:$0xff]  }
 0x55b   :  { %10519 = vmatprep.subr.bf16.mxu0 %v12881_v56  ;;  %10523 = vmatprep.subr.bf16.mxu1 %v12884_v53 }
 0x5a8   :  { %v3268_v4 = vpop.f32.mrb[20].mxu0  ;;  %v3309_v22 = vpop.f32.mrb[20].mxu1 }
 0x5a9   :  { %v3310_v28 = vadd.f32 %v3309_v22, %v3268_v4  ;;  %v3270_v29 = vpop.f32.mrb[21].mxu0  ;;  %v3311_v30 = vpop.f32.mrb[21].mxu1  ;;  %v11092_v4 = vld [vmem:[%s13981_s3 + $0x240] ss:$8 sps:$4 sm:$0xff]  }
 0x5aa   :  { %v3312_v31 = vadd.f32 %v3311_v30, %v3270_v29  ;;  %v3272_v33 = vpop.f32.mrb[22].mxu0  ;;  %v3313_v34 = vpop.f32.mrb[22].mxu1  ;;  %v11095_v22 = vld [vmem:[%s13981_s3 + $0x340] ss:$8 sps:$4 sm:$0xff]   ;;  %v11103_v29 = vld [vmem:[%s13981_s3 + $0x354] ss:$8 sps:$4 sm:$0xff]  }
 0x5ab   :  { %v3273_v35 = vpop.f32.mrb[23].mxu0  ;;  %v3314_v45 = vpop.f32.mrb[23].mxu1  ;;  %v11098_v30 = vld [vmem:[%s13981_s3 + $0x250] ss:$8 sps:$4 sm:$0xff]   ;;  %v11106_v33 = vld [vmem:[%s13981_s3 + $0x264] ss:$8 sps:$4 sm:$0xff]  }
 0x5ac   :  { %v11109_v34 = vld [vmem:[%s13981_s3 + $0x364] ss:$8 sps:$4 sm:$0xff]   ;;  %v11104_v35 = vld [vmem:[%s13981_s3 + $0x260] ss:$8 sps:$4 sm:$0xff]  }
 0x5ad   :  { %v11107_v45 = vld [vmem:[%s13981_s3 + $0x360] ss:$8 sps:$4 sm:$0xff]  }
 0x5e8   :  { %v3670_v36 = vpop.f32.mrb[24].mxu0  ;;  %v3711_v37 = vpop.f32.mrb[24].mxu1 }
 0x5e9   :  { %v3671_v44 = vadd.f32 %v3670_v36, %v3310_v28  ;;  %v3672_v38 = vpop.f32.mrb[25].mxu0  ;;  %v3713_v40 = vpop.f32.mrb[25].mxu1  ;;  %v11100_v28 = vld [vmem:[%s13981_s3 + $0x254] ss:$8 sps:$4 sm:$0xff]  }
 0x5ea   :  { %v3673_v41 = vadd.f32 %v3672_v38, %v3312_v31  ;;  %v3674_v42 = vpop.f32.mrb[26].mxu0  ;;  %v3715_v43 = vpop.f32.mrb[26].mxu1  ;;  %v11101_v31 = vld [vmem:[%s13981_s3 + $0x350] ss:$8 sps:$4 sm:$0xff]   ;;  %v11112_v36 = vld [vmem:[%s13981_s3 + $0x274] ss:$8 sps:$4 sm:$0xff]  }
 0x5eb   :  { %v12888_v19 = vadd.f32 %v3711_v37, %v3671_v44  ;;  %v3675_v11 = vpop.f32.mrb[27].mxu0  ;;  %v3716_v55 = vpop.f32.mrb[27].mxu1  ;;  %v11115_v37 = vld [vmem:[%s13981_s3 + $0x374] ss:$8 sps:$4 sm:$0xff]   ;;  %v11110_v44 = vld [vmem:[%s13981_s3 + $0x270] ss:$8 sps:$4 sm:$0xff]  }
 0x5ec   :  { %v12890_v46 = vadd.f32 %v3713_v40, %v3673_v41  ;;  %v11113_v38 = vld [vmem:[%s13981_s3 + $0x370] ss:$8 sps:$4 sm:$0xff]   ;;  %v11118_v40 = vld [vmem:[%s13981_s3 + $0x284] ss:$8 sps:$4 sm:$0xff]   ;;  %v11116_v42 = vld [vmem:[%s13981_s3 + $0x280] ss:$8 sps:$4 sm:$0xff]  }
 0x5ed   :  { %v11121_v41 = vld [vmem:[%s13981_s3 + $0x384] ss:$8 sps:$4 sm:$0xff]   ;;  %v11119_v43 = vld [vmem:[%s13981_s3 + $0x380] ss:$8 sps:$4 sm:$0xff]   ;;  %v11124_v11 = vld [vmem:[%s13981_s3 + $0x294] ss:$8 sps:$4 sm:$0xff]  }
 0x5ee   :  { %v11127_v55 = vld [vmem:[%s13981_s3 + $0x394] ss:$8 sps:$4 sm:$0xff]  }
 0x5f0   :  { %v3786_v59 = vpop.f32.mrb[18].mxu0  ;;  %v3857_v1 = vpop.f32.mrb[18].mxu1 }
 0x5f1   :  { %v3862_v47 = vpack.c.bf16 %v3786_v59, %v3786_v59  ;;  %v3788_v2 = vpop.f32.mrb[19].mxu0  ;;  %v3859_v48 = vpop.f32.mrb[19].mxu1  ;;  %v3864_v57 = vpack.c.bf16 %v3857_v1, %v3857_v1  ;;  %v11122_v59 = vld [vmem:[%s13981_s3 + $0x290] ss:$8 sps:$4 sm:$0xff]  }
 0x5f2   :  { %v3863_v52 = vpack.c.bf16 %v3788_v2, %v3788_v2  ;;  %v3865_v62 = vpack.c.bf16 %v3859_v48, %v3859_v48  ;;  %v11125_v1 = vld [vmem:[%s13981_s3 + $0x390] ss:$8 sps:$4 sm:$0xff]   ;;  %v11133_v2 = vld [vmem:[%s13981_s3 + $0x3a4] ss:$8 sps:$4 sm:$0xff]   ;;  %v11128_v48 = vld [vmem:[%s13981_s3 + $0x2a0] ss:$8 sps:$4 sm:$0xff]  }
 0x5f4   :  { %4283 = vmatprep.mubr.bf16.mxu0 %v3863_v52  ;;  %4324 = vmatprep.mubr.bf16.mxu1 %v3865_v62  ;;  %v11139_v52 = vld [vmem:[%s13981_s3 + $0x3b4] ss:$8 sps:$4 sm:$0xff]   ;;  %v11134_v62 = vld [vmem:[%s13981_s3 + $0x2b0] ss:$8 sps:$4 sm:$0xff]  }
 0x5f5   :  { %4284 = vmatmul.mubr.bf16.vlgmr.msra.gmra.mrb[28].mxu0 %v3862_v47  ;;  %4325 = vmatmul.mubr.bf16.vlgmr.msra.gmra.mrb[28].mxu1 %v3864_v57  ;;  %v11130_v47 = vld [vmem:[%s13981_s3 + $0x2a4] ss:$8 sps:$4 sm:$0xff]   ;;  %v11137_v57 = vld [vmem:[%s13981_s3 + $0x3b0] ss:$8 sps:$4 sm:$0xff]  }
 0x5f6   :  { %10521 = vmatpush1.bf16.msra.mxu0 %v12892_v61  ;;  %10525 = vmatpush1.bf16.msra.mxu1 %v12894_v6 }
 0x5f7   :  { %9420 = vmatprep.subr.msk.mxu0 %vm137_vm3, %v12898_v7  ;;  %9423 = vmatprep.subr.msk.mxu1 %vm137_vm3, %v12900_v8 }
 0x5f8   :  { %4448 = vmatprep.mubr.f32.mxu0 %v12906_v3  ;;  %4519 = vmatprep.mubr.f32.mxu1 %v12906_v3 }
 0x5fa   :  { %9421 = vmatpush1.msk.msra.mxu0 %vm137_vm3, %v12910_v10  ;;  %9424 = vmatpush1.msk.msra.mxu1 %vm137_vm3, %v12912_v13 }
 0x5fb   :  { %10527 = vmatprep.subr.bf16.mxu0 %v12881_v56  ;;  %10531 = vmatprep.subr.bf16.mxu1 %v12884_v53 }
 0x5fd   :  { %9422 = vmatmul.mubr.msk.f32.vlgmr.msra.gmra.mrb[32].mxu0 %vm2476_vm9, %v14098_v49  ;;  %9425 = vmatmul.mubr.msk.f32.vlgmr.msra.gmra.mrb[32].mxu1 %vm2476_vm9, %v14098_v49 }
 0x5fe   :  { %10529 = vmatpush1.bf16.msra.mxu0 %v12892_v61  ;;  %10533 = vmatpush1.bf16.msra.mxu1 %v12894_v6 }
 0x5ff   :  { %9426 = vmatprep.subr.msk.mxu0 %vm137_vm3, %v12898_v7  ;;  %9429 = vmatprep.subr.msk.mxu1 %vm137_vm3, %v12900_v8 }
 0x600   :  { %4658 = vmatprep.mubr.f32.mxu0 %v12906_v3  ;;  %4729 = vmatprep.mubr.f32.mxu1 %v12906_v3 }
 0x602   :  { %9427 = vmatpush1.msk.msra.mxu0 %vm137_vm3, %v12910_v10  ;;  %9430 = vmatpush1.msk.msra.mxu1 %vm137_vm3, %v12912_v13 }
 0x603   :  { %9428 = vmatmul.mubr.msk.f32.vlgmr.msra.gmra.mrb[34].mxu0 %vm2476_vm9, %v14099_v12  ;;  %9431 = vmatmul.mubr.msk.f32.vlgmr.msra.gmra.mrb[34].mxu1 %vm2476_vm9, %v14099_v12 }
 0x604   :  { %5124 = vmatprep.subr.bf16.mxu0 %v11070_v16  ;;  %5165 = vmatprep.subr.bf16.mxu1 %v11073_v17  ;;  %v11140_v16 = vld [vmem:[%s13981_s3 + $0x2c0] ss:$8 sps:$4 sm:$0xff]  }
 0x605   :  { %5125 = vmatpush1.bf16.msra.mxu0 %v11068_v18  ;;  %5166 = vmatpush1.bf16.msra.mxu1 %v11071_v20  ;;  %v11143_v17 = vld [vmem:[%s13981_s3 + $0x3c0] ss:$8 sps:$4 sm:$0xff]   ;;  %v11148_v18 = vld [vmem:[%s13981_s3 + $0x2d4] ss:$8 sps:$4 sm:$0xff]  }
 0x606   :  { %5126 = vmatprep.subr.bf16.mxu0 %v11076_v21  ;;  %5167 = vmatprep.subr.bf16.mxu1 %v11079_v23  ;;  %v11151_v20 = vld [vmem:[%s13981_s3 + $0x3d4] ss:$8 sps:$4 sm:$0xff]   ;;  %v11146_v21 = vld [vmem:[%s13981_s3 + $0x2d0] ss:$8 sps:$4 sm:$0xff]  }
 0x607   :  { %v11149_v23 = vld [vmem:[%s13981_s3 + $0x3d0] ss:$8 sps:$4 sm:$0xff]  }
 0x609   :  { %5127 = vmatpush1.bf16.msra.mxu0 %v11074_v24  ;;  %5168 = vmatpush1.bf16.msra.mxu1 %v11077_v25  ;;  %v11154_v24 = vld [vmem:[%s13981_s3 + $0x2e4] ss:$8 sps:$4 sm:$0xff]  }
 0x60a   :  { %5128 = vmatprep.subr.bf16.mxu0 %v11082_v15  ;;  %5169 = vmatprep.subr.bf16.mxu1 %v11085_v26  ;;  %v11157_v25 = vld [vmem:[%s13981_s3 + $0x3e4] ss:$8 sps:$4 sm:$0xff]   ;;  %v11152_v15 = vld [vmem:[%s13981_s3 + $0x2e0] ss:$8 sps:$4 sm:$0xff]  }
 0x60b   :  { %v11155_v26 = vld [vmem:[%s13981_s3 + $0x3e0] ss:$8 sps:$4 sm:$0xff]  }
 0x60d   :  { %5129 = vmatpush1.bf16.msra.mxu0 %v11080_v27  ;;  %5170 = vmatpush1.bf16.msra.mxu1 %v11083_v51  ;;  %v11160_v27 = vld [vmem:[%s13981_s3 + $0x2f4] ss:$8 sps:$4 sm:$0xff]  }
 0x60e   :  { %5130 = vmatprep.subr.bf16.mxu0 %v11088_v32  ;;  %5171 = vmatprep.subr.bf16.mxu1 %v11091_v39  ;;  %v11163_v51 = vld [vmem:[%s13981_s3 + $0x3f4] ss:$8 sps:$4 sm:$0xff]   ;;  %v11158_v32 = vld [vmem:[%s13981_s3 + $0x2f0] ss:$8 sps:$4 sm:$0xff]  }
 0x60f   :  { %v11161_v39 = vld [vmem:[%s13981_s3 + $0x3f0] ss:$8 sps:$4 sm:$0xff]  }
 0x611   :  { %5131 = vmatpush1.bf16.msra.mxu0 %v11086_v54  ;;  %5172 = vmatpush1.bf16.msra.mxu1 %v11089_v0  ;;  %v11166_v54 = vld [vmem:[%s13981_s3 + $0x4] ss:$8 sps:$4 sm:$0xff]  }
 0x612   :  { %5132 = vmatprep.subr.bf16.mxu0 %v11094_v50  ;;  %5173 = vmatprep.subr.bf16.mxu1 %v11097_v14  ;;  %v11169_v0 = vld [vmem:[%s13981_s3 + $0x104] ss:$8 sps:$4 sm:$0xff]   ;;  %v2463_v50 = vld [vmem:[%s13982_s4] sm:$0x3] }
 0x615   :  { %5133 = vmatpush1.bf16.msra.mxu0 %v11092_v4  ;;  %5174 = vmatpush1.bf16.msra.mxu1 %v11095_v22 }
 0x616   :  { %5134 = vmatprep.subr.bf16.mxu0 %v11100_v28  ;;  %5175 = vmatprep.subr.bf16.mxu1 %v11103_v29  ;;  %v14100_v28 = vld [vmem:[#allocation17_spill] sm:$0xff] }
 0x617   :  { %v14101_v29 = vsub.s32 0, %v14100_v28 }
 0x619   :  { %5135 = vmatpush1.bf16.msra.mxu0 %v11098_v30  ;;  %5176 = vmatpush1.bf16.msra.mxu1 %v11101_v31  ;;  %v13143_v30 = vrot.slane %v2463_v50, %v14101_v29  ;;  %v11199_v29 = vld [vmem:[%s13981_s3 + $0x154] ss:$8 sps:$4 sm:$0xff]  }
 0x61a   :  { %5136 = vmatprep.subr.bf16.mxu0 %v11106_v33  ;;  %5177 = vmatprep.subr.bf16.mxu1 %v11109_v34 }
 0x61d   :  { %5137 = vmatpush1.bf16.msra.mxu0 %v11104_v35  ;;  %5178 = vmatpush1.bf16.msra.mxu1 %v11107_v45  ;;  %v14102_v35 = vsub.s32 1, %v14100_v28  ;;  %v11196_v28 = vld [vmem:[%s13981_s3 + $0x54] ss:$8 sps:$4 sm:$0xff]  }
 0x61e   :  { %5138 = vmatprep.subr.bf16.mxu0 %v11112_v36  ;;  %5179 = vmatprep.subr.bf16.mxu1 %v11115_v37 }
 0x61f   :  { %v13147_v45 = vrot.slane %v2463_v50, %v14102_v35  ;;  %v11190_v50 = vld [vmem:[%s13981_s3 + $0x44] ss:$8 sps:$4 sm:$0xff]  }
 0x620   :  { %v11205_v35 = vld [vmem:[%s13981_s3 + $0x164] ss:$8 sps:$4 sm:$0xff]  }
 0x621   :  { %5139 = vmatpush1.bf16.msra.mxu0 %v11110_v44  ;;  %5180 = vmatpush1.bf16.msra.mxu1 %v11113_v38 }
 0x622   :  { %5140 = vmatprep.subr.bf16.mxu0 %v11118_v40  ;;  %5181 = vmatprep.subr.bf16.mxu1 %v11121_v41 }
 0x625   :  { %5141 = vmatpush1.bf16.msra.mxu0 %v11116_v42  ;;  %5182 = vmatpush1.bf16.msra.mxu1 %v11119_v43 }
 0x626   :  { %5142 = vmatprep.subr.bf16.mxu0 %v11124_v11  ;;  %5183 = vmatprep.subr.bf16.mxu1 %v11127_v55 }
 0x629   :  { %5143 = vmatpush1.bf16.msra.mxu0 %v11122_v59  ;;  %5184 = vmatpush1.bf16.msra.mxu1 %v11125_v1 }
 0x62a   :  { %5144 = vmatprep.subr.bf16.mxu0 %v11130_v47  ;;  %5185 = vmatprep.subr.bf16.mxu1 %v11133_v2 }
 0x62d   :  { %5145 = vmatpush1.bf16.msra.mxu0 %v11128_v48  ;;  %5186 = vmatpush1.bf16.msra.mxu1 %v11131_v9 }
 0x62e   :  { %5146 = vmatprep.subr.bf16.mxu0 %v11136_v5  ;;  %5187 = vmatprep.subr.bf16.mxu1 %v11139_v52 }
 0x631   :  { %5147 = vmatpush1.bf16.msra.mxu0 %v11134_v62  ;;  %5188 = vmatpush1.bf16.msra.mxu1 %v11137_v57 }
 0x632   :  { %5148 = vmatprep.subr.bf16.mxu0 %v11142_v58  ;;  %5189 = vmatprep.subr.bf16.mxu1 %v11145_v60  ;;  %v11164_v60 = vld [vmem:[%s13981_s3] ss:$8 sps:$4 sm:$0xff]  }
 0x635   :  { %5149 = vmatpush1.bf16.msra.mxu0 %v11140_v16  ;;  %5190 = vmatpush1.bf16.msra.mxu1 %v11143_v17  ;;  %v11167_v16 = vld [vmem:[%s13981_s3 + $0x100] ss:$8 sps:$4 sm:$0xff]  }
 0x636   :  { %5150 = vmatprep.subr.bf16.mxu0 %v11148_v18  ;;  %5191 = vmatprep.subr.bf16.mxu1 %v11151_v20  ;;  %v11172_v18 = vld [vmem:[%s13981_s3 + $0x14] ss:$8 sps:$4 sm:$0xff]  }
 0x637   :  { %v11175_v20 = vld [vmem:[%s13981_s3 + $0x114] ss:$8 sps:$4 sm:$0xff]  }
 0x639   :  { %5151 = vmatpush1.bf16.msra.mxu0 %v11146_v21  ;;  %5192 = vmatpush1.bf16.msra.mxu1 %v11149_v23 }
 0x63a   :  { %5152 = vmatprep.subr.bf16.mxu0 %v11154_v24  ;;  %5193 = vmatprep.subr.bf16.mxu1 %v11157_v25  ;;  %v11170_v24 = vld [vmem:[%s13981_s3 + $0x10] ss:$8 sps:$4 sm:$0xff]  }
 0x63b   :  { %v11173_v25 = vld [vmem:[%s13981_s3 + $0x110] ss:$8 sps:$4 sm:$0xff]  }
 0x63d   :  { %5153 = vmatpush1.bf16.msra.mxu0 %v11152_v15  ;;  %5194 = vmatpush1.bf16.msra.mxu1 %v11155_v26  ;;  %v11178_v15 = vld [vmem:[%s13981_s3 + $0x24] ss:$8 sps:$4 sm:$0xff]  }
 0x63e   :  { %5154 = vmatprep.subr.bf16.mxu0 %v11160_v27  ;;  %5195 = vmatprep.subr.bf16.mxu1 %v11163_v51  ;;  %v11181_v26 = vld [vmem:[%s13981_s3 + $0x124] ss:$8 sps:$4 sm:$0xff]   ;;  %v11176_v27 = vld [vmem:[%s13981_s3 + $0x20] ss:$8 sps:$4 sm:$0xff]  }
 0x63f   :  { %v11179_v51 = vld [vmem:[%s13981_s3 + $0x120] ss:$8 sps:$4 sm:$0xff]  }
 0x641   :  { %5155 = vmatpush1.bf16.msra.mxu0 %v11158_v32  ;;  %5196 = vmatpush1.bf16.msra.mxu1 %v11161_v39  ;;  %v11184_v32 = vld [vmem:[%s13981_s3 + $0x34] ss:$8 sps:$4 sm:$0xff]  }
 0x642   :  { %5526 = vmatprep.subr.bf16.mxu0 %v11166_v54  ;;  %5567 = vmatprep.subr.bf16.mxu1 %v11169_v0  ;;  %v11187_v39 = vld [vmem:[%s13981_s3 + $0x134] ss:$8 sps:$4 sm:$0xff]   ;;  %v11182_v54 = vld [vmem:[%s13981_s3 + $0x30] ss:$8 sps:$4 sm:$0xff]  }
 0x643   :  { %v11185_v0 = vld [vmem:[%s13981_s3 + $0x130] ss:$8 sps:$4 sm:$0xff]  }
 0x6c8   :  { %v4285_v14 = vpop.f32.mrb[28].mxu0  ;;  %v4326_v4 = vpop.f32.mrb[28].mxu1 }
 0x6c9   :  { %v4327_v22 = vadd.f32 %v4326_v4, %v4285_v14  ;;  %v4287_v31 = vpop.f32.mrb[29].mxu0  ;;  %v4328_v33 = vpop.f32.mrb[29].mxu1  ;;  %v11193_v14 = vld [vmem:[%s13981_s3 + $0x144] ss:$8 sps:$4 sm:$0xff]   ;;  %v11188_v4 = vld [vmem:[%s13981_s3 + $0x40] ss:$8 sps:$4 sm:$0xff]  }
 0x6ca   :  { %v4329_v34 = vadd.f32 %v4328_v33, %v4287_v31  ;;  %v4289_v36 = vpop.f32.mrb[30].mxu0  ;;  %v4330_v37 = vpop.f32.mrb[30].mxu1  ;;  %v11194_v31 = vld [vmem:[%s13981_s3 + $0x50] ss:$8 sps:$4 sm:$0xff]  }
 0x6cb   :  { %v4333_v44 = vadd.f32 %v4327_v22, %v12888_v19  ;;  %v4290_v38 = vpop.f32.mrb[31].mxu0  ;;  %v4331_v40 = vpop.f32.mrb[31].mxu1  ;;  %v11191_v22 = vld [vmem:[%s13981_s3 + $0x140] ss:$8 sps:$4 sm:$0xff]   ;;  %v11197_v33 = vld [vmem:[%s13981_s3 + $0x150] ss:$8 sps:$4 sm:$0xff]  }
 0x6cc   :  { %v4334_v41 = vadd.f32 %v4329_v34, %v12890_v46  ;;  %v11202_v34 = vld [vmem:[%s13981_s3 + $0x64] ss:$8 sps:$4 sm:$0xff]   ;;  %v11200_v36 = vld [vmem:[%s13981_s3 + $0x60] ss:$8 sps:$4 sm:$0xff]   ;;  %v11211_v38 = vld [vmem:[%s13981_s3 + $0x174] ss:$8 sps:$4 sm:$0xff]  }
 0x6cd   :  { %v4346_v42 = vadd.f32 %v13143_v30, %v4333_v44  ;;  %v11203_v37 = vld [vmem:[%s13981_s3 + $0x160] ss:$8 sps:$4 sm:$0xff]   ;;  %v11208_v44 = vld [vmem:[%s13981_s3 + $0x74] ss:$8 sps:$4 sm:$0xff]   ;;  %v11206_v40 = vld [vmem:[%s13981_s3 + $0x70] ss:$8 sps:$4 sm:$0xff]  }
 0x6ce   :  { %v4347_v43 = vadd.f32 %v13147_v45, %v4334_v41  ;;  %v11209_v41 = vld [vmem:[%s13981_s3 + $0x170] ss:$8 sps:$4 sm:$0xff]  }
 0x6cf   :  { %v4348_v11 = vmax.f32 %v4346_v42, 0.0  ;;  %v11214_v42 = vld [vmem:[%s13981_s3 + $0x84] ss:$8 sps:$4 sm:$0xff]  }
 0x6d0   :  { %v4349_v55 = vmax.f32 %v4347_v43, 0.0  ;;  %v13153_v59 = vpop.f32.mrb[32].mxu1  ;;  %v13155_v1 = vpop.f32.mrb[32].mxu0  ;;  %v11217_v43 = vld [vmem:[%s13981_s3 + $0x184] ss:$8 sps:$4 sm:$0xff]  }
 0x6d1   :  { %v4352_v47 = vrot.slane %v4348_v11, 7  ;;  %v4523_v2 = vpop.f32.mrb[33].mxu1  ;;  %v4452_v48 = vpop.f32.mrb[33].mxu0  ;;  %v11212_v11 = vld [vmem:[%s13981_s3 + $0x80] ss:$8 sps:$4 sm:$0xff]  }
 0x6d2   :  { %v4353_v9 = vrot.slane %v4349_v55, 7  ;;  %v4529_v21 = vpack.c.bf16 %v4523_v2, %v4523_v2  ;;  %v4527_v23 = vpack.c.bf16 %v4452_v48, %v4452_v48  ;;  %v11215_v55 = vld [vmem:[%s13981_s3 + $0x180] ss:$8 sps:$4 sm:$0xff]   ;;  %v11223_v2 = vld [vmem:[%s13981_s3 + $0x194] ss:$8 sps:$4 sm:$0xff]  }
 0x6d3   :  { %4356 = vst [vmem:[#allocation3] sm:$0xfe] %v4352_v47  ;;  %4358 = vst [vmem:[#allocation3 + $0x10] sm:$0x1] %v4352_v47  ;;  %v11220_v47 = vld [vmem:[%s13981_s3 + $0x94] ss:$8 sps:$4 sm:$0xff]  }
 0x6d4   :  { %4357 = vst [vmem:[#allocation3 + $0x8] sm:$0xfe] %v4353_v9  ;;  %4359 = vst [vmem:[#allocation3 + $0x18] sm:$0x1] %v4353_v9  ;;  %v11218_v48 = vld [vmem:[%s13981_s3 + $0x90] ss:$8 sps:$4 sm:$0xff]  }
 0x6d5   :  { %v11221_v9 = vld [vmem:[%s13981_s3 + $0x190] ss:$8 sps:$4 sm:$0xff]  }
 0x6d6   :  { %v4660_v19 = vpop.f32.mrb[34].mxu0  ;;  %v4731_v46 = vpop.f32.mrb[34].mxu1 }
 0x6d7   :  { %v4736_v5 = vpack.c.bf16 %v4660_v19, %v4660_v19  ;;  %v4662_v52 = vpop.f32.mrb[35].mxu0  ;;  %v4733_v62 = vpop.f32.mrb[35].mxu1  ;;  %v4738_v17 = vpack.c.bf16 %v4731_v46, %v4731_v46  ;;  %v11226_v19 = vld [vmem:[%s13981_s3 + $0xa4] ss:$8 sps:$4 sm:$0xff]  }
 0x6d8   :  { %v4737_v57 = vpack.c.bf16 %v4662_v52, %v4662_v52  ;;  %v4739_v58 = vpack.c.bf16 %v4733_v62, %v4733_v62  ;;  %v11229_v46 = vld [vmem:[%s13981_s3 + $0x1a4] ss:$8 sps:$4 sm:$0xff]   ;;  %v11227_v52 = vld [vmem:[%s13981_s3 + $0x1a0] ss:$8 sps:$4 sm:$0xff]   ;;  %v11232_v62 = vld [vmem:[%s13981_s3 + $0xb4] ss:$8 sps:$4 sm:$0xff]  }
 0x6da   :  { %5156 = vmatprep.mubr.bf16.mxu0 %v4737_v57  ;;  %5197 = vmatprep.mubr.bf16.mxu1 %v4739_v58  ;;  %v11235_v57 = vld [vmem:[%s13981_s3 + $0x1b4] ss:$8 sps:$4 sm:$0xff]   ;;  %v11230_v58 = vld [vmem:[%s13981_s3 + $0xb0] ss:$8 sps:$4 sm:$0xff]  }
 0x6db   :  { %5157 = vmatmul.mubr.bf16.vlgmr.msra.gmra.mrb[36].mxu0 %v4736_v5  ;;  %5198 = vmatmul.mubr.bf16.vlgmr.msra.gmra.mrb[36].mxu1 %v4738_v17  ;;  %v11224_v5 = vld [vmem:[%s13981_s3 + $0xa0] ss:$8 sps:$4 sm:$0xff]   ;;  %v11241_v17 = vld [vmem:[%s13981_s3 + $0x1c4] ss:$8 sps:$4 sm:$0xff]  }
 0x6dc   :  { %5527 = vmatpush1.bf16.msra.mxu0 %v11164_v60  ;;  %5568 = vmatpush1.bf16.msra.mxu1 %v11167_v16  ;;  %v11233_v60 = vld [vmem:[%s13981_s3 + $0x1b0] ss:$8 sps:$4 sm:$0xff]   ;;  %v11238_v16 = vld [vmem:[%s13981_s3 + $0xc4] ss:$8 sps:$4 sm:$0xff]  }
 0x6dd   :  { %5558 = vmatprep.mubr.bf16.mxu0 %v4527_v23  ;;  %5599 = vmatprep.mubr.bf16.mxu1 %v4529_v21  ;;  %v11244_v21 = vld [vmem:[%s13981_s3 + $0xd4] ss:$8 sps:$4 sm:$0xff]  }
 0x6de   :  { %5528 = vmatprep.subr.bf16.mxu0 %v11172_v18  ;;  %5569 = vmatprep.subr.bf16.mxu1 %v11175_v20  ;;  %v11236_v18 = vld [vmem:[%s13981_s3 + $0xc0] ss:$8 sps:$4 sm:$0xff]   ;;  %v11247_v23 = vld [vmem:[%s13981_s3 + $0x1d4] ss:$8 sps:$4 sm:$0xff]  }
 0x6df   :  { %v11239_v20 = vld [vmem:[%s13981_s3 + $0x1c0] ss:$8 sps:$4 sm:$0xff]  }
 0x6e0   :  { %5529 = vmatpush1.bf16.msra.mxu0 %v11170_v24  ;;  %5570 = vmatpush1.bf16.msra.mxu1 %v11173_v25  ;;  %v11242_v24 = vld [vmem:[%s13981_s3 + $0xd0] ss:$8 sps:$4 sm:$0xff]  }
 0x6e1   :  { %5530 = vmatprep.subr.bf16.mxu0 %v11178_v15  ;;  %5571 = vmatprep.subr.bf16.mxu1 %v11181_v26  ;;  %v11245_v25 = vld [vmem:[%s13981_s3 + $0x1d0] ss:$8 sps:$4 sm:$0xff]   ;;  %v11250_v15 = vld [vmem:[%s13981_s3 + $0xe4] ss:$8 sps:$4 sm:$0xff]  }
 0x6e2   :  { %v11253_v26 = vld [vmem:[%s13981_s3 + $0x1e4] ss:$8 sps:$4 sm:$0xff]  }
 0x6e4   :  { %5531 = vmatpush1.bf16.msra.mxu0 %v11176_v27  ;;  %5572 = vmatpush1.bf16.msra.mxu1 %v11179_v51  ;;  %v11248_v27 = vld [vmem:[%s13981_s3 + $0xe0] ss:$8 sps:$4 sm:$0xff]  }
 0x6e5   :  { %5532 = vmatprep.subr.bf16.mxu0 %v11184_v32  ;;  %5573 = vmatprep.subr.bf16.mxu1 %v11187_v39  ;;  %v11251_v51 = vld [vmem:[%s13981_s3 + $0x1e0] ss:$8 sps:$4 sm:$0xff]   ;;  %v11256_v32 = vld [vmem:[%s13981_s3 + $0xf4] ss:$8 sps:$4 sm:$0xff]  }
 0x6e6   :  { %v11259_v39 = vld [vmem:[%s13981_s3 + $0x1f4] ss:$8 sps:$4 sm:$0xff]  }
 0x6e8   :  { %5533 = vmatpush1.bf16.msra.mxu0 %v11182_v54  ;;  %5574 = vmatpush1.bf16.msra.mxu1 %v11185_v0  ;;  %v11254_v54 = vld [vmem:[%s13981_s3 + $0xf0] ss:$8 sps:$4 sm:$0xff]  }
 0x6e9   :  { %5534 = vmatprep.subr.bf16.mxu0 %v11190_v50  ;;  %5575 = vmatprep.subr.bf16.mxu1 %v11193_v14  ;;  %v11257_v0 = vld [vmem:[%s13981_s3 + $0x1f0] ss:$8 sps:$4 sm:$0xff]   ;;  %v4528_v50 = vpack.c.bf16 %v13153_v59, %v13153_v59  ;;  %v4526_v14 = vpack.c.bf16 %v13155_v1, %v13155_v1  ;;  %v11262_v59 = vld [vmem:[%s13981_s3 + $0x504] ss:$8 sps:$4 sm:$0xff]   ;;  %v11277_v1 = vld [vmem:[%s13981_s3 + $0x554] ss:$8 sps:$4 sm:$0xff]  }
 0x6ec   :  { %5535 = vmatpush1.bf16.msra.mxu0 %v11188_v4  ;;  %5576 = vmatpush1.bf16.msra.mxu1 %v11191_v22  ;;  %v11308_v4 = vld [vmem:[%s13981_s3 + $0x400] ss:$8 sps:$4 sm:$0xff]   ;;  %v11310_v22 = vld [vmem:[%s13981_s3 + $0x404] ss:$8 sps:$4 sm:$0xff]  }
 0x6ed   :  { %5536 = vmatprep.subr.bf16.mxu0 %v11196_v28  ;;  %5577 = vmatprep.subr.bf16.mxu1 %v11199_v29  ;;  %v11313_v28 = vld [vmem:[%s13981_s3 + $0x414] ss:$8 sps:$4 sm:$0xff]   ;;  %v11275_v29 = vld [vmem:[%s13981_s3 + $0x550] ss:$8 sps:$4 sm:$0xff]  }
 0x6f0   :  { %5537 = vmatpush1.bf16.msra.mxu0 %v11194_v31  ;;  %5578 = vmatpush1.bf16.msra.mxu1 %v11197_v33  ;;  %v11311_v31 = vld [vmem:[%s13981_s3 + $0x410] ss:$8 sps:$4 sm:$0xff]   ;;  %v11280_v33 = vld [vmem:[%s13981_s3 + $0x564] ss:$8 sps:$4 sm:$0xff]  }
 0x6f1   :  { %5538 = vmatprep.subr.bf16.mxu0 %v11202_v34  ;;  %5579 = vmatprep.subr.bf16.mxu1 %v11205_v35  ;;  %v11316_v34 = vld [vmem:[%s13981_s3 + $0x424] ss:$8 sps:$4 sm:$0xff]   ;;  %v11278_v35 = vld [vmem:[%s13981_s3 + $0x560] ss:$8 sps:$4 sm:$0xff]  }
 0x6f4   :  { %5539 = vmatpush1.bf16.msra.mxu0 %v11200_v36  ;;  %5580 = vmatpush1.bf16.msra.mxu1 %v11203_v37  ;;  %v11314_v36 = vld [vmem:[%s13981_s3 + $0x420] ss:$8 sps:$4 sm:$0xff]   ;;  %v11283_v37 = vld [vmem:[%s13981_s3 + $0x574] ss:$8 sps:$4 sm:$0xff]  }
 0x6f5   :  { %5540 = vmatprep.subr.bf16.mxu0 %v11208_v44  ;;  %5581 = vmatprep.subr.bf16.mxu1 %v11211_v38  ;;  %v11319_v44 = vld [vmem:[%s13981_s3 + $0x434] ss:$8 sps:$4 sm:$0xff]   ;;  %v11281_v38 = vld [vmem:[%s13981_s3 + $0x570] ss:$8 sps:$4 sm:$0xff]  }
 0x6f8   :  { %5541 = vmatpush1.bf16.msra.mxu0 %v11206_v40  ;;  %5582 = vmatpush1.bf16.msra.mxu1 %v11209_v41  ;;  %v11317_v40 = vld [vmem:[%s13981_s3 + $0x430] ss:$8 sps:$4 sm:$0xff]   ;;  %v11286_v41 = vld [vmem:[%s13981_s3 + $0x584] ss:$8 sps:$4 sm:$0xff]  }
 0x6f9   :  { %5542 = vmatprep.subr.bf16.mxu0 %v11214_v42  ;;  %5583 = vmatprep.subr.bf16.mxu1 %v11217_v43  ;;  %v11322_v42 = vld [vmem:[%s13981_s3 + $0x444] ss:$8 sps:$4 sm:$0xff]   ;;  %v11284_v43 = vld [vmem:[%s13981_s3 + $0x580] ss:$8 sps:$4 sm:$0xff]  }
 0x6fc   :  { %5543 = vmatpush1.bf16.msra.mxu0 %v11212_v11  ;;  %5584 = vmatpush1.bf16.msra.mxu1 %v11215_v55  ;;  %v11320_v11 = vld [vmem:[%s13981_s3 + $0x440] ss:$8 sps:$4 sm:$0xff]   ;;  %v11289_v55 = vld [vmem:[%s13981_s3 + $0x594] ss:$8 sps:$4 sm:$0xff]  }
 0x6fd   :  { %5544 = vmatprep.subr.bf16.mxu0 %v11220_v47  ;;  %5585 = vmatprep.subr.bf16.mxu1 %v11223_v2  ;;  %v11325_v47 = vld [vmem:[%s13981_s3 + $0x454] ss:$8 sps:$4 sm:$0xff]   ;;  %v11287_v2 = vld [vmem:[%s13981_s3 + $0x590] ss:$8 sps:$4 sm:$0xff]  }
 0x700   :  { %5545 = vmatpush1.bf16.msra.mxu0 %v11218_v48  ;;  %5586 = vmatpush1.bf16.msra.mxu1 %v11221_v9  ;;  %v11323_v48 = vld [vmem:[%s13981_s3 + $0x450] ss:$8 sps:$4 sm:$0xff]   ;;  %v11292_v9 = vld [vmem:[%s13981_s3 + $0x5a4] ss:$8 sps:$4 sm:$0xff]  }
 0x701   :  { %5546 = vmatprep.subr.bf16.mxu0 %v11226_v19  ;;  %5587 = vmatprep.subr.bf16.mxu1 %v11229_v46  ;;  %v11328_v19 = vld [vmem:[%s13981_s3 + $0x464] ss:$8 sps:$4 sm:$0xff]   ;;  %v11290_v46 = vld [vmem:[%s13981_s3 + $0x5a0] ss:$8 sps:$4 sm:$0xff]  }
 0x704   :  { %5547 = vmatpush1.bf16.msra.mxu0 %v11224_v5  ;;  %5588 = vmatpush1.bf16.msra.mxu1 %v11227_v52  ;;  %v11326_v5 = vld [vmem:[%s13981_s3 + $0x460] ss:$8 sps:$4 sm:$0xff]   ;;  %v11295_v52 = vld [vmem:[%s13981_s3 + $0x5b4] ss:$8 sps:$4 sm:$0xff]  }
 0x705   :  { %5548 = vmatprep.subr.bf16.mxu0 %v11232_v62  ;;  %5589 = vmatprep.subr.bf16.mxu1 %v11235_v57  ;;  %v11331_v62 = vld [vmem:[%s13981_s3 + $0x474] ss:$8 sps:$4 sm:$0xff]   ;;  %v11293_v57 = vld [vmem:[%s13981_s3 + $0x5b0] ss:$8 sps:$4 sm:$0xff]  }
 0x708   :  { %5549 = vmatpush1.bf16.msra.mxu0 %v11230_v58  ;;  %5590 = vmatpush1.bf16.msra.mxu1 %v11233_v60  ;;  %v11329_v58 = vld [vmem:[%s13981_s3 + $0x470] ss:$8 sps:$4 sm:$0xff]   ;;  %v11298_v60 = vld [vmem:[%s13981_s3 + $0x5c4] ss:$8 sps:$4 sm:$0xff]  }
 0x709   :  { %5550 = vmatprep.subr.bf16.mxu0 %v11238_v16  ;;  %5591 = vmatprep.subr.bf16.mxu1 %v11241_v17  ;;  %v11334_v16 = vld [vmem:[%s13981_s3 + $0x484] ss:$8 sps:$4 sm:$0xff]   ;;  %v11296_v17 = vld [vmem:[%s13981_s3 + $0x5c0] ss:$8 sps:$4 sm:$0xff]  }
 0x70c   :  { %5551 = vmatpush1.bf16.msra.mxu0 %v11236_v18  ;;  %5592 = vmatpush1.bf16.msra.mxu1 %v11239_v20  ;;  %v11332_v18 = vld [vmem:[%s13981_s3 + $0x480] ss:$8 sps:$4 sm:$0xff]   ;;  %v11301_v20 = vld [vmem:[%s13981_s3 + $0x5d4] ss:$8 sps:$4 sm:$0xff]  }
 0x70d   :  { %5552 = vmatprep.subr.bf16.mxu0 %v11244_v21  ;;  %5593 = vmatprep.subr.bf16.mxu1 %v11247_v23  ;;  %v11337_v21 = vld [vmem:[%s13981_s3 + $0x494] ss:$8 sps:$4 sm:$0xff]   ;;  %v11299_v23 = vld [vmem:[%s13981_s3 + $0x5d0] ss:$8 sps:$4 sm:$0xff]  }
 0x710   :  { %5553 = vmatpush1.bf16.msra.mxu0 %v11242_v24  ;;  %5594 = vmatpush1.bf16.msra.mxu1 %v11245_v25  ;;  %v11335_v24 = vld [vmem:[%s13981_s3 + $0x490] ss:$8 sps:$4 sm:$0xff]   ;;  %v11304_v25 = vld [vmem:[%s13981_s3 + $0x5e4] ss:$8 sps:$4 sm:$0xff]  }
 0x711   :  { %5554 = vmatprep.subr.bf16.mxu0 %v11250_v15  ;;  %5595 = vmatprep.subr.bf16.mxu1 %v11253_v26  ;;  %v11340_v15 = vld [vmem:[%s13981_s3 + $0x4a4] ss:$8 sps:$4 sm:$0xff]   ;;  %v11302_v26 = vld [vmem:[%s13981_s3 + $0x5e0] ss:$8 sps:$4 sm:$0xff]  }
 0x714   :  { %5555 = vmatpush1.bf16.msra.mxu0 %v11248_v27  ;;  %5596 = vmatpush1.bf16.msra.mxu1 %v11251_v51  ;;  %v11338_v27 = vld [vmem:[%s13981_s3 + $0x4a0] ss:$8 sps:$4 sm:$0xff]   ;;  %v11307_v51 = vld [vmem:[%s13981_s3 + $0x5f4] ss:$8 sps:$4 sm:$0xff]  }
 0x715   :  { %5556 = vmatprep.subr.bf16.mxu0 %v11256_v32  ;;  %5597 = vmatprep.subr.bf16.mxu1 %v11259_v39  ;;  %v11343_v32 = vld [vmem:[%s13981_s3 + $0x4b4] ss:$8 sps:$4 sm:$0xff]   ;;  %v6239_v39 = vld [vmem:[#allocation3 + $0x8] sm:$0xff] }
 0x718   :  { %5557 = vmatpush1.bf16.msra.mxu0 %v11254_v54  ;;  %5598 = vmatpush1.bf16.msra.mxu1 %v11257_v0  ;;  %v11305_v54 = vld [vmem:[%s13981_s3 + $0x5f0] ss:$8 sps:$4 sm:$0xff]  }
 0x719   :  { %10535 = vmatprep.subr.bf16.mxu0 %v12881_v56  ;;  %10539 = vmatprep.subr.bf16.mxu1 %v12884_v53  ;;  %v11260_v56 = vld [vmem:[%s13981_s3 + $0x500] ss:$8 sps:$4 sm:$0xff]   ;;  %v11265_v53 = vld [vmem:[%s13981_s3 + $0x514] ss:$8 sps:$4 sm:$0xff]   ;;  %v6241_v0 = vld [vmem:[#allocation3 + $0x18] sm:$0x3] }
 0x71b   :  { %5559 = vmatmul.mubr.bf16.vlgmr.msra.gmra.mrb[40].mxu0 %v4526_v14  ;;  %5600 = vmatmul.mubr.bf16.vlgmr.msra.gmra.mrb[40].mxu1 %v4528_v50  ;;  %v11341_v50 = vld [vmem:[%s13981_s3 + $0x4b0] ss:$8 sps:$4 sm:$0xff]   ;;  %v11346_v14 = vld [vmem:[%s13981_s3 + $0x4c4] ss:$8 sps:$4 sm:$0xff]  }
 0x71c   :  { %10537 = vmatpush1.bf16.msra.mxu0 %v12892_v61  ;;  %10541 = vmatpush1.bf16.msra.mxu1 %v12894_v6  ;;  %v11263_v61 = vld [vmem:[%s13981_s3 + $0x510] ss:$8 sps:$4 sm:$0xff]   ;;  %v11268_v6 = vld [vmem:[%s13981_s3 + $0x524] ss:$8 sps:$4 sm:$0xff]  }
 0x71d   :  { %9624 = vmatprep.subr.msk.mxu0 %vm137_vm3, %v12898_v7  ;;  %9627 = vmatprep.subr.msk.mxu1 %vm137_vm3, %v12900_v8  ;;  %v11266_v7 = vld [vmem:[%s13981_s3 + $0x520] ss:$8 sps:$4 sm:$0xff]   ;;  %v11271_v8 = vld [vmem:[%s13981_s3 + $0x534] ss:$8 sps:$4 sm:$0xff]  }
 0x71e   :  { %5672 = vmatprep.mubr.f32.mxu0 %v12906_v3  ;;  %5743 = vmatprep.mubr.f32.mxu1 %v12906_v3  ;;  %v11269_v3 = vld [vmem:[%s13981_s3 + $0x530] ss:$8 sps:$4 sm:$0xff]  }
 0x720   :  { %9625 = vmatpush1.msk.msra.mxu0 %vm137_vm3, %v12910_v10  ;;  %9628 = vmatpush1.msk.msra.mxu1 %vm137_vm3, %v12912_v13  ;;  %v11274_v10 = vld [vmem:[%s13981_s3 + $0x544] ss:$8 sps:$4 sm:$0xff]   ;;  %v11272_v13 = vld [vmem:[%s13981_s3 + $0x540] ss:$8 sps:$4 sm:$0xff]  }
 0x721   :  { %6179 = vmatprep.subr.bf16.mxu1 %v11262_v59  ;;  %6138 = vmatprep.subr.bf16.mxu0 %v11310_v22  ;;  %v11439_v59 = vld [vmem:[#allocation8 + $0x108] sm:$0xff]  }
 0x723   :  { %9626 = vmatmul.mubr.msk.f32.vlgmr.msra.gmra.mrb[44].mxu0 %vm2476_vm9, %v11837_v63  ;;  %9629 = vmatmul.mubr.msk.f32.vlgmr.msra.gmra.mrb[44].mxu1 %vm2476_vm9, %v11837_v63 }
 0x724   :  { %6180 = vmatpush1.bf16.msra.mxu1 %v11260_v56  ;;  %6139 = vmatpush1.bf16.msra.mxu0 %v11308_v4  ;;  %v13541_v56 = vpack.c.bf16 %v6241_v0, %v6239_v39  ;;  %v11374_v39 = vld [vmem:[#allocation8 + $0x48] sm:$0xff]  }
 0x725   :  { %6181 = vmatprep.subr.bf16.mxu1 %v11265_v53  ;;  %6140 = vmatprep.subr.bf16.mxu0 %v11313_v28  ;;  %v11344_v53 = vld [vmem:[%s13981_s3 + $0x4c0] ss:$8 sps:$4 sm:$0xff]   ;;  %v11375_v0 = vld [vmem:[#allocation8 + $0x8] sm:$0xff]  }
 0x728   :  { %6182 = vmatpush1.bf16.msra.mxu1 %v11263_v61  ;;  %6141 = vmatpush1.bf16.msra.mxu0 %v11311_v31  ;;  %v11349_v61 = vld [vmem:[%s13981_s3 + $0x4d4] ss:$8 sps:$4 sm:$0xff]  }
 0x729   :  { %6183 = vmatprep.subr.bf16.mxu1 %v11268_v6  ;;  %6142 = vmatprep.subr.bf16.mxu0 %v11316_v34  ;;  %v11347_v6 = vld [vmem:[%s13981_s3 + $0x4d0] ss:$8 sps:$4 sm:$0xff]  }
 0x72c   :  { %6184 = vmatpush1.bf16.msra.mxu1 %v11266_v7  ;;  %6143 = vmatpush1.bf16.msra.mxu0 %v11314_v36  ;;  %v11352_v7 = vld [vmem:[%s13981_s3 + $0x4e4] ss:$8 sps:$4 sm:$0xff]  }
 0x72d   :  { %6185 = vmatprep.subr.bf16.mxu1 %v11271_v8  ;;  %6144 = vmatprep.subr.bf16.mxu0 %v11319_v44  ;;  %v11350_v8 = vld [vmem:[%s13981_s3 + $0x4e0] ss:$8 sps:$4 sm:$0xff]  }
 0x730   :  { %6186 = vmatpush1.bf16.msra.mxu1 %v11269_v3  ;;  %6145 = vmatpush1.bf16.msra.mxu0 %v11317_v40  ;;  %v11355_v3 = vld [vmem:[%s13981_s3 + $0x4f4] ss:$8 sps:$4 sm:$0xff]  }
 0x731   :  { %6187 = vmatprep.subr.bf16.mxu1 %v11274_v10  ;;  %6146 = vmatprep.subr.bf16.mxu0 %v11322_v42  ;;  %v11353_v10 = vld [vmem:[%s13981_s3 + $0x4f0] ss:$8 sps:$4 sm:$0xff]   ;;  %s11563_s3 = scalar_lea.vmem %s8848_s26, 32 }
 0x732   :  { %p11564_p2 = scmp.ne.s32.totalorder %s8848_s26, %s11563_s3  ;;  %p11569_p4 = scmp.lt.s32.totalorder %s11563_s3, %s11563_s3 }
 0x734   :  { %6188 = vmatpush1.bf16.msra.mxu1 %v11272_v13  ;;  %6147 = vmatpush1.bf16.msra.mxu0 %v11320_v11  ;;  %v11356_v13 = vld [vmem:[#allocation8 + $0xc0] sm:$0xff]   ;;  %p11570_p5 = por %p11569_p4, %p11568_p3 }
 0x735   :  { %6189 = vmatprep.subr.bf16.mxu1 %v11277_v1  ;;  %6148 = vmatprep.subr.bf16.mxu0 %v11325_v47 }
 0x736   :  { %p11571_p6 = pnand %p11570_p5, %p11564_p2 }
 0x738   :  { %6190 = vmatpush1.bf16.msra.mxu1 %v11275_v29  ;;  %6149 = vmatpush1.bf16.msra.mxu0 %v11323_v48 }
 0x739   :  { %6191 = vmatprep.subr.bf16.mxu1 %v11280_v33  ;;  %6150 = vmatprep.subr.bf16.mxu0 %v11328_v19 }
 0x73c   :  { %6192 = vmatpush1.bf16.msra.mxu1 %v11278_v35  ;;  %6151 = vmatpush1.bf16.msra.mxu0 %v11326_v5 }
 0x73d   :  { %6193 = vmatprep.subr.bf16.mxu1 %v11283_v37  ;;  %6152 = vmatprep.subr.bf16.mxu0 %v11331_v62  ;;  %v6238_v62 = vld [vmem:[#allocation3] sm:$0xff] }
 0x740   :  { %6194 = vmatpush1.bf16.msra.mxu1 %v11281_v38  ;;  %6153 = vmatpush1.bf16.msra.mxu0 %v11329_v58 }
 0x741   :  { %6195 = vmatprep.subr.bf16.mxu1 %v11286_v41  ;;  %6154 = vmatprep.subr.bf16.mxu0 %v11334_v16  ;;  %v11357_v16 = vld [vmem:[#allocation8 + $0x80] sm:$0xff]  }
 0x744   :  { %6196 = vmatpush1.bf16.msra.mxu1 %v11284_v43  ;;  %6155 = vmatpush1.bf16.msra.mxu0 %v11332_v18  ;;  %v11358_v18 = vld [vmem:[#allocation8 + $0xc8] sm:$0xff]  }
 0x745   :  { %6197 = vmatprep.subr.bf16.mxu1 %v11289_v55  ;;  %6156 = vmatprep.subr.bf16.mxu0 %v11337_v21  ;;  %v11359_v21 = vld [vmem:[#allocation8 + $0x88] sm:$0xff]  }
 0x748   :  { %6198 = vmatpush1.bf16.msra.mxu1 %v11287_v2  ;;  %6157 = vmatpush1.bf16.msra.mxu0 %v11335_v24  ;;  %v13579_v24 = vld [vmem:[#allocation3 + $0x20] sm:$0xff] }
 0x749   :  { %6199 = vmatprep.subr.bf16.mxu1 %v11292_v9  ;;  %6158 = vmatprep.subr.bf16.mxu0 %v11340_v15  ;;  %v11362_v15 = vld [vmem:[#allocation8 + $0xd8] sm:$0xff]  }
 0x74c   :  { %6200 = vmatpush1.bf16.msra.mxu1 %v11290_v46  ;;  %6159 = vmatpush1.bf16.msra.mxu0 %v11338_v27  ;;  %v11363_v27 = vld [vmem:[#allocation8 + $0x98] sm:$0xff]  }
 0x74d   :  { %6201 = vmatprep.subr.bf16.mxu1 %v11295_v52  ;;  %6160 = vmatprep.subr.bf16.mxu0 %v11343_v32  ;;  %v11364_v32 = vld [vmem:[#allocation8 + $0xe0] sm:$0xff]  }
 0x750   :  { %6202 = vmatpush1.bf16.msra.mxu1 %v11293_v57  ;;  %6161 = vmatpush1.bf16.msra.mxu0 %v11341_v50  ;;  %v6240_v57 = vld [vmem:[#allocation3 + $0x10] sm:$0x3]  ;;  %v11366_v50 = vld [vmem:[#allocation8 + $0xe8] sm:$0xff]  }
 0x751   :  { %6203 = vmatprep.subr.bf16.mxu1 %v11298_v60  ;;  %6162 = vmatprep.subr.bf16.mxu0 %v11346_v14  ;;  %v11376_v14 = vld [vmem:[#allocation8 + $0x50] sm:$0xff]  }
 0x754   :  { %6204 = vmatpush1.bf16.msra.mxu1 %v11296_v17  ;;  %6163 = vmatpush1.bf16.msra.mxu0 %v11344_v53  ;;  %v11367_v53 = vld [vmem:[#allocation8 + $0xa8] sm:$0xff]  }
 0x755   :  { %6205 = vmatprep.subr.bf16.mxu1 %v11301_v20  ;;  %6164 = vmatprep.subr.bf16.mxu0 %v11349_v61  ;;  %v13571_v20 = vpack.c.bf16 %v6240_v57, %v6238_v62  ;;  %v11377_v61 = vld [vmem:[#allocation8 + $0x10] sm:$0xff]  }
 0x758   :  { %6206 = vmatpush1.bf16.msra.mxu1 %v11299_v23  ;;  %6165 = vmatpush1.bf16.msra.mxu0 %v11347_v6  ;;  %v11360_v23 = vld [vmem:[#allocation8 + $0xd0] sm:$0xff]  }
 0x759   :  { %6207 = vmatprep.subr.bf16.mxu1 %v11304_v25  ;;  %6166 = vmatprep.subr.bf16.mxu0 %v11352_v7  ;;  %v11361_v25 = vld [vmem:[#allocation8 + $0x90] sm:$0xff]   ;;  %v11378_v7 = vld [vmem:[#allocation8 + $0x58] sm:$0xff]  }
 0x75a   :  { %v11368_v6 = vld [vmem:[#allocation8 + $0xf0] sm:$0xff]  }
 0x75c   :  { %6208 = vmatpush1.bf16.msra.mxu1 %v11302_v26  ;;  %6167 = vmatpush1.bf16.msra.mxu0 %v11350_v8  ;;  %v11372_v26 = vld [vmem:[#allocation8 + $0x40] sm:$0xff]   ;;  %v11369_v8 = vld [vmem:[#allocation8 + $0xb0] sm:$0xff]  }
 0x75d   :  { %6209 = vmatprep.subr.bf16.mxu1 %v11307_v51  ;;  %6168 = vmatprep.subr.bf16.mxu0 %v11355_v3  ;;  %v11373_v51 = vld [vmem:[#allocation8] sm:$0xff]   ;;  %v11379_v3 = vld [vmem:[#allocation8 + $0x18] sm:$0xff]  }
 0x760   :  { %6210 = vmatpush1.bf16.msra.mxu1 %v11305_v54  ;;  %6169 = vmatpush1.bf16.msra.mxu0 %v11353_v10  ;;  %v11365_v54 = vld [vmem:[#allocation8 + $0xa0] sm:$0xff]   ;;  %v11370_v10 = vld [vmem:[#allocation8 + $0xf8] sm:$0xff]  }
 0x761   :  { %10544 = vmatprep.subr.msk.bf16.mxu1 %vm13537_vm11, %v13541_v56  ;;  %9988 = vmatprep.subr.bf16.mxu0 %v11356_v13  ;;  %v11380_v13 = vld [vmem:[#allocation8 + $0x60] sm:$0xff]  }
 0x7ae   :  { %v5158_v1 = vpop.f32.mrb[36].mxu0  ;;  %v5199_v4 = vpop.f32.mrb[36].mxu1 }
 0x7af   :  { %v5200_v22 = vadd.f32 %v5199_v4, %v5158_v1  ;;  %v5160_v28 = vpop.f32.mrb[37].mxu0  ;;  %v5201_v29 = vpop.f32.mrb[37].mxu1  ;;  %v11371_v1 = vld [vmem:[#allocation8 + $0xb8] sm:$0xff]   ;;  %v11381_v4 = vld [vmem:[#allocation8 + $0x20] sm:$0xff]  }
 0x7b0   :  { %v5202_v31 = vadd.f32 %v5201_v29, %v5160_v28  ;;  %v5162_v33 = vpop.f32.mrb[38].mxu0  ;;  %v5203_v34 = vpop.f32.mrb[38].mxu1  ;;  %v11383_v28 = vld [vmem:[#allocation8 + $0x28] sm:$0xff]   ;;  %v11384_v29 = vld [vmem:[#allocation8 + $0x70] sm:$0xff]  }
 0x7b1   :  { %v5163_v35 = vpop.f32.mrb[39].mxu0  ;;  %v5204_v36 = vpop.f32.mrb[39].mxu1  ;;  %v11386_v33 = vld [vmem:[#allocation8 + $0x78] sm:$0xff]  }
 0x7b2   :  { %v11387_v34 = vld [vmem:[#allocation8 + $0x38] sm:$0xff]   ;;  %v11404_v35 = vld [vmem:[#allocation8 + $0x140] sm:$0xff]  }
 0x7ee   :  { %v5560_v37 = vpop.f32.mrb[40].mxu0  ;;  %v5601_v44 = vpop.f32.mrb[40].mxu1 }
 0x7ef   :  { %v5561_v38 = vadd.f32 %v5560_v37, %v5200_v22  ;;  %v5562_v40 = vpop.f32.mrb[41].mxu0  ;;  %v5603_v41 = vpop.f32.mrb[41].mxu1  ;;  %v11382_v22 = vld [vmem:[#allocation8 + $0x68] sm:$0xff]  }
 0x7f0   :  { %v5563_v42 = vadd.f32 %v5562_v40, %v5202_v31  ;;  %v5564_v43 = vpop.f32.mrb[42].mxu0  ;;  %v5605_v11 = vpop.f32.mrb[42].mxu1  ;;  %v11385_v31 = vld [vmem:[#allocation8 + $0x30] sm:$0xff]  }
 0x7f1   :  { %v13567_v55 = vadd.f32 %v5601_v44, %v5561_v38  ;;  %v5565_v47 = vpop.f32.mrb[43].mxu0  ;;  %v5606_v2 = vpop.f32.mrb[43].mxu1 }
 0x7f2   :  { %v13569_v48 = vadd.f32 %v5603_v41, %v5563_v42 }
 0x7f6   :  { %v5674_v9 = vpop.f32.mrb[44].mxu0  ;;  %v5745_v19 = vpop.f32.mrb[44].mxu1 }
 0x7f7   :  { %v5750_v46 = vpack.c.bf16 %v5674_v9, %v5674_v9  ;;  %v5676_v5 = vpop.f32.mrb[45].mxu0  ;;  %v5747_v52 = vpop.f32.mrb[45].mxu1  ;;  %v5752_v17 = vpack.c.bf16 %v5745_v19, %v5745_v19 }
 0x7f8   :  { %v5751_v58 = vpack.c.bf16 %v5676_v5, %v5676_v5  ;;  %v5753_v60 = vpack.c.bf16 %v5747_v52, %v5747_v52 }
 0x7fa   :  { %6170 = vmatprep.mubr.bf16.mxu0 %v5751_v58  ;;  %6211 = vmatprep.mubr.bf16.mxu1 %v5753_v60 }
 0x7fb   :  { %6171 = vmatmul.mubr.bf16.vlgmr.msra.gmra.mrb[48].mxu0 %v5750_v46  ;;  %6212 = vmatmul.mubr.bf16.vlgmr.msra.gmra.mrb[48].mxu1 %v5752_v17 }
 0x7fc   :  { %10547 = vmatpush1.bf16.msk.msra.mxu1 %vm13537_vm11, %v13571_v20  ;;  %9989 = vmatpush3.bf16.msra.mxu0 %v11357_v16  ;;  %v11405_v16 = vld [vmem:[#allocation8 + $0x100] sm:$0xff]  }
 0x7fd   :  { %10550 = vmatprep.subr.msk.bf16.mxu1 %vm13537_vm11, %v13541_v56  ;;  %9990 = vmatprep.subr.bf16.mxu0 %v11358_v18 }
 0x7fe   :  { %6315 = vmatprep.mubr.f32.mxu1 %v13579_v24 }
 0x800   :  { %9991 = vmatpush3.bf16.msra.mxu0 %v11359_v21  ;;  %v11407_v21 = vld [vmem:[#allocation8 + $0x108] sm:$0xff]  }
 0x801   :  { %9992 = vmatprep.subr.bf16.mxu0 %v11360_v23  ;;  %v11408_v23 = vld [vmem:[#allocation8 + $0x150] sm:$0xff]  }
 0x803   :  { %9760 = vmatmul.mubr.msk.f32.vlgmr.msra.gmra.mrb[46].mxu1 %vm6242_vm12, %v14098_v49 }
 0x804   :  { %10553 = vmatpush1.bf16.msk.msra.mxu1 %vm13537_vm11, %v13571_v20  ;;  %9993 = vmatpush3.bf16.msra.mxu0 %v11361_v25 }
 0x805   :  { %6422 = vmatprep.mubr.f32.mxu1 %v13579_v24  ;;  %9994 = vmatprep.subr.bf16.mxu0 %v11362_v15 }
 0x806   :  { %10010 = vmatprep.subr.bf16.mxu1 %v11372_v26  ;;  %v11409_v26 = vld [vmem:[#allocation8 + $0x110] sm:$0xff]  }
 0x807   :  { %9763 = vmatmul.mubr.msk.f32.vlgmr.msra.gmra.mrb[52].mxu1 %vm6242_vm12, %v14099_v12 }
 0x808   :  { %9995 = vmatpush3.bf16.msra.mxu0 %v11363_v27  ;;  %10011 = vmatpush3.bf16.msra.mxu1 %v11373_v51  ;;  %v11410_v51 = vld [vmem:[#allocation8 + $0x158] sm:$0xff]  }
 0x809   :  { %9996 = vmatprep.subr.bf16.mxu0 %v11364_v32  ;;  %10012 = vmatprep.subr.bf16.mxu1 %v11374_v39 }
 0x80c   :  { %9997 = vmatpush3.bf16.msra.mxu0 %v11365_v54  ;;  %10013 = vmatpush3.bf16.msra.mxu1 %v11375_v0  ;;  %v11411_v54 = vld [vmem:[#allocation8 + $0x118] sm:$0xff]  }
 0x80d   :  { %9998 = vmatprep.subr.bf16.mxu0 %v11366_v50  ;;  %10014 = vmatprep.subr.bf16.mxu1 %v11376_v14  ;;  %v11389_v50 = vld [vmem:[#allocation8 + $0x80] sm:$0xff]   ;;  %v11390_v14 = vld [vmem:[#allocation8 + $0xc8] sm:$0xff]  }
 0x810   :  { %9999 = vmatpush3.bf16.msra.mxu0 %v11367_v53  ;;  %10015 = vmatpush3.bf16.msra.mxu1 %v11377_v61  ;;  %v11391_v53 = vld [vmem:[#allocation8 + $0x88] sm:$0xff]   ;;  %v11392_v61 = vld [vmem:[#allocation8 + $0xd0] sm:$0xff]  }
 0x811   :  { %10000 = vmatprep.subr.bf16.mxu0 %v11368_v6  ;;  %10016 = vmatprep.subr.bf16.mxu1 %v11378_v7  ;;  %v11393_v6 = vld [vmem:[#allocation8 + $0x90] sm:$0xff]   ;;  %v11394_v7 = vld [vmem:[#allocation8 + $0xd8] sm:$0xff]  }
 0x814   :  { %10001 = vmatpush3.bf16.msra.mxu0 %v11369_v8  ;;  %10017 = vmatpush3.bf16.msra.mxu1 %v11379_v3  ;;  %v11395_v8 = vld [vmem:[#allocation8 + $0x98] sm:$0xff]   ;;  %v11396_v3 = vld [vmem:[#allocation8 + $0xe0] sm:$0xff]  }
 0x815   :  { %10002 = vmatprep.subr.bf16.mxu0 %v11370_v10  ;;  %10018 = vmatprep.subr.bf16.mxu1 %v11380_v13  ;;  %v11397_v10 = vld [vmem:[#allocation8 + $0xa0] sm:$0xff]   ;;  %v11398_v13 = vld [vmem:[#allocation8 + $0xe8] sm:$0xff]  }
 0x818   :  { %10003 = vmatpush3.bf16.msra.mxu0 %v11371_v1  ;;  %10019 = vmatpush3.bf16.msra.mxu1 %v11381_v4  ;;  %v11399_v1 = vld [vmem:[#allocation8 + $0xa8] sm:$0xff]   ;;  %v11400_v4 = vld [vmem:[#allocation8 + $0xf0] sm:$0xff]  }
 0x819   :  { %10556 = vmatprep.subr.msk.bf16.mxu0 %vm13537_vm11, %v13541_v56  ;;  %10020 = vmatprep.subr.bf16.mxu1 %v11382_v22  ;;  %v11401_v22 = vld [vmem:[#allocation8 + $0xb0] sm:$0xff]  }
 0x81c   :  { %10021 = vmatpush3.bf16.msra.mxu1 %v11383_v28  ;;  %v11402_v28 = vld [vmem:[#allocation8 + $0xf8] sm:$0xff]  }
 0x81d   :  { %10022 = vmatprep.subr.bf16.mxu1 %v11384_v29  ;;  %v11403_v29 = vld [vmem:[#allocation8 + $0xb8] sm:$0xff]  }
 0x820   :  { %10023 = vmatpush3.bf16.msra.mxu1 %v11385_v31  ;;  %v11412_v31 = vld [vmem:[#allocation8 + $0x160] sm:$0xff]  }
 0x821   :  { %10024 = vmatprep.subr.bf16.mxu1 %v11386_v33  ;;  %v11413_v33 = vld [vmem:[#allocation8 + $0x120] sm:$0xff]  }
 0x824   :  { %10025 = vmatpush3.bf16.msra.mxu1 %v11387_v34  ;;  %v11414_v34 = vld [vmem:[#allocation8 + $0x168] sm:$0xff]  }
 0x825   :  { %10032 = vmatprep.subr.bf16.mxu1 %v11404_v35  ;;  %v11415_v35 = vld [vmem:[#allocation8 + $0x128] sm:$0xff]  }
 0x8ce   :  { %v6172_v36 = vpop.f32.mrb[48].mxu0  ;;  %v6213_v37 = vpop.f32.mrb[48].mxu1 }
 0x8cf   :  { %v6214_v44 = vadd.f32 %v6213_v37, %v6172_v36  ;;  %v6174_v38 = vpop.f32.mrb[49].mxu0  ;;  %v6215_v40 = vpop.f32.mrb[49].mxu1  ;;  %v11416_v36 = vld [vmem:[#allocation8 + $0x170] sm:$0xff]  }
 0x8d0   :  { %v6216_v56 = vadd.f32 %v6215_v40, %v6174_v38  ;;  %v6176_v41 = vpop.f32.mrb[50].mxu0  ;;  %v6217_v42 = vpop.f32.mrb[50].mxu1  ;;  %v11417_v37 = vld [vmem:[#allocation8 + $0x130] sm:$0xff]   ;;  %v11419_v38 = vld [vmem:[#allocation8 + $0x138] sm:$0xff]   ;;  %v11420_v40 = vld [vmem:[#allocation8 + $0x40] sm:$0xff]  }
 0x8d1   :  { %v6220_v43 = vadd.f32 %v6214_v44, %v13567_v55  ;;  %v6177_v11 = vpop.f32.mrb[51].mxu0  ;;  %v6218_v47 = vpop.f32.mrb[51].mxu1  ;;  %v11406_v55 = vld [vmem:[#allocation8 + $0x148] sm:$0xff]   ;;  %v11418_v44 = vld [vmem:[#allocation8 + $0x178] sm:$0xff]  }
 0x8d2   :  { %v6221_v2 = vadd.f32 %v6216_v56, %v13569_v48 }
 0x8d3   :  { %v6222_v9 = vadd.f32 %v6220_v43, %v13143_v30 }
 0x8d4   :  { %v6223_v19 = vadd.f32 %v6221_v2, %v13147_v45 }
 0x8d5   :  { %v6224_v46 = vmax.f32 %v6222_v9, 0.0 }
 0x8d6   :  { %v6225_v5 = vmax.f32 %v6223_v19, 0.0  ;;  %v6317_v52 = vpop.f32.mrb[46].mxu1 }
 0x8d7   :  { %v6228_v62 = vrot.slane %v6224_v46, 7  ;;  %v6319_v57 = vpop.f32.mrb[47].mxu1  ;;  %v6322_v17 = vpack.c.bf16 %v6317_v52, %v6317_v52 }
 0x8d8   :  { %v6229_v58 = vrot.slane %v6225_v5, 7  ;;  %v6323_v60 = vpack.c.bf16 %v6319_v57, %v6319_v57 }
 0x8d9   :  { %6233 = vst [vmem:[#allocation3 + $0x20] sm:$0xfe] %v6228_v62  ;;  %6235 = vst [vmem:[#allocation3 + $0x30] sm:$0x1] %v6228_v62 }
 0x8da   :  { %6234 = vst [vmem:[#allocation3 + $0x28] sm:$0xfe] %v6229_v58  ;;  %6236 = vst [vmem:[#allocation3 + $0x38] sm:$0x1] %v6229_v58  ;;  %v6424_v18 = vpop.f32.mrb[52].mxu1  ;;  %6728 = vmatprep.mubr.bf16.mxu1 %v6323_v60  ;;  %v11421_v58 = vld [vmem:[#allocation8] sm:$0xff]  }
 0x8db   :  { %v6426_v48 = vpop.f32.mrb[53].mxu1  ;;  %6729 = vmatmul.mubr.bf16.vlgmr.msra.gmra.mrb[56].mxu1 %v6322_v17  ;;  %v6429_v45 = vpack.c.bf16 %v6424_v18, %v6424_v18 }
 0x8dc   :  { %v6430_v30 = vpack.c.bf16 %v6426_v48, %v6426_v48  ;;  %10033 = vmatpush3.bf16.msra.mxu1 %v11405_v16  ;;  %v11422_v16 = vld [vmem:[#allocation8 + $0x48] sm:$0xff]  }
 0x8dd   :  { %10034 = vmatprep.subr.bf16.mxu1 %v11406_v55  ;;  %v11423_v48 = vld [vmem:[#allocation8 + $0x8] sm:$0xff]  }
 0x8de   :  { %6592 = vmatprep.mubr.bf16.mxu0 %v6430_v30  ;;  %v11424_v30 = vld [vmem:[#allocation8 + $0x50] sm:$0xff]  }
 0x8df   :  { %6593 = vmatmul.mubr.bf16.vlgmr.msra.gmra.mrb[52].mxu0 %v6429_v45 }
 0x8e0   :  { %10559 = vmatpush1.bf16.msk.msra.mxu0 %vm13537_vm11, %v13571_v20  ;;  %6802 = vmatprep.mubr.f32.mxu0 %v13579_v24  ;;  %v6990_v32 = vld [vmem:[#allocation3 + $0x20] sm:$0xff]  ;;  %v6992_v39 = vld [vmem:[#allocation3 + $0x30] sm:$0x3] }
 0x8e1   :  { %v6991_v25 = vld [vmem:[#allocation3 + $0x28] sm:$0xff]  ;;  %v6993_v15 = vld [vmem:[#allocation3 + $0x38] sm:$0x3]  ;;  %10035 = vmatpush3.bf16.msra.mxu1 %v11407_v21  ;;  %v13603_v0 = vpack.c.bf16 %v6992_v39, %v6990_v32  ;;  %v11388_v20 = vld [vmem:[#allocation8 + $0xc0] sm:$0xff]  }
 0x8e2   :  { %v10560_v27 = vpack.c.bf16 %v6993_v15, %v6991_v25  ;;  %10036 = vmatprep.subr.bf16.mxu1 %v11408_v23  ;;  %v11425_v25 = vld [vmem:[#allocation8 + $0x10] sm:$0xff]   ;;  %v11428_v32 = vld [vmem:[#allocation8 + $0x60] sm:$0xff]  }
 0x8e3   :  { %v11429_v39 = vld [vmem:[#allocation8 + $0x20] sm:$0xff]  }
 0x8e4   :  { %10562 = vmatprep.subr.msk.bf16.mxu0 %vm13537_vm11, %v10560_v27 }
 0x8e5   :  { %10037 = vmatpush3.bf16.msra.mxu1 %v11409_v26  ;;  %v11426_v26 = vld [vmem:[#allocation8 + $0x58] sm:$0xff]  }
 0x8e6   :  { %10038 = vmatprep.subr.bf16.mxu1 %v11410_v51  ;;  %v11427_v51 = vld [vmem:[#allocation8 + $0x18] sm:$0xff]  }
 0x8e7   :  { %9798 = vmatmul.mubr.msk.f32.vlgmr.msra.gmra.mrb[46].mxu0 %vm6242_vm12, %v11837_v63 }
 0x8e8   :  { %10565 = vmatpush1.bf16.msk.msra.mxu0 %vm13537_vm11, %v13603_v0  ;;  %7064 = vmatprep.mubr.f32.mxu0 %v13579_v24 }
 0x8e9   :  { %10568 = vmatprep.subr.msk.bf16.mxu0 %vm13537_vm11, %v10560_v27  ;;  %10039 = vmatpush3.bf16.msra.mxu1 %v11411_v54  ;;  %v11437_v54 = vld [vmem:[#allocation8 + $0x100] sm:$0xff]  }
 0x8ea   :  { %10040 = vmatprep.subr.bf16.mxu1 %v11412_v31  ;;  %v11449_v31 = vld [vmem:[#allocation8 + $0x130] sm:$0xff]  }
 0x8eb   :  { %9818 = vmatmul.mubr.msk.f32.vlgmr.msra.gmra.mrb[56].mxu0 %vm6242_vm12, %v14098_v49 }
 0x8ec   :  { %10571 = vmatpush1.bf16.msk.msra.mxu0 %vm13537_vm11, %v13603_v0  ;;  %7169 = vmatprep.mubr.f32.mxu0 %v13579_v24 }
 0x8ed   :  { %10054 = vmatprep.subr.bf16.mxu0 %v11388_v20  ;;  %10041 = vmatpush3.bf16.msra.mxu1 %v11413_v33  ;;  %v11430_v20 = vld [vmem:[#allocation8 + $0x68] sm:$0xff]   ;;  %v11450_v33 = vld [vmem:[#allocation8 + $0x178] sm:$0xff]  }
 0x8ee   :  { %10042 = vmatprep.subr.bf16.mxu1 %v11414_v34  ;;  %v11451_v34 = vld [vmem:[#allocation8 + $0x138] sm:$0xff]  }
 0x8ef   :  { %9821 = vmatmul.mubr.msk.f32.vlgmr.msra.gmra.mrb[58].mxu0 %vm6242_vm12, %v14099_v12 }
 0x8f0   :  { %10055 = vmatpush3.bf16.msra.mxu0 %v11389_v50  ;;  %v11438_v50 = vld [vmem:[#allocation8 + $0x148] sm:$0xff]  }
 0x8f1   :  { %10056 = vmatprep.subr.bf16.mxu0 %v11390_v14  ;;  %10043 = vmatpush3.bf16.msra.mxu1 %v11415_v35  ;;  %v11431_v14 = vld [vmem:[#allocation8 + $0x28] sm:$0xff]  }
 0x8f2   :  { %10044 = vmatprep.subr.bf16.mxu1 %v11416_v36 }
 0x8f4   :  { %10057 = vmatpush3.bf16.msra.mxu0 %v11391_v53  ;;  %v11440_v53 = vld [vmem:[#allocation8 + $0x150] sm:$0xff]  }
 0x8f5   :  { %10058 = vmatprep.subr.bf16.mxu0 %v11392_v61  ;;  %10045 = vmatpush3.bf16.msra.mxu1 %v11417_v37  ;;  %v11433_v61 = vld [vmem:[#allocation8 + $0x30] sm:$0xff]  }
 0x8f6   :  { %10046 = vmatprep.subr.bf16.mxu1 %v11418_v44 }
 0x8f8   :  { %10059 = vmatpush3.bf16.msra.mxu0 %v11393_v6  ;;  %v11441_v6 = vld [vmem:[#allocation8 + $0x110] sm:$0xff]  }
 0x8f9   :  { %10060 = vmatprep.subr.bf16.mxu0 %v11394_v7  ;;  %10047 = vmatpush3.bf16.msra.mxu1 %v11419_v38  ;;  %v11434_v7 = vld [vmem:[#allocation8 + $0x78] sm:$0xff]   ;;  %v13638_v38 = vld [vmem:[%s13984_s6] ss:$0 sm:$0xff] }
 0x8fa   :  { %10076 = vmatprep.subr.bf16.mxu1 %v11420_v40 }
 0x8fc   :  { %10061 = vmatpush3.bf16.msra.mxu0 %v11395_v8  ;;  %v11435_v8 = vld [vmem:[#allocation8 + $0x38] sm:$0xff]  }
 0x8fd   :  { %10062 = vmatprep.subr.bf16.mxu0 %v11396_v3 }
 0x900   :  { %10063 = vmatpush3.bf16.msra.mxu0 %v11397_v10  ;;  %v11442_v10 = vld [vmem:[#allocation8 + $0x158] sm:$0xff]  }
 0x901   :  { %10064 = vmatprep.subr.bf16.mxu0 %v11398_v13  ;;  %v11443_v13 = vld [vmem:[#allocation8 + $0x118] sm:$0xff]  }
 0x904   :  { %10065 = vmatpush3.bf16.msra.mxu0 %v11399_v1  ;;  %v11444_v1 = vld [vmem:[#allocation8 + $0x160] sm:$0xff]  }
 0x905   :  { %10066 = vmatprep.subr.bf16.mxu0 %v11400_v4  ;;  %v11445_v4 = vld [vmem:[#allocation8 + $0x120] sm:$0xff]  }
 0x908   :  { %10067 = vmatpush3.bf16.msra.mxu0 %v11401_v22  ;;  %v11446_v22 = vld [vmem:[#allocation8 + $0x168] sm:$0xff]  }
 0x909   :  { %10068 = vmatprep.subr.bf16.mxu0 %v11402_v28  ;;  %v11447_v28 = vld [vmem:[#allocation8 + $0x128] sm:$0xff]  }
 0x90c   :  { %10069 = vmatpush3.bf16.msra.mxu0 %v11403_v29  ;;  %v11448_v29 = vld [vmem:[#allocation8 + $0x170] sm:$0xff]  }
 0x90d   :  { %10574 = vmatprep.subr.msk.bf16.mxu0 %vm13537_vm11, %v10560_v27  ;;  %v11436_v27 = vld [vmem:[#allocation8 + $0x140] sm:$0xff]  }
 0x9ae   :  { %v10026_v56 = vpop.f32.mrb[56].mxu1 }
 0x9af   :  { %v10027_v41 = vpop.f32.mrb[57].mxu1 }
 0x9b0   :  { %v10028_v42 = vadd.f32 %v10027_v41, %v10026_v56  ;;  %v10029_v43 = vpop.f32.mrb[58].mxu1 }
 0x9b1   :  { %v10030_v11 = vpop.f32.mrb[59].mxu1 }
 0x9b2   :  { %v10004_v47 = vpop.f32.mrb[52].mxu0 }
 0x9b3   :  { %v10005_v2 = vpop.f32.mrb[53].mxu0 }
 0x9b4   :  { %v10006_v9 = vadd.f32 %v10005_v2, %v10004_v47  ;;  %v10007_v19 = vpop.f32.mrb[54].mxu0 }
 0x9b5   :  { %v10008_v46 = vpop.f32.mrb[55].mxu0 }
 0x9b6   :  { %v13623_v5 = vadd.f32 %v10028_v42, %v10006_v9 }
 0x9ba   :  { %v6804_v52 = vpop.f32.mrb[46].mxu0 }
 0x9bb   :  { %v6806_v62 = vpop.f32.mrb[47].mxu0  ;;  %v6809_v60 = vpack.c.bf16 %v6804_v52, %v6804_v52 }
 0x9bc   :  { %v6810_v57 = vpack.c.bf16 %v6806_v62, %v6806_v62 }
 0x9be   :  { %6972 = vmatprep.mubr.bf16.mxu1 %v6810_v57  ;;  %v7066_v17 = vpop.f32.mrb[56].mxu0 }
 0x9bf   :  { %6973 = vmatmul.mubr.bf16.vlgmr.msra.gmra.mrb[60].mxu1 %v6809_v60  ;;  %v7068_v55 = vpop.f32.mrb[57].mxu0  ;;  %v7071_v3 = vpack.c.bf16 %v7066_v17, %v7066_v17  ;;  %v13668_v60 = vld [vmem:[%s13985_s7 + $0x8] sm:$0xff]   ;;  %v13688_v17 = vld [vmem:[%s13985_s7 + $0x10] sm:$0xff]  }
 0x9c0   :  { %v7072_v18 = vpack.c.bf16 %v7068_v55, %v7068_v55  ;;  %10077 = vmatpush3.bf16.msra.mxu1 %v11421_v58  ;;  %v13659_v58 = vld [vmem:[%s13985_s7 + $0x40] sm:$0xff]   ;;  %v13695_v55 = vld [vmem:[%s13985_s7 + $0x50] sm:$0xff]  }
 0x9c1   :  { %10078 = vmatprep.subr.bf16.mxu1 %v11422_v16  ;;  %v13677_v16 = vld [vmem:[%s13985_s7 + $0x48] sm:$0xff]  }
 0x9c2   :  { %v7171_v45 = vpop.f32.mrb[58].mxu0  ;;  %7474 = vmatprep.mubr.bf16.mxu1 %v7072_v18  ;;  %v13702_v18 = vld [vmem:[%s13985_s7 + $0x18] sm:$0xff]  }
 0x9c3   :  { %v7173_v21 = vpop.f32.mrb[59].mxu0  ;;  %v7176_v15 = vpack.c.bf16 %v7171_v45, %v7171_v45 }
 0x9c4   :  { %v7177_v23 = vpack.c.bf16 %v7173_v21, %v7173_v21  ;;  %10079 = vmatpush3.bf16.msra.mxu1 %v11423_v48 }
 0x9c5   :  { %10080 = vmatprep.subr.bf16.mxu1 %v11424_v30  ;;  %v13709_v30 = vld [vmem:[%s13985_s7 + $0x58] sm:$0xff]  }
 0x9c6   :  { %7338 = vmatprep.mubr.bf16.mxu0 %v7177_v23 }
 0x9c7   :  { %7339 = vmatmul.mubr.bf16.vlgmr.msra.gmra.mrb[60].mxu0 %v7176_v15 }
 0x9c8   :  { %10081 = vmatpush3.bf16.msra.mxu1 %v11425_v25  ;;  %10577 = vmatpush1.bf16.msk.msra.mxu0 %vm13537_vm11, %v13603_v0  ;;  %v11432_v0 = vld [vmem:[#allocation8 + $0x70] sm:$0xff]  }
 0x9c9   :  { %10082 = vmatprep.subr.bf16.mxu1 %v11426_v26  ;;  %7546 = vmatprep.mubr.f32.mxu0 %v13579_v24  ;;  %v13716_v25 = vld [vmem:[%s13985_s7 + $0x20] sm:$0xff]  }
 0x9ca   :  { %10098 = vmatprep.subr.bf16.mxu0 %v11436_v27  ;;  %v13723_v27 = vld [vmem:[%s13985_s7 + $0x60] sm:$0xff]  }
 0x9cc   :  { %10083 = vmatpush3.bf16.msra.mxu1 %v11427_v51  ;;  %v13732_v51 = vld [vmem:[%s13985_s7 + $0x68] sm:$0xff]  }
 0x9cd   :  { %10084 = vmatprep.subr.bf16.mxu1 %v11428_v32  ;;  %v13739_v32 = vld [vmem:[%s13985_s7 + $0x70] sm:$0xff]  }
 0x9cf   :  { %9856 = vmatmul.mubr.msk.f32.vlgmr.msra.gmra.mrb[64].mxu0 %vm6242_vm12, %v11837_v63 }
 0x9d0   :  { %10085 = vmatpush3.bf16.msra.mxu1 %v11429_v39  ;;  %10099 = vmatpush3.bf16.msra.mxu0 %v11437_v54  ;;  %v13747_v39 = vld [vmem:[%s13985_s7 + $0x28] sm:$0xff]   ;;  %v13754_v54 = vld [vmem:[%s13985_s7 + $0x78] sm:$0xff]  }
 0x9d1   :  { %10086 = vmatprep.subr.bf16.mxu1 %v11430_v20  ;;  %10100 = vmatprep.subr.bf16.mxu0 %v11438_v50  ;;  %v13759_v20 = vld [vmem:[%s13985_s7 + $0x30] sm:$0xff]   ;;  %v13768_v50 = vld [vmem:[%s13985_s7 + $0x38] sm:$0xff]  }
 0x9d4   :  { %10087 = vmatpush3.bf16.msra.mxu1 %v11431_v14  ;;  %10101 = vmatpush3.bf16.msra.mxu0 %v11439_v59 }
 0x9d5   :  { %10088 = vmatprep.subr.bf16.mxu1 %v11432_v0  ;;  %10102 = vmatprep.subr.bf16.mxu0 %v11440_v53 }
 0x9d8   :  { %10089 = vmatpush3.bf16.msra.mxu1 %v11433_v61  ;;  %10103 = vmatpush3.bf16.msra.mxu0 %v11441_v6 }
 0x9d9   :  { %10090 = vmatprep.subr.bf16.mxu1 %v11434_v7  ;;  %10104 = vmatprep.subr.bf16.mxu0 %v11442_v10 }
 0x9dc   :  { %10091 = vmatpush3.bf16.msra.mxu1 %v11435_v8  ;;  %10105 = vmatpush3.bf16.msra.mxu0 %v11443_v13 }
 0x9dd   :  { %10274 = vmatprep.subr.mxu1 %v13579_v24  ;;  %10106 = vmatprep.subr.bf16.mxu0 %v11444_v1 }
 0x9df   :  { %7475 = vmatmul.mubr.bf16.vlgmr.msra.gmra.mrb[64].mxu1 %v7071_v3 }
 0x9e0   :  { %10107 = vmatpush3.bf16.msra.mxu0 %v11445_v4  ;;  %10276 = vmatprep.mubr.msk.f32.mxu1 %vm11624_vm13, %v13579_v24 }
 0x9e1   :  { %10108 = vmatprep.subr.bf16.mxu0 %v11446_v22 }
 0x9e4   :  { %10109 = vmatpush3.bf16.msra.mxu0 %v11447_v28  ;;  %v13783_v28 = vld [vmem:[%s13985_s7 + $0x80] sm:$0xff]  }
 0x9e5   :  { %10110 = vmatprep.subr.bf16.mxu0 %v11448_v29  ;;  %v13791_v29 = vld [vmem:[%s13985_s7 + $0x88] sm:$0xff]  }
 0x9e8   :  { %10111 = vmatpush3.bf16.msra.mxu0 %v11449_v31 }
 0x9e9   :  { %10112 = vmatprep.subr.bf16.mxu0 %v11450_v33  ;;  %v13804_v33 = vld [vmem:[%s13985_s7 + $0x90] sm:$0xff]  }
 0x9ec   :  { %10113 = vmatpush3.bf16.msra.mxu0 %v11451_v34  ;;  %v13819_v34 = vld [vmem:[%s13985_s7 + $0x98] sm:$0xff]  }
 0x9ed   :  { %10304 = vmatprep.subr.bf16.mxu0 %v13579_v24 }
 0xa92   :  { %v10048_v35 = vpop.f32.mrb[60].mxu1 }
 0xa93   :  { %v10049_v36 = vpop.f32.mrb[61].mxu1 }
 0xa94   :  { %v10050_v37 = vadd.f32 %v10049_v36, %v10048_v35  ;;  %v10051_v44 = vpop.f32.mrb[62].mxu1  ;;  %v13850_v35 = vld [vmem:[%s13985_s7 + $0xb0] sm:$0xff]   ;;  %v11475_v36 = vld [vmem:[%s13985_s7 + $0xb8] sm:$0xff]  }
 0xa95   :  { %v10052_v40 = vpop.f32.mrb[63].mxu1 }
 0xa96   :  { %v6980_v56 = vadd.f32 %v10050_v37, %v13623_v5  ;;  %v13649_v5 = vld [vmem:[%s13985_s7] sm:$0xff]  }
 0xa98   :  { %v6987_v41 = vadd.f32 %v13638_v38, %v6980_v56 }
 0xa9a   :  { %v6988_v42 = vmax.f32 %v6987_v41, 0.0  ;;  %v10070_v43 = vpop.f32.mrb[60].mxu0 }
 0xa9b   :  { %v10071_v11 = vpop.f32.mrb[61].mxu0 }
 0xa9c   :  { %6989 = vst [vmem:[#allocation4 + $0x1] sm:$0xf] %v6988_v42  ;;  %v10072_v47 = vadd.f32 %v10071_v11, %v10070_v43  ;;  %v10073_v2 = vpop.f32.mrb[62].mxu0 }
 0xa9d   :  { %v10074_v9 = vpop.f32.mrb[63].mxu0 }
 0xaa2   :  { %v7548_v19 = vpop.f32.mrb[64].mxu0 }
 0xaa3   :  { %v7550_v46 = vpop.f32.mrb[65].mxu0  ;;  %v13642_v52 = vld [vmem:[#allocation4] sm:$0x3f]  ;;  %v7553_v57 = vpack.c.bf16 %v7548_v19, %v7548_v19 }
 0xaa4   :  { %v7554_v62 = vpack.c.bf16 %v7550_v46, %v7550_v46  ;;  %10275 = vmatpush3.msk.msra.mxu1 %vm7733_vm14, %v13642_v52 }
 0xaa5   :  { %10277 = vmatmul.mubr.msk.f32.vlgmr.msra.gmra.mrb[54].mxu1 %vm7730_vm15, %v14098_v49  ;;  %10279 = vmatprep.subr.mxu1 %v13579_v24 }
 0xaa6   :  { %7715 = vmatprep.mubr.bf16.mxu0 %v7554_v62  ;;  %10280 = vmatpush3.msk.msra.mxu1 %vm7733_vm14, %v13642_v52 }
 0xaa7   :  { %7716 = vmatmul.mubr.bf16.vlgmr.msra.gmra.mrb[68].mxu0 %v7553_v57  ;;  %10281 = vmatprep.mubr.msk.f32.mxu1 %vm11624_vm13, %v13579_v24 }
 0xaa8   :  { %10284 = vmatprep.subr.bf16.mxu1 %v13579_v24  ;;  %10305 = vmatpush3.bf16.msra.mxu0 %v13649_v5 }
 0xaa9   :  { %10282 = vmatmul.mubr.msk.f32.vlgmr.msra.gmra.mrb[68].mxu1 %vm7730_vm15, %v14099_v12  ;;  %10306 = vmatprep.subr.bf16.mxu0 %v13579_v24 }
 0xaaa   :  { %10285 = vmatpush3.bf16.msra.mxu1 %v13659_v58  ;;  %10300 = vmatprep.mubr.msk.bf16.mxu1 %vm11624_vm13, %v13579_v24 }
 0xaab   :  { %10286 = vmatprep.subr.bf16.mxu1 %v13579_v24  ;;  %10320 = vmatprep.mubr.msk.bf16.mxu0 %vm11624_vm13, %v13579_v24 }
 0xaac   :  { %10307 = vmatpush3.bf16.msra.mxu0 %v13668_v60 }
 0xaad   :  { %10308 = vmatprep.subr.bf16.mxu0 %v13579_v24 }
 0xaae   :  { %10287 = vmatpush3.bf16.msra.mxu1 %v13677_v16 }
 0xaaf   :  { %10288 = vmatprep.subr.bf16.mxu1 %v13579_v24 }
 0xab0   :  { %10309 = vmatpush3.bf16.msra.mxu0 %v13688_v17 }
 0xab1   :  { %10310 = vmatprep.subr.bf16.mxu0 %v13579_v24 }
 0xab2   :  { %v10092_v48 = vpop.f32.mrb[64].mxu1  ;;  %10289 = vmatpush3.bf16.msra.mxu1 %v13695_v55 }
 0xab3   :  { %v10093_v45 = vpop.f32.mrb[65].mxu1  ;;  %10290 = vmatprep.subr.bf16.mxu1 %v13579_v24 }
 0xab4   :  { %v10094_v21 = vadd.f32 %v10093_v45, %v10092_v48  ;;  %v10095_v23 = vpop.f32.mrb[66].mxu1  ;;  %10311 = vmatpush3.bf16.msra.mxu0 %v13702_v18 }
 0xab5   :  { %v10096_v15 = vpop.f32.mrb[67].mxu1  ;;  %10312 = vmatprep.subr.bf16.mxu0 %v13579_v24 }
 0xab6   :  { %v7477_v26 = vadd.f32 %v10094_v21, %v10072_v47  ;;  %10291 = vmatpush3.bf16.msra.mxu1 %v13709_v30 }
 0xab7   :  { %10292 = vmatprep.subr.bf16.mxu1 %v13579_v24 }
 0xab8   :  { %10313 = vmatpush3.bf16.msra.mxu0 %v13716_v25 }
 0xab9   :  { %10314 = vmatprep.subr.bf16.mxu0 %v13579_v24 }
 0xaba   :  { %10293 = vmatpush3.bf16.msra.mxu1 %v13723_v27 }
 0xabb   :  { %10294 = vmatprep.subr.bf16.mxu1 %v13579_v24 }
 0xabc   :  { %10315 = vmatpush3.bf16.msra.mxu0 %v13747_v39 }
 0xabd   :  { %10316 = vmatprep.subr.bf16.mxu0 %v13579_v24 }
 0xabe   :  { %10295 = vmatpush3.bf16.msra.mxu1 %v13732_v51 }
 0xabf   :  { %10296 = vmatprep.subr.bf16.mxu1 %v13579_v24 }
 0xac0   :  { %10317 = vmatpush3.bf16.msra.mxu0 %v13759_v20 }
 0xac1   :  { %10318 = vmatprep.subr.bf16.mxu0 %v13579_v24 }
 0xac2   :  { %10297 = vmatpush3.bf16.msra.mxu1 %v13739_v32 }
 0xac3   :  { %10298 = vmatprep.subr.bf16.mxu1 %v13579_v24 }
 0xac4   :  { %10319 = vmatpush3.bf16.msra.mxu0 %v13768_v50 }
 0xac5   :  { %10349 = vmatprep.subr.mxu0 %v13579_v24 }
 0xac6   :  { %10299 = vmatpush3.bf16.msra.mxu1 %v13754_v54 }
 0xac7   :  { %10324 = vmatprep.subr.mxu1 %v13579_v24 }
 0xb78   :  { %v7803_v14 = vpop.f32.mrb[54].mxu1 }
 0xb79   :  { %v7807_v59 = vpack.c.bf16 %v7803_v14, %v7803_v14  ;;  %v10278_v0 = vpop.f32.mrb[55].mxu1 }
 0xb7a   :  { %v10114_v53 = vpop.f32.mrb[68].mxu0 }
 0xb7b   :  { %v10115_v61 = vpop.f32.mrb[69].mxu0  ;;  %10321 = vmatmul.mubr.bf16.vlgmr.msra.gmra.mrb[72].mxu0 %v7807_v59 }
 0xb7c   :  { %v10116_v6 = vadd.f32 %v10115_v61, %v10114_v53  ;;  %v10117_v7 = vpop.f32.mrb[70].mxu0  ;;  %v7892_v8 = vpop.f32.mrb[68].mxu1  ;;  %10351 = vmatprep.mubr.msk.f32.mxu0 %vm11624_vm13, %v13579_v24 }
 0xb7d   :  { %v7896_v3 = vpack.c.bf16 %v7892_v8, %v7892_v8  ;;  %v10118_v10 = vpop.f32.mrb[71].mxu0  ;;  %v10283_v13 = vpop.f32.mrb[69].mxu1 }
 0xb7e   :  { %v7723_v1 = vadd.f32 %v10116_v6, %v7477_v26  ;;  %v8648_v10 = vld [vmem:[%s13987_s9 + $0x8] sm:$0xff] }
 0xb7f   :  { %10301 = vmatmul.mubr.bf16.vlgmr.msra.gmra.mrb[72].mxu1 %v7896_v3  ;;  %v8647_v3 = vld [vmem:[%s13987_s9] sm:$0xff] }
 0xb80   :  { %v7724_v4 = vadd.f32 %v13638_v38, %v7723_v1  ;;  %10325 = vmatpush3.msk.msra.mxu1 %vm7733_vm14, %v13642_v52  ;;  %10326 = vmatprep.mubr.msk.f32.mxu1 %vm11624_vm13, %v13579_v24  ;;  %v10579_v1 = vpack.c.bf16 %v8648_v10, %v8647_v3 }
 0xb81   :  { %10329 = vmatprep.subr.bf16.mxu1 %v13579_v24 }
 0xb82   :  { %v7725_v22 = vmax.f32 %v7724_v4, 0.0  ;;  %v8649_v4 = vld [vmem:[%s13987_s9 + $0x10] sm:$0xff] }
 0xb84   :  { %7727 = vst [vmem:[#allocation4 + $0x9] sm:$0xf] %v7725_v22  ;;  %v8650_v22 = vld [vmem:[%s13987_s9 + $0x18] sm:$0xff] }
 0xb87   :  { %10327 = vmatmul.mubr.msk.f32.vlgmr.msra.gmra.mrb[70].mxu1 %vm7730_vm15, %v11837_v63 }
 0xb88   :  { %10330 = vmatpush3.bf16.msra.mxu1 %v13783_v28  ;;  %10345 = vmatprep.mubr.msk.bf16.mxu1 %vm11624_vm13, %v13579_v24 }
 0xb89   :  { %10331 = vmatprep.subr.bf16.mxu1 %v13579_v24 }
 0xb8b   :  { %v13796_v31 = vld [vmem:[#allocation4 + $0x8] sm:$0x3f] }
 0xb8c   :  { %10350 = vmatpush3.msk.msra.mxu0 %vm7733_vm14, %v13796_v31  ;;  %10332 = vmatpush3.bf16.msra.mxu1 %v13791_v29 }
 0xb8d   :  { %10352 = vmatmul.mubr.msk.f32.vlgmr.msra.gmra.mrb[66].mxu0 %vm7730_vm15, %v14098_v49  ;;  %10354 = vmatprep.subr.mxu0 %v13579_v24  ;;  %v13832_v49 = vld [vmem:[%s13985_s7 + $0xa0] sm:$0xff]  }
 0xb8e   :  { %10355 = vmatpush3.msk.msra.mxu0 %vm7733_vm14, %v13796_v31  ;;  %10356 = vmatprep.mubr.msk.f32.mxu0 %vm11624_vm13, %v13579_v24 }
 0xb8f   :  { %10333 = vmatprep.subr.bf16.mxu1 %v13579_v24  ;;  %10359 = vmatprep.subr.bf16.mxu0 %v13579_v24 }
 0xb90   :  { %10334 = vmatpush3.bf16.msra.mxu1 %v13804_v33 }
 0xb91   :  { %10357 = vmatmul.mubr.msk.f32.vlgmr.msra.gmra.mrb[76].mxu0 %vm7730_vm15, %v14099_v12  ;;  %10335 = vmatprep.subr.bf16.mxu1 %v13579_v24  ;;  %v13841_v12 = vld [vmem:[%s13985_s7 + $0xa8] sm:$0xff]  }
 0xb92   :  { %10360 = vmatpush3.bf16.msra.mxu0 %v13659_v58  ;;  %10375 = vmatprep.mubr.msk.bf16.mxu0 %vm11624_vm13, %v13579_v24 }
 0xb93   :  { %10361 = vmatprep.subr.bf16.mxu0 %v13579_v24 }
 0xb94   :  { %10336 = vmatpush3.bf16.msra.mxu1 %v13819_v34 }
 0xb95   :  { %10337 = vmatprep.subr.bf16.mxu1 %v13579_v24 }
 0xb96   :  { %10362 = vmatpush3.bf16.msra.mxu0 %v13677_v16 }
 0xb97   :  { %10363 = vmatprep.subr.bf16.mxu0 %v13579_v24 }
 0xb98   :  { %10338 = vmatpush3.bf16.msra.mxu1 %v13832_v49 }
 0xb99   :  { %10339 = vmatprep.subr.bf16.mxu1 %v13579_v24 }
 0xb9a   :  { %10364 = vmatpush3.bf16.msra.mxu0 %v13695_v55 }
 0xb9b   :  { %10365 = vmatprep.subr.bf16.mxu0 %v13579_v24 }
 0xb9c   :  { %10340 = vmatpush3.bf16.msra.mxu1 %v13841_v12 }
 0xb9d   :  { %10341 = vmatprep.subr.bf16.mxu1 %v13579_v24 }
 0xb9e   :  { %10366 = vmatpush3.bf16.msra.mxu0 %v13709_v30 }
 0xb9f   :  { %10367 = vmatprep.subr.bf16.mxu0 %v13579_v24 }
 0xba0   :  { %10342 = vmatpush3.bf16.msra.mxu1 %v13850_v35 }
 0xba1   :  { %10343 = vmatprep.subr.bf16.mxu1 %v13579_v24 }
 0xba2   :  { %10368 = vmatpush3.bf16.msra.mxu0 %v13723_v27 }
 0xba3   :  { %10369 = vmatprep.subr.bf16.mxu0 %v13579_v24 }
 0xba4   :  { %10344 = vmatpush3.bf16.msra.mxu1 %v11475_v36 }
 0xba5   :  { %10379 = vmatprep.subr.bf16.mxu1 %v13579_v24 }
 0xba6   :  { %10370 = vmatpush3.bf16.msra.mxu0 %v13732_v51 }
 0xba7   :  { %10371 = vmatprep.subr.bf16.mxu0 %v13579_v24 }
 0xbaa   :  { %10372 = vmatpush3.bf16.msra.mxu0 %v13739_v32 }
 0xbab   :  { %10373 = vmatprep.subr.bf16.mxu0 %v13579_v24 }
 0xbae   :  { %10374 = vmatpush3.bf16.msra.mxu0 %v13754_v54 }
 0xbaf   :  { %10399 = vmatprep.subr.mxu0 %v13579_v24 }
 0xc4e   :  { %v8084_v37 = vpop.f32.mrb[72].mxu0 }
 0xc4f   :  { %v10322_v44 = vpop.f32.mrb[73].mxu0 }
 0xc50   :  { %v8087_v38 = vpop.f32.mrb[74].mxu0 }
 0xc51   :  { %v10323_v40 = vpop.f32.mrb[75].mxu0 }
 0xc52   :  { %v7996_v56 = vpop.f32.mrb[72].mxu1 }
 0xc53   :  { %v10302_v41 = vpop.f32.mrb[73].mxu1  ;;  %v8085_v42 = vadd.f32 %v8084_v37, %v7996_v56  ;;  %v9942_v56 = vld [vmem:[%s13988_s10] ss:$0 sm:$0xff] }
 0xc54   :  { %v7999_v43 = vpop.f32.mrb[74].mxu1 }
 0xc55   :  { %v10303_v11 = vpop.f32.mrb[75].mxu1 }
 0xc5a   :  { %v8158_v47 = vpop.f32.mrb[70].mxu1 }
 0xc5b   :  { %v8162_v2 = vpack.c.bf16 %v8158_v47, %v8158_v47  ;;  %v10328_v9 = vpop.f32.mrb[71].mxu1 }
 0xc5d   :  { %10346 = vmatmul.mubr.bf16.vlgmr.msra.gmra.mrb[76].mxu1 %v8162_v2 }
 0xc5e   :  { %10380 = vmatpush3.bf16.msra.mxu1 %v13649_v5  ;;  %10395 = vmatprep.mubr.msk.bf16.mxu1 %vm11624_vm13, %v13579_v24  ;;  %v9935_v5 = vld [vmem:[%s13986_s8] ss:$0 sm:$0xff] }
 0xc5f   :  { %10381 = vmatprep.subr.bf16.mxu1 %v13579_v24 }
 0xc60   :  { %v8347_v19 = vpop.f32.mrb[66].mxu0 }
 0xc61   :  { %v10353_v46 = vpop.f32.mrb[67].mxu0 }
 0xc62   :  { %10382 = vmatpush3.bf16.msra.mxu1 %v13668_v60 }
 0xc63   :  { %10383 = vmatprep.subr.bf16.mxu1 %v13579_v24 }
 0xc64   :  { %v8418_v52 = vpop.f32.mrb[76].mxu0 }
 0xc65   :  { %v8422_v62 = vpack.c.bf16 %v8418_v52, %v8418_v52  ;;  %v10358_v57 = vpop.f32.mrb[77].mxu0  ;;  %v8746_v52 = vld [vmem:[%s13989_s11 + $0x8] sm:$0xff] }
 0xc66   :  { %10384 = vmatpush3.bf16.msra.mxu1 %v13688_v17  ;;  %v8747_v57 = vld [vmem:[%s13989_s11 + $0x10] sm:$0xff] }
 0xc67   :  { %10376 = vmatmul.mubr.bf16.vlgmr.msra.gmra.mrb[80].mxu0 %v8422_v62  ;;  %10385 = vmatprep.subr.bf16.mxu1 %v13579_v24 }
 0xc68   :  { %10400 = vmatpush3.msk.msra.mxu0 %vm7733_vm14, %v13796_v31  ;;  %10401 = vmatprep.mubr.msk.f32.mxu0 %vm11624_vm13, %v13579_v24  ;;  %v11626_v31 = vmov 0.0|0.0  }
 0xc69   :  { %10404 = vmatprep.subr.bf16.mxu0 %v13579_v24 }
 0xc6a   :  { %10386 = vmatpush3.bf16.msra.mxu1 %v13702_v18 }
 0xc6b   :  { %10387 = vmatprep.subr.bf16.mxu1 %v13579_v24 }
 0xc6e   :  { %10388 = vmatpush3.bf16.msra.mxu1 %v13716_v25 }
 0xc6f   :  { %10402 = vmatmul.mubr.msk.f32.vlgmr.msra.gmra.mrb[78].mxu0 %vm7730_vm15, %v11837_v63  ;;  %10389 = vmatprep.subr.bf16.mxu1 %v13579_v24  ;;  %v8351_v63 = vpack.c.bf16 %v8347_v19, %v8347_v19 }
 0xc70   :  { %10405 = vmatpush3.bf16.msra.mxu0 %v13783_v28  ;;  %10420 = vmatprep.mubr.msk.bf16.mxu0 %vm11624_vm13, %v13579_v24 }
 0xc71   :  { %10406 = vmatprep.subr.bf16.mxu0 %v13579_v24 }
 0xc72   :  { %10390 = vmatpush3.bf16.msra.mxu1 %v13747_v39 }
 0xc73   :  { %10391 = vmatprep.subr.bf16.mxu1 %v13579_v24 }
 0xc74   :  { %10407 = vmatpush3.bf16.msra.mxu0 %v13791_v29 }
 0xc75   :  { %10408 = vmatprep.subr.bf16.mxu0 %v13579_v24 }
 0xc76   :  { %10392 = vmatpush3.bf16.msra.mxu1 %v13759_v20 }
 0xc77   :  { %10393 = vmatprep.subr.bf16.mxu1 %v13579_v24 }
 0xc78   :  { %10409 = vmatpush3.bf16.msra.mxu0 %v13804_v33  ;;  %v10582_v33 = vpack.c.bf16 %v8650_v22, %v8649_v4 }
 0xc79   :  { %10410 = vmatprep.subr.bf16.mxu0 %v13579_v24 }
 0xc7a   :  { %10394 = vmatpush3.bf16.msra.mxu1 %v13768_v50 }
 0xc7b   :  { %10578 = vmatprep.subr.bf16.mxu1 %v11626_v31 }
 0xc7c   :  { %10411 = vmatpush3.bf16.msra.mxu0 %v13819_v34 }
 0xc7d   :  { %10396 = vmatmul.mubr.bf16.vlgmr.msra.gmra.mrb[80].mxu1 %v8351_v63  ;;  %10412 = vmatprep.subr.bf16.mxu0 %v13579_v24  ;;  %v8748_v63 = vld [vmem:[%s13989_s11 + $0x18] sm:$0xff] }
 0xc7e   :  { %10432 = vmatprep.mubr.msk.f32.mxu1 %vm11624_vm13, %v13579_v24  ;;  %10580 = vmatpush3.bf16.msra.mxu1 %v10579_v1 }
 0xc7f   :  { %10581 = vmatprep.subr.bf16.mxu1 %v11626_v31 }
 0xc80   :  { %10413 = vmatpush3.bf16.msra.mxu0 %v13832_v49 }
 0xc81   :  { %10414 = vmatprep.subr.bf16.mxu0 %v13579_v24 }
 0xc82   :  { %10583 = vmatpush3.bf16.msra.mxu1 %v10582_v33 }
 0xc83   :  { %10584 = vmatprep.subr.bf16.mxu1 %v11626_v31 }
 0xc84   :  { %10415 = vmatpush3.bf16.msra.mxu0 %v13841_v12 }
 0xc85   :  { %10416 = vmatprep.subr.bf16.mxu0 %v13579_v24 }
 0xc88   :  { %10417 = vmatpush3.bf16.msra.mxu0 %v13850_v35 }
 0xc89   :  { %10418 = vmatprep.subr.bf16.mxu0 %v13579_v24 }
 0xc8c   :  { %10419 = vmatpush3.bf16.msra.mxu0 %v11475_v36 }
 0xd30   :  { %v8262_v58 = vpop.f32.mrb[76].mxu1 }
 0xd31   :  { %v8268_v60 = vadd.f32 %v8262_v58, %v8085_v42  ;;  %v10347_v16 = vpop.f32.mrb[77].mxu1 }
 0xd32   :  { %v8265_v17 = vpop.f32.mrb[78].mxu1 }
 0xd33   :  { %v8275_v55 = vadd.f32 %v9935_v5, %v8268_v60  ;;  %v10348_v18 = vpop.f32.mrb[79].mxu1 }
 0xd35   :  { %v8276_v48 = vmax.f32 %v8275_v55, 0.0 }
 0xd37   :  { %8618 = vrot.lane.b32.xlu0 %v8276_v48, %s11625_s2  ;;  %v8622_v30 = vrot.slane %v8276_v48, 1 }
 0xd39   :  { %8625 = vrot.lane.b32.xlu1 %v8622_v30, %s11625_s2 }
 0xd3a   :  { %v8457_v45 = vpop.f32.mrb[80].mxu0 }
 0xd3b   :  { %v10377_v21 = vpop.f32.mrb[81].mxu0 }
 0xd3c   :  { %v8460_v23 = vpop.f32.mrb[82].mxu0 }
 0xd3d   :  { %v10378_v25 = vpop.f32.mrb[83].mxu0 }
 0xd42   :  { %v8569_v15 = vpop.f32.mrb[78].mxu0 }
 0xd43   :  { %v8573_v26 = vpack.c.bf16 %v8569_v15, %v8569_v15  ;;  %v10403_v27 = vpop.f32.mrb[79].mxu0 }
 0xd45   :  { %10421 = vmatmul.mubr.bf16.vlgmr.msra.gmra.mrb[84].mxu0 %v8573_v26 }
 0xd50   :  { %v8497_v51 = vpop.f32.mrb[80].mxu1 }
 0xd51   :  { %v8498_v32 = vadd.f32 %v8497_v51, %v8457_v45  ;;  %v10397_v39 = vpop.f32.mrb[81].mxu1 }
 0xd52   :  { %v8500_v54 = vpop.f32.mrb[82].mxu1 }
 0xd53   :  { %v10398_v20 = vpop.f32.mrb[83].mxu1 }
 0xda9   :  { %v8619_v50 = vpop.permute.xlu0 %8618 }
 0xdaa   :  { %v8621_v14 = vadd.f32 %v8619_v50, %v8276_v48 }
 0xdab   :  { %v8626_v0 = vpop.permute.xlu1 %8625 }
 0xdac   :  { %v8624_v59 = vadd.f32 %v8622_v30, %v8621_v14 }
 0xdae   :  { %v8628_v53 = vadd.f32 %v8626_v0, %v8624_v59 }
 0xdb0   :  { %v8629_v61 = vmul.f32 0.25, %v8628_v53 }
 0xdb2   :  { %8631 = vst.msk [vmem:[#allocation11] sm:$0x1] %vm8630_vm0, %v8629_v61 }
 0xe18   :  { %v8608_v6 = vpop.f32.mrb[84].mxu0 }
 0xe19   :  { %v8614_v7 = vadd.f32 %v8608_v6, %v8498_v32  ;;  %v10422_v8 = vpop.f32.mrb[85].mxu0 }
 0xe1a   :  { %v8611_v13 = vpop.f32.mrb[86].mxu0 }
 0xe1b   :  { %v8615_v28 = vadd.f32 %v9935_v5, %v8614_v7  ;;  %v10423_v29 = vpop.f32.mrb[87].mxu0  ;;  %v10588_v5 = vpack.c.bf16 %v8748_v63, %v8747_v57 }
 0xe1d   :  { %v8616_v34 = vmax.f32 %v8615_v28, 0.0 }
 0xe1f   :  { %8633 = vrot.lane.b32.xlu0 %v8616_v34, %s11625_s2  ;;  %v8637_v49 = vrot.slane %v8616_v34, 1 }
 0xe21   :  { %8640 = vrot.lane.b32.xlu1 %v8637_v49, %s11625_s2 }
 0xe91   :  { %v8634_v12 = vpop.permute.xlu0 %8633 }
 0xe92   :  { %v8636_v35 = vadd.f32 %v8634_v12, %v8616_v34 }
 0xe93   :  { %v8641_v37 = vpop.permute.xlu1 %8640 }
 0xe94   :  { %v8639_v36 = vadd.f32 %v8637_v49, %v8636_v35 }
 0xe96   :  { %v8643_v44 = vadd.f32 %v8641_v37, %v8639_v36 }
 0xe98   :  { %v8644_v38 = vmul.f32 0.25, %v8643_v44 }
 0xe9a   :  { %8645 = vst.msk [vmem:[#allocation11 + $0x1] sm:$0x1] %vm8630_vm0, %v8644_v38 }
 0xea1   :  { %v8646_v40 = vld [vmem:[#allocation11] sm:$0x3] }
 0xea2   :  { %10433 = vmatmul.mubr.msk.f32.vlgmr.msra.gmra.mrb[84].mxu1 %vm8658_vm1, %v8646_v40 }
 0xea3   :  { %10443 = vmatprep.mubr.msk.f32.mxu1 %vm11624_vm13, %v13579_v24  ;;  %v8745_v24 = vld [vmem:[%s13989_s11] sm:$0xff] }
 0xea4   :  { %v10585_v62 = vpack.c.bf16 %v8746_v52, %v8745_v24 }
 0xea6   :  { %10586 = vmatpush3.bf16.msra.mxu1 %v10585_v62 }
 0xea7   :  { %10587 = vmatprep.subr.bf16.mxu1 %v11626_v31 }
 0xeaa   :  { %10589 = vmatpush3.bf16.msra.mxu1 %v10588_v5 }
 0xf75   :  { %v8728_v41 = vpop.f32.mrb[84].mxu1 }
 0xf76   :  { %v8729_v42 = vadd.f32 %v9942_v56, %v8728_v41  ;;  %v10434_v43 = vpop.f32.mrb[85].mxu1 }
 0xf78   :  { %v8733_v11 = vsel %vm8732_vm2, %v8729_v42, -inf }
 0xf79   :  { %8734 = vmax.xlane.f32.xlu0 %v8733_v11 }
0x1006   :  { %v8735_v47 = vpop.xlane.xlu0 %8734 }
0x1007   :  { %v8736_v2 = vsub.f32 %v8729_v42, %v8735_v47 }
0x1009   :  { %v8737_v9 = vmul.f32 1.442695, %v8736_v2 }
0x100b   :  { %11476 = vpow2.f32 %v8737_v9 }
0x1015   :  { %v11477_v19 = vpop.eup %11476 }
0x1016   :  { %v8739_v46 = vsel %vm8732_vm2, %v11477_v19, 0.0 }
0x1017   :  { %8740 = vadd.xlane.f32.xlu1 %v8739_v46 }
0x10a4   :  { %v8741_v58 = vpop.xlane.xlu1 %8740 }
0x10a5   :  { %11478 = vrcp.f32 %v8741_v58 }
0x10af   :  { %v11479_v60 = vpop.eup %11478 }
0x10b0   :  { %v8743_v16 = vmul.f32 %v11479_v60, %v11477_v19 }
0x10b2   :  { %v8744_v17 = vmul.f32 %v8743_v16, %v8646_v40 }
0x10b4   :  { %10444 = vmatmul.mubr.msk.f32.vlgmr.msra.gmra.mrb[86].mxu1 %vm8658_vm1, %v8744_v17 }
0x10b5   :  { %11574 = shalt.err (!%p11571_p6)
}
0x10b6   :  { %s11575_s6 = scalar_lea.hbm %s13992_s14, 32 }
0x10b7   :  { %p11576_p7 = scmp.ne.s32.totalorder %s13992_s14, %s11575_s6  ;;  %p11579_p8 = scmp.lt.u32.totalorder %s11575_s6, %s13992_s14 }
0x10b9   :  { %p11581_p9 = pnand %p11579_p8, %p11576_p7 }
0x10bb   :  { %11584 = shalt.err (!%p11581_p9)
}
0x10bc   :  { %8850 = dma.vmem_to_hbm [thread:$0]  %s8848_s26, 32, %s13992_s14, [#allocation12]   ;;  %v9944_v55 = vld [vmem:[%s13990_s12] ss:$0 sm:$0xff]  ;;  %vm8829_vm3 = vcmask 41984  }
0x10bd   :  { %s11628_s16 = smov [#allocation10]  }
0x10be   :  { %s8837_s17 = sshll.u32 %s11628_s16, 4  ;;  %s8838_s17 = int_to_ptr.vmem [resolvable:$true] %s8837_s17 }
0x10bf   :  { %s11585_s18 = scalar_lea.vmem %s8838_s17, 32  ;;  %p11590_p11 = scmp.lt.s32.totalorder %s8838_s17, %s8838_s17 }
0x10c0   :  { %p11586_p10 = scmp.ne.s32.totalorder %s8838_s17, %s11585_s18  ;;  %p11591_p12 = scmp.lt.s32.totalorder %s11585_s18, %s11585_s18 }
0x10c2   :  { %p11592_p13 = por %p11591_p12, %p11590_p11 }
0x10c4   :  { %p11593_p0 = pnand %p11592_p13, %p11586_p10 }
0x1187   :  { %v8825_v18 = vpop.f32.mrb[86].mxu1 }
0x1188   :  { %v8826_v48 = vadd.f32 %v9944_v55, %v8825_v18  ;;  %v10445_v30 = vpop.f32.mrb[87].mxu1 }
0x118a   :  { %8830 = vst.msk [vmem:[#allocation10] sm:$0x3] %vm8829_vm3, %v8826_v48 }
0x118b   :  { %11596 = shalt.err (!%p11593_p0)
}
0x118c   :  { %s11597_s9 = scalar_lea.hbm %s13991_s13, 32 }
0x118d   :  { %p11598_p1 = scmp.ne.s32.totalorder %s13991_s13, %s11597_s9  ;;  %p11601_p2 = scmp.lt.u32.totalorder %s11597_s9, %s13991_s13 }
0x118f   :  { %p11603_p3 = pnand %p11601_p2, %p11598_p1 }
0x1191   :  { %11606 = shalt.err (!%p11603_p3)
}
0x1192   :  { %8840 = dma.vmem_to_hbm [thread:$0]  %s8838_s17, 32, %s13991_s13, [#allocation7]  }
0x1193   :  { %11611 = dma.done.wait [#allocation7], 32  }
0x1194   :  { %11612 = vsyncadd [#allocation7], 4294967264 }
0x1195   :  { %11613 = dma.done.wait [#allocation12], 32  }
0x1196   :  { %11614 = vsyncadd [#allocation12], 4294967264 }
0x1197   :  { %8857 = vsyncpa [#allocation6], 1 }
0x1198   :  { %8858 = vsyncpa [#allocation9], 1 }
0x1199   :  { %8859 = vsyncpa [#allocation7], 1 }
0x119a   :  { %8860 = vsyncpa [#allocation12], 1 }

</bundles_post_ra>
